<compile_context>
chip_gen: v7x
topology: tpu7x:2x2x1
jax: 0.10.0
libtpu: 0.0.40
codegen_flags: <defaults>
</compile_context>

<pallas_src>
import math
import functools

import jax
import jax.numpy as jnp
from jax.experimental import pallas as pl
from jax.experimental.pallas import tpu as pltpu


# ----------------------------------------------------------------------------
# Kernel 1: frontend conv (3 accumulated K=49 MXU GEMMs per frame) + folded BN
#           + PReLU + fused 3x3/s2/p1 spatial max-pool + GAP + trunk Linear+ReLU.
# Grid = (B, num_time_blocks); each step produces Tt output frames and keeps a
# 2-frame temporal halo in a persistent VMEM carry (no overlapping re-fetch).
# ----------------------------------------------------------------------------
def frontend_kernel(init_ref, main_ref, w_ref, b_ref, a_ref, wt_ref, bt_ref,
                    o_ref, carry_ref, *, wp):
    tt, r4, _ = main_ref.shape
    r = r4 // 4                                     # pooled rows = Hp*Wp
    cf = w_ref.shape[2]
    neg = float("-inf")

    # (Re)initialize the 2-frame temporal carry at the start of each batch row.
    @pl.when(pl.program_id(1) == 0)
    def _():
        carry_ref[...] = init_ref[...]

    # Hoisted per-grid-step constants (NOT per frame; JAX does not CSE these).
    w_first = (jax.lax.broadcasted_iota(jnp.int32, (r, cf), 0) % wp) == 0
    neg_row = jnp.full((1, cf), neg, jnp.float32)
    neg_blk = jnp.full((wp, cf), neg, jnp.float32)
    ones_gap = jnp.full((1, r), 1.0 / r, jnp.float32)   # GAP as an MXU matmul
    bias = b_ref[...]
    alpha = a_ref[...]
    w0, w1, w2 = w_ref[0], w_ref[1], w_ref[2]

    def shift_w(v):   # v[hh, ww] <- v[hh, ww-1]; ww == 0 -> -inf
        s = jnp.concatenate([neg_row, v[:-1]], axis=0)
        return jnp.where(w_first, neg, s)

    def shift_h(v):   # v[hh, ww] <- v[hh-1, ww]; hh == 0 -> -inf
        return jnp.concatenate([neg_blk, v[:-wp]], axis=0)

    gaps = []
    for j in range(tt):
        # Padded frames needed for output frame (tb*tt + j):
        #   carry[0] = padded frame tb*tt, carry[1] = tb*tt+1,
        #   main[k]  = padded frame tb*tt+2+k.
        if j == 0:
            f0, f1, f2 = carry_ref[0], carry_ref[1], main_ref[0]
        elif j == 1:
            f0, f1, f2 = carry_ref[1], main_ref[0], main_ref[1]
        else:
            f0, f1, f2 = main_ref[j - 2], main_ref[j - 1], main_ref[j]

        y = jnp.dot(f0, w0, preferred_element_type=jnp.float32)
        y = y + jnp.dot(f1, w1, preferred_element_type=jnp.float32)
        y = y + jnp.dot(f2, w2, preferred_element_type=jnp.float32)
        y = y + bias                                 # folded BN bias (zero here)
        y = jnp.where(y >= 0, y, alpha * y)          # PReLU(Cf)

        # Rows are ordered (sh, sw, hh, ww) with ho = 2*hh + sh, wo = 2*ww + sw,
        # so the 3x3/s2/p1 max-pool is a max over 4 parity slabs + 3 shifts.
        e00, e01 = y[0:r], y[r:2 * r]
        e10, e11 = y[2 * r:3 * r], y[3 * r:4 * r]
        m_c = jnp.maximum(jnp.maximum(e00, e01), jnp.maximum(e10, e11))
        m_w = shift_w(jnp.maximum(e01, e11))
        m_h = shift_h(jnp.maximum(e10, e11))
        m_hw = shift_h(shift_w(e11))
        pooled = jnp.maximum(jnp.maximum(m_c, m_w), jnp.maximum(m_h, m_hw))

        # Global average pool over the Hp*Wp rows via the MXU (ones matmul).
        gaps.append(jnp.dot(ones_gap, pooled, preferred_element_type=jnp.float32))

    # TODO(synk): ResNet/EfficientNet trunk class not provided in the source;
    # replaced with global-average-pool + Linear(Cf->emb) + ReLU.
    feat = jnp.concatenate(gaps, axis=0)             # (Tt, Cf)
    emb = jnp.dot(feat, wt_ref[...], preferred_element_type=jnp.float32) + bt_ref[...]
    o_ref[...] = jnp.maximum(emb, 0.0)               # (Tt, emb)

    # Carry the last two padded frames of this block for the next time block.
    carry_ref[0] = main_ref[tt - 2]
    carry_ref[1] = main_ref[tt - 1]


# ----------------------------------------------------------------------------
# Kernel 2: fused tail — temporal Conv1d(emb->out, k=3)+ReLU + cls Linear.
# Batch is folded into rows (single grid step over B*T rows); temporal
# neighbours are masked to zero across batch boundaries.  cls output padded to
# 512 lanes (dense vst); wrapper slices back to 500.
# ----------------------------------------------------------------------------
def tail_kernel(x_ref, wb_ref, bb_ref, wc_ref, bc_ref, o_ref, *, seq_len):
    emb = x_ref[...]                                 # (B*T, E) f32
    rows, e = emb.shape
    zrow = jnp.zeros((1, e), jnp.float32)
    prev = jnp.concatenate([zrow, emb[:-1]], axis=0)
    nxt = jnp.concatenate([emb[1:], zrow], axis=0)

    # Zero temporal neighbours that would cross a batch boundary.
    t_in_seq = jax.lax.broadcasted_iota(jnp.int32, (rows, e), 0) % seq_len
    prev = jnp.where(t_in_seq == 0, 0.0, prev)
    nxt = jnp.where(t_in_seq == seq_len - 1, 0.0, nxt)

    # TODO(synk): TD3Net backend class not provided in the source; replaced
    # with one same-padded temporal Conv1d(E -> O, k=3) + ReLU.
    back = (jnp.dot(prev, wb_ref[0], preferred_element_type=jnp.float32)
            + jnp.dot(emb, wb_ref[1], preferred_element_type=jnp.float32)
            + jnp.dot(nxt, wb_ref[2], preferred_element_type=jnp.float32)
            + bb_ref[...])
    back = jnp.maximum(back, 0.0)                    # (B*T, O)

    # cls_layer Linear(O, 500), padded to 512 lanes (sliced in the wrapper).
    o_ref[...] = jnp.dot(back, wc_ref[...], preferred_element_type=jnp.float32) + bc_ref[...]


# ----------------------------------------------------------------------------
# Model (parameters built deterministically in-script)
# ----------------------------------------------------------------------------
class TD3NetLipreadingPallas:
    CLS_PAD = 512   # lane-dense classifier output (500 -> 512, sliced back)
    T_BLOCK = 8     # output frames per frontend grid step (>= 2)

    def __init__(self, key, frontend_nout=64, emb_dim=32, out_ch=32, num_classes=500):
        self.Cf = frontend_nout
        self.emb_dim = emb_dim
        self.out_ch = out_ch
        self.num_classes = num_classes

        k = jax.random.split(key, 5)

        def f(n):  # matches initialize_weights_randomly (use_sqrt=True)
            return math.sqrt(2.0 / float(n))

        # Conv3d(1, Cf, (3,7,7)) weight laid out as (kt, kh*kw, Cf); bias=None.
        # BatchNorm3d evaluated with fresh running stats (mean=0, var=1,
        # gamma=1, beta=0), folded into the conv weights.  Weights kept bf16
        # (MXU-native); accumulation stays f32 in the kernel.
        n_front = 3 * 7 * 7 * self.Cf
        w_front = jax.random.normal(k[0], (3, 49, self.Cf), jnp.float32) * f(n_front)
        bn_scale = 1.0 / math.sqrt(1.0 + 1e-5)
        self.w_front = (w_front * bn_scale).astype(jnp.bfloat16)
        self.b_front = jnp.zeros((1, self.Cf), jnp.float32)
        self.alpha_front = jnp.full((1, self.Cf), 0.25, jnp.float32)  # PReLU default

        # TODO(synk): trunk placeholder — Linear(Cf -> emb_dim) after GAP.
        self.w_trunk = jax.random.normal(k[1], (self.Cf, self.emb_dim), jnp.float32) * f(self.Cf)
        self.b_trunk = jnp.zeros((1, self.emb_dim), jnp.float32)

        # TODO(synk): TD3Net placeholder — temporal Conv1d(emb -> out, k=3).
        n_back = 3 * self.out_ch
        self.w_back = jax.random.normal(
            k[2], (3, self.emb_dim, self.out_ch), jnp.float32) * f(n_back)
        self.b_back = jnp.zeros((1, self.out_ch), jnp.float32)

        # cls_layer: nn.Linear(out_ch, 500); padded to 512 output lanes.
        w_cls = jax.random.normal(k[3], (self.out_ch, num_classes), jnp.float32) * f(self.out_ch)
        bound = 1.0 / math.sqrt(self.out_ch)
        b_cls = jax.random.uniform(k[4], (num_classes,), jnp.float32, -bound, bound)
        self.w_cls = jnp.zeros((self.out_ch, self.CLS_PAD), jnp.float32).at[:, :num_classes].set(w_cls)
        self.b_cls = jnp.zeros((1, self.CLS_PAD), jnp.float32).at[0, :num_classes].set(b_cls)

    def __call__(self, x):
        # x: (B, 1, T, H, W)  -- PyTorch NCDHW
        B, cin, T, H, W = x.shape
        assert cin == 1 and H % 4 == 0 and W % 4 == 0
        cf, e, o = self.Cf, self.emb_dim, self.out_ch
        ho, wo = H // 2, W // 2          # conv output spatial dims
        hp, wp = ho // 2, wo // 2        # pooled spatial dims
        r, r4 = hp * wp, 4 * hp * wp
        tt = self.T_BLOCK
        tpad = ((T + tt - 1) // tt) * tt # time padded to a multiple of T_BLOCK
        nt = tpad // tt

        # ---- wrapper-side layout plumbing (no compute): padded volume ->
        # 49-wide bf16 patch slab indexed by padded time, rows ordered
        # (sh, sw, hh, ww) so the max-pool fuses into the frontend kernel.
        # TODO(synk): the 49-tap im2col still materializes ~12x the padded
        # input in HBM via XLA; a rows-on-lanes layout with in-kernel
        # pltpu.roll column taps would shrink this further.
        xpad = jnp.pad(x[:, 0].astype(jnp.bfloat16), ((0, 0), (1, 1), (3, 3), (3, 3)))
        taps = [xpad[:, :, dh:dh + 2 * ho:2, dw:dw + 2 * wo:2]
                for dh in range(7) for dw in range(7)]
        slab = jnp.stack(taps, axis=-1)                       # (B, T+2, Ho, Wo, 49)
        slab = slab.reshape(B, T + 2, hp, 2, wp, 2, 49)
        slab = slab.transpose(0, 1, 3, 5, 2, 4, 6).reshape(B, T + 2, r4, 49)

        slab_init = slab[:, :2]                               # padded frames 0..1
        slab_main = slab[:, 2:]                               # padded frames 2..T+1
        if tpad != T:
            slab_main = jnp.pad(slab_main, ((0, 0), (0, tpad - T), (0, 0), (0, 0)))

        # ---- kernel 1: conv + BN + PReLU + maxpool + GAP + trunk Linear+ReLU.
        emb = pl.pallas_call(
            functools.partial(frontend_kernel, wp=wp),
            out_shape=jax.ShapeDtypeStruct((B, tpad, e), jnp.float32),
            grid=(B, nt),
            in_specs=[
                pl.BlockSpec((None, 2, r4, 49), lambda b, t: (b, 0, 0, 0)),
                pl.BlockSpec((None, tt, r4, 49), lambda b, t: (b, t, 0, 0)),
                pl.BlockSpec((3, 49, cf), lambda b, t: (0, 0, 0)),
                pl.BlockSpec((1, cf), lambda b, t: (0, 0)),
                pl.BlockSpec((1, cf), lambda b, t: (0, 0)),
                pl.BlockSpec((cf, e), lambda b, t: (0, 0)),
                pl.BlockSpec((1, e), lambda b, t: (0, 0)),
            ],
            out_specs=pl.BlockSpec((None, tt, e), lambda b, t: (b, t, 0)),
            scratch_shapes=[pltpu.VMEM((2, r4, 49), jnp.bfloat16)],  # temporal halo
            compiler_params=pltpu.CompilerParams(
                dimension_semantics=("parallel", "arbitrary"),
                vmem_limit_bytes=48 * 1024 * 1024),
        )(slab_init, slab_main, self.w_front, self.b_front, self.alpha_front,
          self.w_trunk, self.b_trunk)

        emb = emb[:, :T].reshape(B * T, e)                    # drop time padding

        # ---- kernel 2: fused temporal conv + cls over all B*T rows at once.
        logits = pl.pallas_call(
            functools.partial(tail_kernel, seq_len=T),
            out_shape=jax.ShapeDtypeStruct((B * T, self.CLS_PAD), jnp.float32),
            grid=(1,),
            in_specs=[
                pl.BlockSpec((B * T, e), lambda i: (0, 0)),
                pl.BlockSpec((3, e, o), lambda i: (0, 0, 0)),
                pl.BlockSpec((1, o), lambda i: (0, 0)),
                pl.BlockSpec((o, self.CLS_PAD), lambda i: (0, 0)),
                pl.BlockSpec((1, self.CLS_PAD), lambda i: (0, 0)),
            ],
            out_specs=pl.BlockSpec((B * T, self.CLS_PAD), lambda i: (0, 0)),
            compiler_params=pltpu.CompilerParams(
                dimension_semantics=("arbitrary",)),
        )(emb, self.w_back, self.b_back, self.w_cls, self.b_cls)

        return logits[:, :self.num_classes].reshape(B, T, self.num_classes)


# ----------------------------------------------------------------------------
if __name__ == "__main__":
    key = jax.random.PRNGKey(0)
    k_param, k_x = jax.random.split(key)

    model = TD3NetLipreadingPallas(k_param, frontend_nout=64, emb_dim=32,
                                   out_ch=32, num_classes=500)

    # B=2, C=1, T=8, H=W=16  (small shapes consistent with (B,1,T,H,W) input)
    x = jax.random.normal(k_x, (2, 1, 8, 16, 16), jnp.float32)

    fwd = jax.jit(model.__call__)
    out = jax.block_until_ready(fwd(x))
    assert out.shape == (2, 8, 500), out.shape
    assert bool(jnp.all(jnp.isfinite(out)))
    print("KERNEL_OK")
</pallas_src>

<mosaic_0001>
module attributes {stable_mosaic.version = 11 : i64} {
  func.func @tail_kernel(%arg0: i32, %arg1: memref<16x32xf32, #tpu.memory_space<vmem>>, %arg2: memref<3x32x32xf32, #tpu.memory_space<vmem>>, %arg3: memref<1x32xf32, #tpu.memory_space<vmem>>, %arg4: memref<32x512xf32, #tpu.memory_space<vmem>>, %arg5: memref<1x512xf32, #tpu.memory_space<vmem>>, %arg6: memref<16x512xf32, #tpu.memory_space<vmem>>) attributes {dimension_semantics = [#tpu.dimension_semantics<arbitrary>], iteration_bounds = array<i64: 1>, scalar_prefetch = 0 : i64, scratch_operands = 0 : i64, tpu.core_type = #tpu.core_type<tc>, window_params = [{pipeline_mode = #tpu.pipeline_mode<synchronous>, transform_indices = @transform_0, window_bounds = array<i64: 16, 32>}, {pipeline_mode = #tpu.pipeline_mode<synchronous>, transform_indices = @transform_1, window_bounds = array<i64: 3, 32, 32>}, {pipeline_mode = #tpu.pipeline_mode<synchronous>, transform_indices = @transform_2, window_bounds = array<i64: 1, 32>}, {pipeline_mode = #tpu.pipeline_mode<synchronous>, transform_indices = @transform_3, window_bounds = array<i64: 32, 512>}, {pipeline_mode = #tpu.pipeline_mode<synchronous>, transform_indices = @transform_4, window_bounds = array<i64: 1, 512>}, {pipeline_mode = #tpu.pipeline_mode<synchronous>, transform_indices = @transform_5, window_bounds = array<i64: 16, 512>}]} {
    %c0 = arith.constant 0 : index
    %c0_0 = arith.constant 0 : index
    %0 = vector.load %arg1[%c0, %c0_0] : memref<16x32xf32, #tpu.memory_space<vmem>>, vector<16x32xf32>
    %cst = arith.constant 0.000000e+00 : f32
    %1 = vector.broadcast %cst : f32 to vector<1x32xf32>
    %2 = vector.extract_strided_slice %0 {offsets = [0, 0], sizes = [15, 32], strides = [1, 1]} : vector<16x32xf32> to vector<15x32xf32>
    %3 = tpu.concatenate %1, %2 in 0 : vector<1x32xf32>, vector<15x32xf32> -> vector<16x32xf32>
    %4 = vector.extract_strided_slice %0 {offsets = [1, 0], sizes = [15, 32], strides = [1, 1]} : vector<16x32xf32> to vector<15x32xf32>
    %5 = tpu.concatenate %4, %1 in 0 : vector<15x32xf32>, vector<1x32xf32> -> vector<16x32xf32>
    %6 = tpu.iota {dimensions = array<i32: 0>} : vector<16x32xi32>
    %c8_i32 = arith.constant 8 : i32
    %c0_i32 = arith.constant 0 : i32
    %7 = arith.cmpi eq, %c8_i32, %c0_i32 : i32
    %c1_i32 = arith.constant 1 : i32
    %8 = arith.select %7, %c1_i32, %c8_i32 : i32
    %9 = vector.broadcast %8 : i32 to vector<16x32xi32>
    %10 = arith.remsi %6, %9 : vector<16x32xi32>
    %c0_i32_1 = arith.constant 0 : i32
    %11 = vector.broadcast %c0_i32_1 : i32 to vector<16x32xi32>
    %12 = arith.cmpi ne, %10, %11 : vector<16x32xi32>
    %c0_i32_2 = arith.constant 0 : i32
    %13 = vector.broadcast %c0_i32_2 : i32 to vector<16x32xi32>
    %14 = arith.cmpi slt, %10, %13 : vector<16x32xi32>
    %c0_i32_3 = arith.constant 0 : i32
    %15 = arith.cmpi slt, %8, %c0_i32_3 : i32
    %16 = vector.broadcast %15 : i1 to vector<16x32xi1>
    %17 = vector.broadcast %16 : vector<16x32xi1> to vector<16x32xi1>
    %18 = arith.xori %14, %17 : vector<16x32xi1>
    %19 = arith.andi %18, %12 : vector<16x32xi1>
    %20 = vector.broadcast %8 : i32 to vector<16x32xi32>
    %21 = arith.addi %10, %20 : vector<16x32xi32>
    %22 = arith.select %19, %21, %10 : vector<16x32xi1>, vector<16x32xi32>
    %c0_i32_4 = arith.constant 0 : i32
    %23 = vector.broadcast %c0_i32_4 : i32 to vector<16x32xi32>
    %24 = arith.cmpi eq, %22, %23 : vector<16x32xi32>
    %cst_5 = arith.constant 0.000000e+00 : f32
    %25 = vector.broadcast %cst_5 : f32 to vector<16x32xf32>
    %26 = arith.select %24, %25, %3 : vector<16x32xi1>, vector<16x32xf32>
    %c7_i32 = arith.constant 7 : i32
    %27 = vector.broadcast %c7_i32 : i32 to vector<16x32xi32>
    %28 = arith.cmpi eq, %22, %27 : vector<16x32xi32>
    %cst_6 = arith.constant 0.000000e+00 : f32
    %29 = vector.broadcast %cst_6 : f32 to vector<16x32xf32>
    %30 = arith.select %28, %29, %5 : vector<16x32xi1>, vector<16x32xf32>
    %c0_7 = arith.constant 0 : index
    %c0_8 = arith.constant 0 : index
    %c0_9 = arith.constant 0 : index
    %31 = vector.load %arg2[%c0_7, %c0_8, %c0_9] : memref<3x32x32xf32, #tpu.memory_space<vmem>>, vector<1x32x32xf32>
    %32 = vector.shape_cast %31 : vector<1x32x32xf32> to vector<32x32xf32>
    %cst_10 = arith.constant dense<0.000000e+00> : vector<16x32xf32>
    %33 = tpu.matmul %26, %32, %cst_10 {dimension_numbers = #tpu.dot_dimension_numbers<[1], [0], [0], [1], [0, 0, 1, 1], [], []>} : vector<16x32xf32>, vector<32x32xf32>, vector<16x32xf32> -> vector<16x32xf32>
    %c1 = arith.constant 1 : index
    %c0_11 = arith.constant 0 : index
    %c0_12 = arith.constant 0 : index
    %34 = vector.load %arg2[%c1, %c0_11, %c0_12] : memref<3x32x32xf32, #tpu.memory_space<vmem>>, vector<1x32x32xf32>
    %35 = vector.shape_cast %34 : vector<1x32x32xf32> to vector<32x32xf32>
    %cst_13 = arith.constant dense<0.000000e+00> : vector<16x32xf32>
    %36 = tpu.matmul %0, %35, %cst_13 {dimension_numbers = #tpu.dot_dimension_numbers<[1], [0], [0], [1], [0, 0, 1, 1], [], []>} : vector<16x32xf32>, vector<32x32xf32>, vector<16x32xf32> -> vector<16x32xf32>
    %37 = arith.addf %33, %36 : vector<16x32xf32>
    %c2 = arith.constant 2 : index
    %c0_14 = arith.constant 0 : index
    %c0_15 = arith.constant 0 : index
    %38 = vector.load %arg2[%c2, %c0_14, %c0_15] : memref<3x32x32xf32, #tpu.memory_space<vmem>>, vector<1x32x32xf32>
    %39 = vector.shape_cast %38 : vector<1x32x32xf32> to vector<32x32xf32>
    %cst_16 = arith.constant dense<0.000000e+00> : vector<16x32xf32>
    %40 = tpu.matmul %30, %39, %cst_16 {dimension_numbers = #tpu.dot_dimension_numbers<[1], [0], [0], [1], [0, 0, 1, 1], [], []>} : vector<16x32xf32>, vector<32x32xf32>, vector<16x32xf32> -> vector<16x32xf32>
    %41 = arith.addf %37, %40 : vector<16x32xf32>
    %c0_17 = arith.constant 0 : index
    %c0_18 = arith.constant 0 : index
    %42 = vector.load %arg3[%c0_17, %c0_18] : memref<1x32xf32, #tpu.memory_space<vmem>>, vector<1x32xf32>
    %43 = vector.broadcast %42 : vector<1x32xf32> to vector<16x32xf32>
    %44 = arith.addf %41, %43 : vector<16x32xf32>
    %cst_19 = arith.constant 0.000000e+00 : f32
    %45 = vector.broadcast %cst_19 : f32 to vector<16x32xf32>
    %46 = arith.maximumf %44, %45 : vector<16x32xf32>
    %c0_20 = arith.constant 0 : index
    %c0_21 = arith.constant 0 : index
    %47 = vector.load %arg4[%c0_20, %c0_21] : memref<32x512xf32, #tpu.memory_space<vmem>>, vector<32x512xf32>
    %cst_22 = arith.constant dense<0.000000e+00> : vector<16x512xf32>
    %48 = tpu.matmul %46, %47, %cst_22 {dimension_numbers = #tpu.dot_dimension_numbers<[1], [0], [0], [1], [0, 0, 1, 1], [], []>} : vector<16x32xf32>, vector<32x512xf32>, vector<16x512xf32> -> vector<16x512xf32>
    %c0_23 = arith.constant 0 : index
    %c0_24 = arith.constant 0 : index
    %49 = vector.load %arg5[%c0_23, %c0_24] : memref<1x512xf32, #tpu.memory_space<vmem>>, vector<1x512xf32>
    %50 = vector.broadcast %49 : vector<1x512xf32> to vector<16x512xf32>
    %51 = arith.addf %48, %50 : vector<16x512xf32>
    %c0_25 = arith.constant 0 : index
    %c0_26 = arith.constant 0 : index
    %52 = vector.load %arg6[%c0_25, %c0_26] : memref<16x512xf32, #tpu.memory_space<vmem>>, vector<16x512xf32>
    tpu.vector_store %arg6[%c0_25, %c0_26], %51 {strides = array<i32>} : memref<16x512xf32, #tpu.memory_space<vmem>>, vector<16x512xf32>,
    return
  }
  func.func @transform_0(%arg0: i32) -> (i32, i32) {
    %c0_i32 = arith.constant 0 : i32
    %c0_i32_0 = arith.constant 0 : i32
    %c0_i32_1 = arith.constant 0 : i32
    return %c0_i32, %c0_i32_0 : i32, i32
  }
  func.func @transform_1(%arg0: i32) -> (i32, i32, i32) {
    %c0_i32 = arith.constant 0 : i32
    %c0_i32_0 = arith.constant 0 : i32
    %c0_i32_1 = arith.constant 0 : i32
    %c0_i32_2 = arith.constant 0 : i32
    return %c0_i32, %c0_i32_0, %c0_i32_1 : i32, i32, i32
  }
  func.func @transform_2(%arg0: i32) -> (i32, i32) {
    %c0_i32 = arith.constant 0 : i32
    %c0_i32_0 = arith.constant 0 : i32
    %c0_i32_1 = arith.constant 0 : i32
    return %c0_i32, %c0_i32_0 : i32, i32
  }
  func.func @transform_3(%arg0: i32) -> (i32, i32) {
    %c0_i32 = arith.constant 0 : i32
    %c0_i32_0 = arith.constant 0 : i32
    %c0_i32_1 = arith.constant 0 : i32
    return %c0_i32, %c0_i32_0 : i32, i32
  }
  func.func @transform_4(%arg0: i32) -> (i32, i32) {
    %c0_i32 = arith.constant 0 : i32
    %c0_i32_0 = arith.constant 0 : i32
    %c0_i32_1 = arith.constant 0 : i32
    return %c0_i32, %c0_i32_0 : i32, i32
  }
  func.func @transform_5(%arg0: i32) -> (i32, i32) {
    %c0_i32 = arith.constant 0 : i32
    %c0_i32_0 = arith.constant 0 : i32
    %c0_i32_1 = arith.constant 0 : i32
    return %c0_i32, %c0_i32_0 : i32, i32
  }
}

module attributes {stable_mosaic.version = 11 : i64} {
  func.func @frontend_kernel(%arg0: i32, %arg1: i32, %arg2: memref<1x2x64x49xbf16, #tpu.memory_space<vmem>>, %arg3: memref<1x8x64x49xbf16, #tpu.memory_space<vmem>>, %arg4: memref<3x49x64xbf16, #tpu.memory_space<vmem>>, %arg5: memref<1x64xf32, #tpu.memory_space<vmem>>, %arg6: memref<1x64xf32, #tpu.memory_space<vmem>>, %arg7: memref<64x32xf32, #tpu.memory_space<vmem>>, %arg8: memref<1x32xf32, #tpu.memory_space<vmem>>, %arg9: memref<1x8x32xf32, #tpu.memory_space<vmem>>, %arg10: memref<2x64x49xbf16, #tpu.memory_space<vmem>>) attributes {dimension_semantics = [#tpu.dimension_semantics<parallel>, #tpu.dimension_semantics<arbitrary>], iteration_bounds = array<i64: 2, 1>, scalar_prefetch = 0 : i64, scratch_operands = 1 : i64, tpu.core_type = #tpu.core_type<tc>, window_params = [{transform_indices = @transform_0, window_bounds = array<i64: 1, 2, 64, 49>}, {transform_indices = @transform_1, window_bounds = array<i64: 1, 8, 64, 49>}, {pipeline_mode = #tpu.pipeline_mode<synchronous>, transform_indices = @transform_2, window_bounds = array<i64: 3, 49, 64>}, {pipeline_mode = #tpu.pipeline_mode<synchronous>, transform_indices = @transform_3, window_bounds = array<i64: 1, 64>}, {pipeline_mode = #tpu.pipeline_mode<synchronous>, transform_indices = @transform_4, window_bounds = array<i64: 1, 64>}, {pipeline_mode = #tpu.pipeline_mode<synchronous>, transform_indices = @transform_5, window_bounds = array<i64: 64, 32>}, {pipeline_mode = #tpu.pipeline_mode<synchronous>, transform_indices = @transform_6, window_bounds = array<i64: 1, 32>}, {transform_indices = @transform_7, window_bounds = array<i64: 1, 8, 32>}]} {
    %c0_i32 = arith.constant 0 : i32
    %0 = arith.cmpi eq, %arg1, %c0_i32 : i32
    %1 = arith.extui %0 : i1 to i32
    %c0_i32_0 = arith.constant 0 : i32
    %2 = arith.cmpi ne, %1, %c0_i32_0 : i32
    scf.if %2 {
      %c0_185 = arith.constant 0 : index
      %c0_186 = arith.constant 0 : index
      %c0_187 = arith.constant 0 : index
      %c0_188 = arith.constant 0 : index
      %398 = vector.load %arg2[%c0_185, %c0_186, %c0_187, %c0_188] : memref<1x2x64x49xbf16, #tpu.memory_space<vmem>>, vector<1x2x64x49xbf16>
      %399 = vector.shape_cast %398 : vector<1x2x64x49xbf16> to vector<2x64x49xbf16>
      %c0_189 = arith.constant 0 : index
      %c0_190 = arith.constant 0 : index
      %c0_191 = arith.constant 0 : index
      %400 = vector.load %arg10[%c0_189, %c0_190, %c0_191] : memref<2x64x49xbf16, #tpu.memory_space<vmem>>, vector<2x64x49xbf16>
      tpu.vector_store %arg10[%c0_189, %c0_190, %c0_191], %399 {strides = array<i32>} : memref<2x64x49xbf16, #tpu.memory_space<vmem>>, vector<2x64x49xbf16>,
    } else {
    }
    %3 = tpu.iota {dimensions = array<i32: 0>} : vector<16x64xi32>
    %c4_i32 = arith.constant 4 : i32
    %c0_i32_1 = arith.constant 0 : i32
    %4 = arith.cmpi eq, %c4_i32, %c0_i32_1 : i32
    %c1_i32 = arith.constant 1 : i32
    %5 = arith.select %4, %c1_i32, %c4_i32 : i32
    %6 = vector.broadcast %5 : i32 to vector<16x64xi32>
    %7 = arith.remsi %3, %6 : vector<16x64xi32>
    %c0_i32_2 = arith.constant 0 : i32
    %8 = vector.broadcast %c0_i32_2 : i32 to vector<16x64xi32>
    %9 = arith.cmpi ne, %7, %8 : vector<16x64xi32>
    %c0_i32_3 = arith.constant 0 : i32
    %10 = vector.broadcast %c0_i32_3 : i32 to vector<16x64xi32>
    %11 = arith.cmpi slt, %7, %10 : vector<16x64xi32>
    %c0_i32_4 = arith.constant 0 : i32
    %12 = arith.cmpi slt, %5, %c0_i32_4 : i32
    %13 = vector.broadcast %12 : i1 to vector<16x64xi1>
    %14 = vector.broadcast %13 : vector<16x64xi1> to vector<16x64xi1>
    %15 = arith.xori %11, %14 : vector<16x64xi1>
    %16 = arith.andi %15, %9 : vector<16x64xi1>
    %17 = vector.broadcast %5 : i32 to vector<16x64xi32>
    %18 = arith.addi %7, %17 : vector<16x64xi32>
    %19 = arith.select %16, %18, %7 : vector<16x64xi1>, vector<16x64xi32>
    %c0_i32_5 = arith.constant 0 : i32
    %20 = vector.broadcast %c0_i32_5 : i32 to vector<16x64xi32>
    %21 = arith.cmpi eq, %19, %20 : vector<16x64xi32>
    %cst = arith.constant 0xFF800000 : f32
    %22 = vector.broadcast %cst : f32 to vector<1x64xf32>
    %cst_6 = arith.constant 0xFF800000 : f32
    %23 = vector.broadcast %cst_6 : f32 to vector<4x64xf32>
    %cst_7 = arith.constant 6.250000e-02 : f32
    %24 = vector.broadcast %cst_7 : f32 to vector<1x16xf32>
    %c0 = arith.constant 0 : index
    %c0_8 = arith.constant 0 : index
    %25 = vector.load %arg5[%c0, %c0_8] : memref<1x64xf32, #tpu.memory_space<vmem>>, vector<1x64xf32>
    %c0_9 = arith.constant 0 : index
    %c0_10 = arith.constant 0 : index
    %26 = vector.load %arg6[%c0_9, %c0_10] : memref<1x64xf32, #tpu.memory_space<vmem>>, vector<1x64xf32>
    %c0_11 = arith.constant 0 : index
    %c0_12 = arith.constant 0 : index
    %c0_13 = arith.constant 0 : index
    %27 = vector.load %arg4[%c0_11, %c0_12, %c0_13] : memref<3x49x64xbf16, #tpu.memory_space<vmem>>, vector<1x49x64xbf16>
    %28 = vector.shape_cast %27 : vector<1x49x64xbf16> to vector<49x64xbf16>
    %c1 = arith.constant 1 : index
    %c0_14 = arith.constant 0 : index
    %c0_15 = arith.constant 0 : index
    %29 = vector.load %arg4[%c1, %c0_14, %c0_15] : memref<3x49x64xbf16, #tpu.memory_space<vmem>>, vector<1x49x64xbf16>
    %30 = vector.shape_cast %29 : vector<1x49x64xbf16> to vector<49x64xbf16>
    %c2 = arith.constant 2 : index
    %c0_16 = arith.constant 0 : index
    %c0_17 = arith.constant 0 : index
    %31 = vector.load %arg4[%c2, %c0_16, %c0_17] : memref<3x49x64xbf16, #tpu.memory_space<vmem>>, vector<1x49x64xbf16>
    %32 = vector.shape_cast %31 : vector<1x49x64xbf16> to vector<49x64xbf16>
    %c0_18 = arith.constant 0 : index
    %c0_19 = arith.constant 0 : index
    %c0_20 = arith.constant 0 : index
    %33 = vector.load %arg10[%c0_18, %c0_19, %c0_20] : memref<2x64x49xbf16, #tpu.memory_space<vmem>>, vector<1x64x49xbf16>
    %34 = vector.shape_cast %33 : vector<1x64x49xbf16> to vector<64x49xbf16>
    %c1_21 = arith.constant 1 : index
    %c0_22 = arith.constant 0 : index
    %c0_23 = arith.constant 0 : index
    %35 = vector.load %arg10[%c1_21, %c0_22, %c0_23] : memref<2x64x49xbf16, #tpu.memory_space<vmem>>, vector<1x64x49xbf16>
    %36 = vector.shape_cast %35 : vector<1x64x49xbf16> to vector<64x49xbf16>
    %c0_24 = arith.constant 0 : index
    %c0_25 = arith.constant 0 : index
    %c0_26 = arith.constant 0 : index
    %c0_27 = arith.constant 0 : index
    %37 = vector.load %arg3[%c0_24, %c0_25, %c0_26, %c0_27] : memref<1x8x64x49xbf16, #tpu.memory_space<vmem>>, vector<1x1x64x49xbf16>
    %38 = vector.shape_cast %37 : vector<1x1x64x49xbf16> to vector<64x49xbf16>
    %cst_28 = arith.constant dense<0.000000e+00> : vector<64x64xf32>
    %39 = tpu.matmul %34, %28, %cst_28 {dimension_numbers = #tpu.dot_dimension_numbers<[1], [0], [0], [1], [0, 0, 1, 1], [], []>} : vector<64x49xbf16>, vector<49x64xbf16>, vector<64x64xf32> -> vector<64x64xf32>
    %cst_29 = arith.constant dense<0.000000e+00> : vector<64x64xf32>
    %40 = tpu.matmul %36, %30, %cst_29 {dimension_numbers = #tpu.dot_dimension_numbers<[1], [0], [0], [1], [0, 0, 1, 1], [], []>} : vector<64x49xbf16>, vector<49x64xbf16>, vector<64x64xf32> -> vector<64x64xf32>
    %41 = arith.addf %39, %40 : vector<64x64xf32>
    %cst_30 = arith.constant dense<0.000000e+00> : vector<64x64xf32>
    %42 = tpu.matmul %38, %32, %cst_30 {dimension_numbers = #tpu.dot_dimension_numbers<[1], [0], [0], [1], [0, 0, 1, 1], [], []>} : vector<64x49xbf16>, vector<49x64xbf16>, vector<64x64xf32> -> vector<64x64xf32>
    %43 = arith.addf %41, %42 : vector<64x64xf32>
    %44 = vector.broadcast %25 : vector<1x64xf32> to vector<64x64xf32>
    %45 = arith.addf %43, %44 : vector<64x64xf32>
    %cst_31 = arith.constant 0.000000e+00 : f32
    %46 = vector.broadcast %cst_31 : f32 to vector<64x64xf32>
    %47 = arith.cmpf oge, %45, %46 : vector<64x64xf32>
    %48 = vector.broadcast %26 : vector<1x64xf32> to vector<64x64xf32>
    %49 = arith.mulf %48, %45 : vector<64x64xf32>
    %50 = arith.select %47, %45, %49 : vector<64x64xi1>, vector<64x64xf32>
    %51 = vector.extract_strided_slice %50 {offsets = [0, 0], sizes = [16, 64], strides = [1, 1]} : vector<64x64xf32> to vector<16x64xf32>
    %52 = vector.extract_strided_slice %50 {offsets = [16, 0], sizes = [16, 64], strides = [1, 1]} : vector<64x64xf32> to vector<16x64xf32>
    %53 = vector.extract_strided_slice %50 {offsets = [32, 0], sizes = [16, 64], strides = [1, 1]} : vector<64x64xf32> to vector<16x64xf32>
    %54 = vector.extract_strided_slice %50 {offsets = [48, 0], sizes = [16, 64], strides = [1, 1]} : vector<64x64xf32> to vector<16x64xf32>
    %55 = arith.maximumf %51, %52 : vector<16x64xf32>
    %56 = arith.maximumf %53, %54 : vector<16x64xf32>
    %57 = arith.maximumf %55, %56 : vector<16x64xf32>
    %58 = arith.maximumf %52, %54 : vector<16x64xf32>
    %59 = vector.extract_strided_slice %58 {offsets = [0, 0], sizes = [15, 64], strides = [1, 1]} : vector<16x64xf32> to vector<15x64xf32>
    %60 = tpu.concatenate %22, %59 in 0 : vector<1x64xf32>, vector<15x64xf32> -> vector<16x64xf32>
    %cst_32 = arith.constant 0xFF800000 : f32
    %61 = vector.broadcast %cst_32 : f32 to vector<16x64xf32>
    %62 = arith.select %21, %61, %60 : vector<16x64xi1>, vector<16x64xf32>
    %63 = arith.maximumf %53, %54 : vector<16x64xf32>
    %64 = vector.extract_strided_slice %63 {offsets = [0, 0], sizes = [12, 64], strides = [1, 1]} : vector<16x64xf32> to vector<12x64xf32>
    %65 = tpu.concatenate %23, %64 in 0 : vector<4x64xf32>, vector<12x64xf32> -> vector<16x64xf32>
    %66 = vector.extract_strided_slice %54 {offsets = [0, 0], sizes = [15, 64], strides = [1, 1]} : vector<16x64xf32> to vector<15x64xf32>
    %67 = tpu.concatenate %22, %66 in 0 : vector<1x64xf32>, vector<15x64xf32> -> vector<16x64xf32>
    %cst_33 = arith.constant 0xFF800000 : f32
    %68 = vector.broadcast %cst_33 : f32 to vector<16x64xf32>
    %69 = arith.select %21, %68, %67 : vector<16x64xi1>, vector<16x64xf32>
    %70 = vector.extract_strided_slice %69 {offsets = [0, 0], sizes = [12, 64], strides = [1, 1]} : vector<16x64xf32> to vector<12x64xf32>
    %71 = tpu.concatenate %23, %70 in 0 : vector<4x64xf32>, vector<12x64xf32> -> vector<16x64xf32>
    %72 = arith.maximumf %57, %62 : vector<16x64xf32>
    %73 = arith.maximumf %65, %71 : vector<16x64xf32>
    %74 = arith.maximumf %72, %73 : vector<16x64xf32>
    %cst_34 = arith.constant dense<0.000000e+00> : vector<1x64xf32>
    %75 = tpu.matmul %24, %74, %cst_34 {dimension_numbers = #tpu.dot_dimension_numbers<[1], [0], [0], [1], [0, 0, 1, 1], [], []>} : vector<1x16xf32>, vector<16x64xf32>, vector<1x64xf32> -> vector<1x64xf32>
    %c1_35 = arith.constant 1 : index
    %c0_36 = arith.constant 0 : index
    %c0_37 = arith.constant 0 : index
    %76 = vector.load %arg10[%c1_35, %c0_36, %c0_37] : memref<2x64x49xbf16, #tpu.memory_space<vmem>>, vector<1x64x49xbf16>
    %77 = vector.shape_cast %76 : vector<1x64x49xbf16> to vector<64x49xbf16>
    %c0_38 = arith.constant 0 : index
    %c0_39 = arith.constant 0 : index
    %c0_40 = arith.constant 0 : index
    %c0_41 = arith.constant 0 : index
    %78 = vector.load %arg3[%c0_38, %c0_39, %c0_40, %c0_41] : memref<1x8x64x49xbf16, #tpu.memory_space<vmem>>, vector<1x1x64x49xbf16>
    %79 = vector.shape_cast %78 : vector<1x1x64x49xbf16> to vector<64x49xbf16>
    %c0_42 = arith.constant 0 : index
    %c1_43 = arith.constant 1 : index
    %c0_44 = arith.constant 0 : index
    %c0_45 = arith.constant 0 : index
    %80 = vector.load %arg3[%c0_42, %c1_43, %c0_44, %c0_45] : memref<1x8x64x49xbf16, #tpu.memory_space<vmem>>, vector<1x1x64x49xbf16>
    %81 = vector.shape_cast %80 : vector<1x1x64x49xbf16> to vector<64x49xbf16>
    %cst_46 = arith.constant dense<0.000000e+00> : vector<64x64xf32>
    %82 = tpu.matmul %77, %28, %cst_46 {dimension_numbers = #tpu.dot_dimension_numbers<[1], [0], [0], [1], [0, 0, 1, 1], [], []>} : vector<64x49xbf16>, vector<49x64xbf16>, vector<64x64xf32> -> vector<64x64xf32>
    %cst_47 = arith.constant dense<0.000000e+00> : vector<64x64xf32>
    %83 = tpu.matmul %79, %30, %cst_47 {dimension_numbers = #tpu.dot_dimension_numbers<[1], [0], [0], [1], [0, 0, 1, 1], [], []>} : vector<64x49xbf16>, vector<49x64xbf16>, vector<64x64xf32> -> vector<64x64xf32>
    %84 = arith.addf %82, %83 : vector<64x64xf32>
    %cst_48 = arith.constant dense<0.000000e+00> : vector<64x64xf32>
    %85 = tpu.matmul %81, %32, %cst_48 {dimension_numbers = #tpu.dot_dimension_numbers<[1], [0], [0], [1], [0, 0, 1, 1], [], []>} : vector<64x49xbf16>, vector<49x64xbf16>, vector<64x64xf32> -> vector<64x64xf32>
    %86 = arith.addf %84, %85 : vector<64x64xf32>
    %87 = vector.broadcast %25 : vector<1x64xf32> to vector<64x64xf32>
    %88 = arith.addf %86, %87 : vector<64x64xf32>
    %cst_49 = arith.constant 0.000000e+00 : f32
    %89 = vector.broadcast %cst_49 : f32 to vector<64x64xf32>
    %90 = arith.cmpf oge, %88, %89 : vector<64x64xf32>
    %91 = vector.broadcast %26 : vector<1x64xf32> to vector<64x64xf32>
    %92 = arith.mulf %91, %88 : vector<64x64xf32>
    %93 = arith.select %90, %88, %92 : vector<64x64xi1>, vector<64x64xf32>
    %94 = vector.extract_strided_slice %93 {offsets = [0, 0], sizes = [16, 64], strides = [1, 1]} : vector<64x64xf32> to vector<16x64xf32>
    %95 = vector.extract_strided_slice %93 {offsets = [16, 0], sizes = [16, 64], strides = [1, 1]} : vector<64x64xf32> to vector<16x64xf32>
    %96 = vector.extract_strided_slice %93 {offsets = [32, 0], sizes = [16, 64], strides = [1, 1]} : vector<64x64xf32> to vector<16x64xf32>
    %97 = vector.extract_strided_slice %93 {offsets = [48, 0], sizes = [16, 64], strides = [1, 1]} : vector<64x64xf32> to vector<16x64xf32>
    %98 = arith.maximumf %94, %95 : vector<16x64xf32>
    %99 = arith.maximumf %96, %97 : vector<16x64xf32>
    %100 = arith.maximumf %98, %99 : vector<16x64xf32>
    %101 = arith.maximumf %95, %97 : vector<16x64xf32>
    %102 = vector.extract_strided_slice %101 {offsets = [0, 0], sizes = [15, 64], strides = [1, 1]} : vector<16x64xf32> to vector<15x64xf32>
    %103 = tpu.concatenate %22, %102 in 0 : vector<1x64xf32>, vector<15x64xf32> -> vector<16x64xf32>
    %cst_50 = arith.constant 0xFF800000 : f32
    %104 = vector.broadcast %cst_50 : f32 to vector<16x64xf32>
    %105 = arith.select %21, %104, %103 : vector<16x64xi1>, vector<16x64xf32>
    %106 = arith.maximumf %96, %97 : vector<16x64xf32>
    %107 = vector.extract_strided_slice %106 {offsets = [0, 0], sizes = [12, 64], strides = [1, 1]} : vector<16x64xf32> to vector<12x64xf32>
    %108 = tpu.concatenate %23, %107 in 0 : vector<4x64xf32>, vector<12x64xf32> -> vector<16x64xf32>
    %109 = vector.extract_strided_slice %97 {offsets = [0, 0], sizes = [15, 64], strides = [1, 1]} : vector<16x64xf32> to vector<15x64xf32>
    %110 = tpu.concatenate %22, %109 in 0 : vector<1x64xf32>, vector<15x64xf32> -> vector<16x64xf32>
    %cst_51 = arith.constant 0xFF800000 : f32
    %111 = vector.broadcast %cst_51 : f32 to vector<16x64xf32>
    %112 = arith.select %21, %111, %110 : vector<16x64xi1>, vector<16x64xf32>
    %113 = vector.extract_strided_slice %112 {offsets = [0, 0], sizes = [12, 64], strides = [1, 1]} : vector<16x64xf32> to vector<12x64xf32>
    %114 = tpu.concatenate %23, %113 in 0 : vector<4x64xf32>, vector<12x64xf32> -> vector<16x64xf32>
    %115 = arith.maximumf %100, %105 : vector<16x64xf32>
    %116 = arith.maximumf %108, %114 : vector<16x64xf32>
    %117 = arith.maximumf %115, %116 : vector<16x64xf32>
    %cst_52 = arith.constant dense<0.000000e+00> : vector<1x64xf32>
    %118 = tpu.matmul %24, %117, %cst_52 {dimension_numbers = #tpu.dot_dimension_numbers<[1], [0], [0], [1], [0, 0, 1, 1], [], []>} : vector<1x16xf32>, vector<16x64xf32>, vector<1x64xf32> -> vector<1x64xf32>
    %c0_53 = arith.constant 0 : index
    %c0_54 = arith.constant 0 : index
    %c0_55 = arith.constant 0 : index
    %c0_56 = arith.constant 0 : index
    %119 = vector.load %arg3[%c0_53, %c0_54, %c0_55, %c0_56] : memref<1x8x64x49xbf16, #tpu.memory_space<vmem>>, vector<1x1x64x49xbf16>
    %120 = vector.shape_cast %119 : vector<1x1x64x49xbf16> to vector<64x49xbf16>
    %c0_57 = arith.constant 0 : index
    %c1_58 = arith.constant 1 : index
    %c0_59 = arith.constant 0 : index
    %c0_60 = arith.constant 0 : index
    %121 = vector.load %arg3[%c0_57, %c1_58, %c0_59, %c0_60] : memref<1x8x64x49xbf16, #tpu.memory_space<vmem>>, vector<1x1x64x49xbf16>
    %122 = vector.shape_cast %121 : vector<1x1x64x49xbf16> to vector<64x49xbf16>
    %c0_61 = arith.constant 0 : index
    %c2_62 = arith.constant 2 : index
    %c0_63 = arith.constant 0 : index
    %c0_64 = arith.constant 0 : index
    %123 = vector.load %arg3[%c0_61, %c2_62, %c0_63, %c0_64] : memref<1x8x64x49xbf16, #tpu.memory_space<vmem>>, vector<1x1x64x49xbf16>
    %124 = vector.shape_cast %123 : vector<1x1x64x49xbf16> to vector<64x49xbf16>
    %cst_65 = arith.constant dense<0.000000e+00> : vector<64x64xf32>
    %125 = tpu.matmul %120, %28, %cst_65 {dimension_numbers = #tpu.dot_dimension_numbers<[1], [0], [0], [1], [0, 0, 1, 1], [], []>} : vector<64x49xbf16>, vector<49x64xbf16>, vector<64x64xf32> -> vector<64x64xf32>
    %cst_66 = arith.constant dense<0.000000e+00> : vector<64x64xf32>
    %126 = tpu.matmul %122, %30, %cst_66 {dimension_numbers = #tpu.dot_dimension_numbers<[1], [0], [0], [1], [0, 0, 1, 1], [], []>} : vector<64x49xbf16>, vector<49x64xbf16>, vector<64x64xf32> -> vector<64x64xf32>
    %127 = arith.addf %125, %126 : vector<64x64xf32>
    %cst_67 = arith.constant dense<0.000000e+00> : vector<64x64xf32>
    %128 = tpu.matmul %124, %32, %cst_67 {dimension_numbers = #tpu.dot_dimension_numbers<[1], [0], [0], [1], [0, 0, 1, 1], [], []>} : vector<64x49xbf16>, vector<49x64xbf16>, vector<64x64xf32> -> vector<64x64xf32>
    %129 = arith.addf %127, %128 : vector<64x64xf32>
    %130 = vector.broadcast %25 : vector<1x64xf32> to vector<64x64xf32>
    %131 = arith.addf %129, %130 : vector<64x64xf32>
    %cst_68 = arith.constant 0.000000e+00 : f32
    %132 = vector.broadcast %cst_68 : f32 to vector<64x64xf32>
    %133 = arith.cmpf oge, %131, %132 : vector<64x64xf32>
    %134 = vector.broadcast %26 : vector<1x64xf32> to vector<64x64xf32>
    %135 = arith.mulf %134, %131 : vector<64x64xf32>
    %136 = arith.select %133, %131, %135 : vector<64x64xi1>, vector<64x64xf32>
    %137 = vector.extract_strided_slice %136 {offsets = [0, 0], sizes = [16, 64], strides = [1, 1]} : vector<64x64xf32> to vector<16x64xf32>
    %138 = vector.extract_strided_slice %136 {offsets = [16, 0], sizes = [16, 64], strides = [1, 1]} : vector<64x64xf32> to vector<16x64xf32>
    %139 = vector.extract_strided_slice %136 {offsets = [32, 0], sizes = [16, 64], strides = [1, 1]} : vector<64x64xf32> to vector<16x64xf32>
    %140 = vector.extract_strided_slice %136 {offsets = [48, 0], sizes = [16, 64], strides = [1, 1]} : vector<64x64xf32> to vector<16x64xf32>
    %141 = arith.maximumf %137, %138 : vector<16x64xf32>
    %142 = arith.maximumf %139, %140 : vector<16x64xf32>
    %143 = arith.maximumf %141, %142 : vector<16x64xf32>
    %144 = arith.maximumf %138, %140 : vector<16x64xf32>
    %145 = vector.extract_strided_slice %144 {offsets = [0, 0], sizes = [15, 64], strides = [1, 1]} : vector<16x64xf32> to vector<15x64xf32>
    %146 = tpu.concatenate %22, %145 in 0 : vector<1x64xf32>, vector<15x64xf32> -> vector<16x64xf32>
    %cst_69 = arith.constant 0xFF800000 : f32
    %147 = vector.broadcast %cst_69 : f32 to vector<16x64xf32>
    %148 = arith.select %21, %147, %146 : vector<16x64xi1>, vector<16x64xf32>
    %149 = arith.maximumf %139, %140 : vector<16x64xf32>
    %150 = vector.extract_strided_slice %149 {offsets = [0, 0], sizes = [12, 64], strides = [1, 1]} : vector<16x64xf32> to vector<12x64xf32>
    %151 = tpu.concatenate %23, %150 in 0 : vector<4x64xf32>, vector<12x64xf32> -> vector<16x64xf32>
    %152 = vector.extract_strided_slice %140 {offsets = [0, 0], sizes = [15, 64], strides = [1, 1]} : vector<16x64xf32> to vector<15x64xf32>
    %153 = tpu.concatenate %22, %152 in 0 : vector<1x64xf32>, vector<15x64xf32> -> vector<16x64xf32>
    %cst_70 = arith.constant 0xFF800000 : f32
    %154 = vector.broadcast %cst_70 : f32 to vector<16x64xf32>
    %155 = arith.select %21, %154, %153 : vector<16x64xi1>, vector<16x64xf32>
    %156 = vector.extract_strided_slice %155 {offsets = [0, 0], sizes = [12, 64], strides = [1, 1]} : vector<16x64xf32> to vector<12x64xf32>
    %157 = tpu.concatenate %23, %156 in 0 : vector<4x64xf32>, vector<12x64xf32> -> vector<16x64xf32>
    %158 = arith.maximumf %143, %148 : vector<16x64xf32>
    %159 = arith.maximumf %151, %157 : vector<16x64xf32>
    %160 = arith.maximumf %158, %159 : vector<16x64xf32>
    %cst_71 = arith.constant dense<0.000000e+00> : vector<1x64xf32>
    %161 = tpu.matmul %24, %160, %cst_71 {dimension_numbers = #tpu.dot_dimension_numbers<[1], [0], [0], [1], [0, 0, 1, 1], [], []>} : vector<1x16xf32>, vector<16x64xf32>, vector<1x64xf32> -> vector<1x64xf32>
    %c0_72 = arith.constant 0 : index
    %c1_73 = arith.constant 1 : index
    %c0_74 = arith.constant 0 : index
    %c0_75 = arith.constant 0 : index
    %162 = vector.load %arg3[%c0_72, %c1_73, %c0_74, %c0_75] : memref<1x8x64x49xbf16, #tpu.memory_space<vmem>>, vector<1x1x64x49xbf16>
    %163 = vector.shape_cast %162 : vector<1x1x64x49xbf16> to vector<64x49xbf16>
    %c0_76 = arith.constant 0 : index
    %c2_77 = arith.constant 2 : index
    %c0_78 = arith.constant 0 : index
    %c0_79 = arith.constant 0 : index
    %164 = vector.load %arg3[%c0_76, %c2_77, %c0_78, %c0_79] : memref<1x8x64x49xbf16, #tpu.memory_space<vmem>>, vector<1x1x64x49xbf16>
    %165 = vector.shape_cast %164 : vector<1x1x64x49xbf16> to vector<64x49xbf16>
    %c0_80 = arith.constant 0 : index
    %c3 = arith.constant 3 : index
    %c0_81 = arith.constant 0 : index
    %c0_82 = arith.constant 0 : index
    %166 = vector.load %arg3[%c0_80, %c3, %c0_81, %c0_82] : memref<1x8x64x49xbf16, #tpu.memory_space<vmem>>, vector<1x1x64x49xbf16>
    %167 = vector.shape_cast %166 : vector<1x1x64x49xbf16> to vector<64x49xbf16>
    %cst_83 = arith.constant dense<0.000000e+00> : vector<64x64xf32>
    %168 = tpu.matmul %163, %28, %cst_83 {dimension_numbers = #tpu.dot_dimension_numbers<[1], [0], [0], [1], [0, 0, 1, 1], [], []>} : vector<64x49xbf16>, vector<49x64xbf16>, vector<64x64xf32> -> vector<64x64xf32>
    %cst_84 = arith.constant dense<0.000000e+00> : vector<64x64xf32>
    %169 = tpu.matmul %165, %30, %cst_84 {dimension_numbers = #tpu.dot_dimension_numbers<[1], [0], [0], [1], [0, 0, 1, 1], [], []>} : vector<64x49xbf16>, vector<49x64xbf16>, vector<64x64xf32> -> vector<64x64xf32>
    %170 = arith.addf %168, %169 : vector<64x64xf32>
    %cst_85 = arith.constant dense<0.000000e+00> : vector<64x64xf32>
    %171 = tpu.matmul %167, %32, %cst_85 {dimension_numbers = #tpu.dot_dimension_numbers<[1], [0], [0], [1], [0, 0, 1, 1], [], []>} : vector<64x49xbf16>, vector<49x64xbf16>, vector<64x64xf32> -> vector<64x64xf32>
    %172 = arith.addf %170, %171 : vector<64x64xf32>
    %173 = vector.broadcast %25 : vector<1x64xf32> to vector<64x64xf32>
    %174 = arith.addf %172, %173 : vector<64x64xf32>
    %cst_86 = arith.constant 0.000000e+00 : f32
    %175 = vector.broadcast %cst_86 : f32 to vector<64x64xf32>
    %176 = arith.cmpf oge, %174, %175 : vector<64x64xf32>
    %177 = vector.broadcast %26 : vector<1x64xf32> to vector<64x64xf32>
    %178 = arith.mulf %177, %174 : vector<64x64xf32>
    %179 = arith.select %176, %174, %178 : vector<64x64xi1>, vector<64x64xf32>
    %180 = vector.extract_strided_slice %179 {offsets = [0, 0], sizes = [16, 64], strides = [1, 1]} : vector<64x64xf32> to vector<16x64xf32>
    %181 = vector.extract_strided_slice %179 {offsets = [16, 0], sizes = [16, 64], strides = [1, 1]} : vector<64x64xf32> to vector<16x64xf32>
    %182 = vector.extract_strided_slice %179 {offsets = [32, 0], sizes = [16, 64], strides = [1, 1]} : vector<64x64xf32> to vector<16x64xf32>
    %183 = vector.extract_strided_slice %179 {offsets = [48, 0], sizes = [16, 64], strides = [1, 1]} : vector<64x64xf32> to vector<16x64xf32>
    %184 = arith.maximumf %180, %181 : vector<16x64xf32>
    %185 = arith.maximumf %182, %183 : vector<16x64xf32>
    %186 = arith.maximumf %184, %185 : vector<16x64xf32>
    %187 = arith.maximumf %181, %183 : vector<16x64xf32>
    %188 = vector.extract_strided_slice %187 {offsets = [0, 0], sizes = [15, 64], strides = [1, 1]} : vector<16x64xf32> to vector<15x64xf32>
    %189 = tpu.concatenate %22, %188 in 0 : vector<1x64xf32>, vector<15x64xf32> -> vector<16x64xf32>
    %cst_87 = arith.constant 0xFF800000 : f32
    %190 = vector.broadcast %cst_87 : f32 to vector<16x64xf32>
    %191 = arith.select %21, %190, %189 : vector<16x64xi1>, vector<16x64xf32>
    %192 = arith.maximumf %182, %183 : vector<16x64xf32>
    %193 = vector.extract_strided_slice %192 {offsets = [0, 0], sizes = [12, 64], strides = [1, 1]} : vector<16x64xf32> to vector<12x64xf32>
    %194 = tpu.concatenate %23, %193 in 0 : vector<4x64xf32>, vector<12x64xf32> -> vector<16x64xf32>
    %195 = vector.extract_strided_slice %183 {offsets = [0, 0], sizes = [15, 64], strides = [1, 1]} : vector<16x64xf32> to vector<15x64xf32>
    %196 = tpu.concatenate %22, %195 in 0 : vector<1x64xf32>, vector<15x64xf32> -> vector<16x64xf32>
    %cst_88 = arith.constant 0xFF800000 : f32
    %197 = vector.broadcast %cst_88 : f32 to vector<16x64xf32>
    %198 = arith.select %21, %197, %196 : vector<16x64xi1>, vector<16x64xf32>
    %199 = vector.extract_strided_slice %198 {offsets = [0, 0], sizes = [12, 64], strides = [1, 1]} : vector<16x64xf32> to vector<12x64xf32>
    %200 = tpu.concatenate %23, %199 in 0 : vector<4x64xf32>, vector<12x64xf32> -> vector<16x64xf32>
    %201 = arith.maximumf %186, %191 : vector<16x64xf32>
    %202 = arith.maximumf %194, %200 : vector<16x64xf32>
    %203 = arith.maximumf %201, %202 : vector<16x64xf32>
    %cst_89 = arith.constant dense<0.000000e+00> : vector<1x64xf32>
    %204 = tpu.matmul %24, %203, %cst_89 {dimension_numbers = #tpu.dot_dimension_numbers<[1], [0], [0], [1], [0, 0, 1, 1], [], []>} : vector<1x16xf32>, vector<16x64xf32>, vector<1x64xf32> -> vector<1x64xf32>
    %c0_90 = arith.constant 0 : index
    %c2_91 = arith.constant 2 : index
    %c0_92 = arith.constant 0 : index
    %c0_93 = arith.constant 0 : index
    %205 = vector.load %arg3[%c0_90, %c2_91, %c0_92, %c0_93] : memref<1x8x64x49xbf16, #tpu.memory_space<vmem>>, vector<1x1x64x49xbf16>
    %206 = vector.shape_cast %205 : vector<1x1x64x49xbf16> to vector<64x49xbf16>
    %c0_94 = arith.constant 0 : index
    %c3_95 = arith.constant 3 : index
    %c0_96 = arith.constant 0 : index
    %c0_97 = arith.constant 0 : index
    %207 = vector.load %arg3[%c0_94, %c3_95, %c0_96, %c0_97] : memref<1x8x64x49xbf16, #tpu.memory_space<vmem>>, vector<1x1x64x49xbf16>
    %208 = vector.shape_cast %207 : vector<1x1x64x49xbf16> to vector<64x49xbf16>
    %c0_98 = arith.constant 0 : index
    %c4 = arith.constant 4 : index
    %c0_99 = arith.constant 0 : index
    %c0_100 = arith.constant 0 : index
    %209 = vector.load %arg3[%c0_98, %c4, %c0_99, %c0_100] : memref<1x8x64x49xbf16, #tpu.memory_space<vmem>>, vector<1x1x64x49xbf16>
    %210 = vector.shape_cast %209 : vector<1x1x64x49xbf16> to vector<64x49xbf16>
    %cst_101 = arith.constant dense<0.000000e+00> : vector<64x64xf32>
    %211 = tpu.matmul %206, %28, %cst_101 {dimension_numbers = #tpu.dot_dimension_numbers<[1], [0], [0], [1], [0, 0, 1, 1], [], []>} : vector<64x49xbf16>, vector<49x64xbf16>, vector<64x64xf32> -> vector<64x64xf32>
    %cst_102 = arith.constant dense<0.000000e+00> : vector<64x64xf32>
    %212 = tpu.matmul %208, %30, %cst_102 {dimension_numbers = #tpu.dot_dimension_numbers<[1], [0], [0], [1], [0, 0, 1, 1], [], []>} : vector<64x49xbf16>, vector<49x64xbf16>, vector<64x64xf32> -> vector<64x64xf32>
    %213 = arith.addf %211, %212 : vector<64x64xf32>
    %cst_103 = arith.constant dense<0.000000e+00> : vector<64x64xf32>
    %214 = tpu.matmul %210, %32, %cst_103 {dimension_numbers = #tpu.dot_dimension_numbers<[1], [0], [0], [1], [0, 0, 1, 1], [], []>} : vector<64x49xbf16>, vector<49x64xbf16>, vector<64x64xf32> -> vector<64x64xf32>
    %215 = arith.addf %213, %214 : vector<64x64xf32>
    %216 = vector.broadcast %25 : vector<1x64xf32> to vector<64x64xf32>
    %217 = arith.addf %215, %216 : vector<64x64xf32>
    %cst_104 = arith.constant 0.000000e+00 : f32
    %218 = vector.broadcast %cst_104 : f32 to vector<64x64xf32>
    %219 = arith.cmpf oge, %217, %218 : vector<64x64xf32>
    %220 = vector.broadcast %26 : vector<1x64xf32> to vector<64x64xf32>
    %221 = arith.mulf %220, %217 : vector<64x64xf32>
    %222 = arith.select %219, %217, %221 : vector<64x64xi1>, vector<64x64xf32>
    %223 = vector.extract_strided_slice %222 {offsets = [0, 0], sizes = [16, 64], strides = [1, 1]} : vector<64x64xf32> to vector<16x64xf32>
    %224 = vector.extract_strided_slice %222 {offsets = [16, 0], sizes = [16, 64], strides = [1, 1]} : vector<64x64xf32> to vector<16x64xf32>
    %225 = vector.extract_strided_slice %222 {offsets = [32, 0], sizes = [16, 64], strides = [1, 1]} : vector<64x64xf32> to vector<16x64xf32>
    %226 = vector.extract_strided_slice %222 {offsets = [48, 0], sizes = [16, 64], strides = [1, 1]} : vector<64x64xf32> to vector<16x64xf32>
    %227 = arith.maximumf %223, %224 : vector<16x64xf32>
    %228 = arith.maximumf %225, %226 : vector<16x64xf32>
    %229 = arith.maximumf %227, %228 : vector<16x64xf32>
    %230 = arith.maximumf %224, %226 : vector<16x64xf32>
    %231 = vector.extract_strided_slice %230 {offsets = [0, 0], sizes = [15, 64], strides = [1, 1]} : vector<16x64xf32> to vector<15x64xf32>
    %232 = tpu.concatenate %22, %231 in 0 : vector<1x64xf32>, vector<15x64xf32> -> vector<16x64xf32>
    %cst_105 = arith.constant 0xFF800000 : f32
    %233 = vector.broadcast %cst_105 : f32 to vector<16x64xf32>
    %234 = arith.select %21, %233, %232 : vector<16x64xi1>, vector<16x64xf32>
    %235 = arith.maximumf %225, %226 : vector<16x64xf32>
    %236 = vector.extract_strided_slice %235 {offsets = [0, 0], sizes = [12, 64], strides = [1, 1]} : vector<16x64xf32> to vector<12x64xf32>
    %237 = tpu.concatenate %23, %236 in 0 : vector<4x64xf32>, vector<12x64xf32> -> vector<16x64xf32>
    %238 = vector.extract_strided_slice %226 {offsets = [0, 0], sizes = [15, 64], strides = [1, 1]} : vector<16x64xf32> to vector<15x64xf32>
    %239 = tpu.concatenate %22, %238 in 0 : vector<1x64xf32>, vector<15x64xf32> -> vector<16x64xf32>
    %cst_106 = arith.constant 0xFF800000 : f32
    %240 = vector.broadcast %cst_106 : f32 to vector<16x64xf32>
    %241 = arith.select %21, %240, %239 : vector<16x64xi1>, vector<16x64xf32>
    %242 = vector.extract_strided_slice %241 {offsets = [0, 0], sizes = [12, 64], strides = [1, 1]} : vector<16x64xf32> to vector<12x64xf32>
    %243 = tpu.concatenate %23, %242 in 0 : vector<4x64xf32>, vector<12x64xf32> -> vector<16x64xf32>
    %244 = arith.maximumf %229, %234 : vector<16x64xf32>
    %245 = arith.maximumf %237, %243 : vector<16x64xf32>
    %246 = arith.maximumf %244, %245 : vector<16x64xf32>
    %cst_107 = arith.constant dense<0.000000e+00> : vector<1x64xf32>
    %247 = tpu.matmul %24, %246, %cst_107 {dimension_numbers = #tpu.dot_dimension_numbers<[1], [0], [0], [1], [0, 0, 1, 1], [], []>} : vector<1x16xf32>, vector<16x64xf32>, vector<1x64xf32> -> vector<1x64xf32>
    %c0_108 = arith.constant 0 : index
    %c3_109 = arith.constant 3 : index
    %c0_110 = arith.constant 0 : index
    %c0_111 = arith.constant 0 : index
    %248 = vector.load %arg3[%c0_108, %c3_109, %c0_110, %c0_111] : memref<1x8x64x49xbf16, #tpu.memory_space<vmem>>, vector<1x1x64x49xbf16>
    %249 = vector.shape_cast %248 : vector<1x1x64x49xbf16> to vector<64x49xbf16>
    %c0_112 = arith.constant 0 : index
    %c4_113 = arith.constant 4 : index
    %c0_114 = arith.constant 0 : index
    %c0_115 = arith.constant 0 : index
    %250 = vector.load %arg3[%c0_112, %c4_113, %c0_114, %c0_115] : memref<1x8x64x49xbf16, #tpu.memory_space<vmem>>, vector<1x1x64x49xbf16>
    %251 = vector.shape_cast %250 : vector<1x1x64x49xbf16> to vector<64x49xbf16>
    %c0_116 = arith.constant 0 : index
    %c5 = arith.constant 5 : index
    %c0_117 = arith.constant 0 : index
    %c0_118 = arith.constant 0 : index
    %252 = vector.load %arg3[%c0_116, %c5, %c0_117, %c0_118] : memref<1x8x64x49xbf16, #tpu.memory_space<vmem>>, vector<1x1x64x49xbf16>
    %253 = vector.shape_cast %252 : vector<1x1x64x49xbf16> to vector<64x49xbf16>
    %cst_119 = arith.constant dense<0.000000e+00> : vector<64x64xf32>
    %254 = tpu.matmul %249, %28, %cst_119 {dimension_numbers = #tpu.dot_dimension_numbers<[1], [0], [0], [1], [0, 0, 1, 1], [], []>} : vector<64x49xbf16>, vector<49x64xbf16>, vector<64x64xf32> -> vector<64x64xf32>
    %cst_120 = arith.constant dense<0.000000e+00> : vector<64x64xf32>
    %255 = tpu.matmul %251, %30, %cst_120 {dimension_numbers = #tpu.dot_dimension_numbers<[1], [0], [0], [1], [0, 0, 1, 1], [], []>} : vector<64x49xbf16>, vector<49x64xbf16>, vector<64x64xf32> -> vector<64x64xf32>
    %256 = arith.addf %254, %255 : vector<64x64xf32>
    %cst_121 = arith.constant dense<0.000000e+00> : vector<64x64xf32>
    %257 = tpu.matmul %253, %32, %cst_121 {dimension_numbers = #tpu.dot_dimension_numbers<[1], [0], [0], [1], [0, 0, 1, 1], [], []>} : vector<64x49xbf16>, vector<49x64xbf16>, vector<64x64xf32> -> vector<64x64xf32>
    %258 = arith.addf %256, %257 : vector<64x64xf32>
    %259 = vector.broadcast %25 : vector<1x64xf32> to vector<64x64xf32>
    %260 = arith.addf %258, %259 : vector<64x64xf32>
    %cst_122 = arith.constant 0.000000e+00 : f32
    %261 = vector.broadcast %cst_122 : f32 to vector<64x64xf32>
    %262 = arith.cmpf oge, %260, %261 : vector<64x64xf32>
    %263 = vector.broadcast %26 : vector<1x64xf32> to vector<64x64xf32>
    %264 = arith.mulf %263, %260 : vector<64x64xf32>
    %265 = arith.select %262, %260, %264 : vector<64x64xi1>, vector<64x64xf32>
    %266 = vector.extract_strided_slice %265 {offsets = [0, 0], sizes = [16, 64], strides = [1, 1]} : vector<64x64xf32> to vector<16x64xf32>
    %267 = vector.extract_strided_slice %265 {offsets = [16, 0], sizes = [16, 64], strides = [1, 1]} : vector<64x64xf32> to vector<16x64xf32>
    %268 = vector.extract_strided_slice %265 {offsets = [32, 0], sizes = [16, 64], strides = [1, 1]} : vector<64x64xf32> to vector<16x64xf32>
    %269 = vector.extract_strided_slice %265 {offsets = [48, 0], sizes = [16, 64], strides = [1, 1]} : vector<64x64xf32> to vector<16x64xf32>
    %270 = arith.maximumf %266, %267 : vector<16x64xf32>
    %271 = arith.maximumf %268, %269 : vector<16x64xf32>
    %272 = arith.maximumf %270, %271 : vector<16x64xf32>
    %273 = arith.maximumf %267, %269 : vector<16x64xf32>
    %274 = vector.extract_strided_slice %273 {offsets = [0, 0], sizes = [15, 64], strides = [1, 1]} : vector<16x64xf32> to vector<15x64xf32>
    %275 = tpu.concatenate %22, %274 in 0 : vector<1x64xf32>, vector<15x64xf32> -> vector<16x64xf32>
    %cst_123 = arith.constant 0xFF800000 : f32
    %276 = vector.broadcast %cst_123 : f32 to vector<16x64xf32>
    %277 = arith.select %21, %276, %275 : vector<16x64xi1>, vector<16x64xf32>
    %278 = arith.maximumf %268, %269 : vector<16x64xf32>
    %279 = vector.extract_strided_slice %278 {offsets = [0, 0], sizes = [12, 64], strides = [1, 1]} : vector<16x64xf32> to vector<12x64xf32>
    %280 = tpu.concatenate %23, %279 in 0 : vector<4x64xf32>, vector<12x64xf32> -> vector<16x64xf32>
    %281 = vector.extract_strided_slice %269 {offsets = [0, 0], sizes = [15, 64], strides = [1, 1]} : vector<16x64xf32> to vector<15x64xf32>
    %282 = tpu.concatenate %22, %281 in 0 : vector<1x64xf32>, vector<15x64xf32> -> vector<16x64xf32>
    %cst_124 = arith.constant 0xFF800000 : f32
    %283 = vector.broadcast %cst_124 : f32 to vector<16x64xf32>
    %284 = arith.select %21, %283, %282 : vector<16x64xi1>, vector<16x64xf32>
    %285 = vector.extract_strided_slice %284 {offsets = [0, 0], sizes = [12, 64], strides = [1, 1]} : vector<16x64xf32> to vector<12x64xf32>
    %286 = tpu.concatenate %23, %285 in 0 : vector<4x64xf32>, vector<12x64xf32> -> vector<16x64xf32>
    %287 = arith.maximumf %272, %277 : vector<16x64xf32>
    %288 = arith.maximumf %280, %286 : vector<16x64xf32>
    %289 = arith.maximumf %287, %288 : vector<16x64xf32>
    %cst_125 = arith.constant dense<0.000000e+00> : vector<1x64xf32>
    %290 = tpu.matmul %24, %289, %cst_125 {dimension_numbers = #tpu.dot_dimension_numbers<[1], [0], [0], [1], [0, 0, 1, 1], [], []>} : vector<1x16xf32>, vector<16x64xf32>, vector<1x64xf32> -> vector<1x64xf32>
    %c0_126 = arith.constant 0 : index
    %c4_127 = arith.constant 4 : index
    %c0_128 = arith.constant 0 : index
    %c0_129 = arith.constant 0 : index
    %291 = vector.load %arg3[%c0_126, %c4_127, %c0_128, %c0_129] : memref<1x8x64x49xbf16, #tpu.memory_space<vmem>>, vector<1x1x64x49xbf16>
    %292 = vector.shape_cast %291 : vector<1x1x64x49xbf16> to vector<64x49xbf16>
    %c0_130 = arith.constant 0 : index
    %c5_131 = arith.constant 5 : index
    %c0_132 = arith.constant 0 : index
    %c0_133 = arith.constant 0 : index
    %293 = vector.load %arg3[%c0_130, %c5_131, %c0_132, %c0_133] : memref<1x8x64x49xbf16, #tpu.memory_space<vmem>>, vector<1x1x64x49xbf16>
    %294 = vector.shape_cast %293 : vector<1x1x64x49xbf16> to vector<64x49xbf16>
    %c0_134 = arith.constant 0 : index
    %c6 = arith.constant 6 : index
    %c0_135 = arith.constant 0 : index
    %c0_136 = arith.constant 0 : index
    %295 = vector.load %arg3[%c0_134, %c6, %c0_135, %c0_136] : memref<1x8x64x49xbf16, #tpu.memory_space<vmem>>, vector<1x1x64x49xbf16>
    %296 = vector.shape_cast %295 : vector<1x1x64x49xbf16> to vector<64x49xbf16>
    %cst_137 = arith.constant dense<0.000000e+00> : vector<64x64xf32>
    %297 = tpu.matmul %292, %28, %cst_137 {dimension_numbers = #tpu.dot_dimension_numbers<[1], [0], [0], [1], [0, 0, 1, 1], [], []>} : vector<64x49xbf16>, vector<49x64xbf16>, vector<64x64xf32> -> vector<64x64xf32>
    %cst_138 = arith.constant dense<0.000000e+00> : vector<64x64xf32>
    %298 = tpu.matmul %294, %30, %cst_138 {dimension_numbers = #tpu.dot_dimension_numbers<[1], [0], [0], [1], [0, 0, 1, 1], [], []>} : vector<64x49xbf16>, vector<49x64xbf16>, vector<64x64xf32> -> vector<64x64xf32>
    %299 = arith.addf %297, %298 : vector<64x64xf32>
    %cst_139 = arith.constant dense<0.000000e+00> : vector<64x64xf32>
    %300 = tpu.matmul %296, %32, %cst_139 {dimension_numbers = #tpu.dot_dimension_numbers<[1], [0], [0], [1], [0, 0, 1, 1], [], []>} : vector<64x49xbf16>, vector<49x64xbf16>, vector<64x64xf32> -> vector<64x64xf32>
    %301 = arith.addf %299, %300 : vector<64x64xf32>
    %302 = vector.broadcast %25 : vector<1x64xf32> to vector<64x64xf32>
    %303 = arith.addf %301, %302 : vector<64x64xf32>
    %cst_140 = arith.constant 0.000000e+00 : f32
    %304 = vector.broadcast %cst_140 : f32 to vector<64x64xf32>
    %305 = arith.cmpf oge, %303, %304 : vector<64x64xf32>
    %306 = vector.broadcast %26 : vector<1x64xf32> to vector<64x64xf32>
    %307 = arith.mulf %306, %303 : vector<64x64xf32>
    %308 = arith.select %305, %303, %307 : vector<64x64xi1>, vector<64x64xf32>
    %309 = vector.extract_strided_slice %308 {offsets = [0, 0], sizes = [16, 64], strides = [1, 1]} : vector<64x64xf32> to vector<16x64xf32>
    %310 = vector.extract_strided_slice %308 {offsets = [16, 0], sizes = [16, 64], strides = [1, 1]} : vector<64x64xf32> to vector<16x64xf32>
    %311 = vector.extract_strided_slice %308 {offsets = [32, 0], sizes = [16, 64], strides = [1, 1]} : vector<64x64xf32> to vector<16x64xf32>
    %312 = vector.extract_strided_slice %308 {offsets = [48, 0], sizes = [16, 64], strides = [1, 1]} : vector<64x64xf32> to vector<16x64xf32>
    %313 = arith.maximumf %309, %310 : vector<16x64xf32>
    %314 = arith.maximumf %311, %312 : vector<16x64xf32>
    %315 = arith.maximumf %313, %314 : vector<16x64xf32>
    %316 = arith.maximumf %310, %312 : vector<16x64xf32>
    %317 = vector.extract_strided_slice %316 {offsets = [0, 0], sizes = [15, 64], strides = [1, 1]} : vector<16x64xf32> to vector<15x64xf32>
    %318 = tpu.concatenate %22, %317 in 0 : vector<1x64xf32>, vector<15x64xf32> -> vector<16x64xf32>
    %cst_141 = arith.constant 0xFF800000 : f32
    %319 = vector.broadcast %cst_141 : f32 to vector<16x64xf32>
    %320 = arith.select %21, %319, %318 : vector<16x64xi1>, vector<16x64xf32>
    %321 = arith.maximumf %311, %312 : vector<16x64xf32>
    %322 = vector.extract_strided_slice %321 {offsets = [0, 0], sizes = [12, 64], strides = [1, 1]} : vector<16x64xf32> to vector<12x64xf32>
    %323 = tpu.concatenate %23, %322 in 0 : vector<4x64xf32>, vector<12x64xf32> -> vector<16x64xf32>
    %324 = vector.extract_strided_slice %312 {offsets = [0, 0], sizes = [15, 64], strides = [1, 1]} : vector<16x64xf32> to vector<15x64xf32>
    %325 = tpu.concatenate %22, %324 in 0 : vector<1x64xf32>, vector<15x64xf32> -> vector<16x64xf32>
    %cst_142 = arith.constant 0xFF800000 : f32
    %326 = vector.broadcast %cst_142 : f32 to vector<16x64xf32>
    %327 = arith.select %21, %326, %325 : vector<16x64xi1>, vector<16x64xf32>
    %328 = vector.extract_strided_slice %327 {offsets = [0, 0], sizes = [12, 64], strides = [1, 1]} : vector<16x64xf32> to vector<12x64xf32>
    %329 = tpu.concatenate %23, %328 in 0 : vector<4x64xf32>, vector<12x64xf32> -> vector<16x64xf32>
    %330 = arith.maximumf %315, %320 : vector<16x64xf32>
    %331 = arith.maximumf %323, %329 : vector<16x64xf32>
    %332 = arith.maximumf %330, %331 : vector<16x64xf32>
    %cst_143 = arith.constant dense<0.000000e+00> : vector<1x64xf32>
    %333 = tpu.matmul %24, %332, %cst_143 {dimension_numbers = #tpu.dot_dimension_numbers<[1], [0], [0], [1], [0, 0, 1, 1], [], []>} : vector<1x16xf32>, vector<16x64xf32>, vector<1x64xf32> -> vector<1x64xf32>
    %c0_144 = arith.constant 0 : index
    %c5_145 = arith.constant 5 : index
    %c0_146 = arith.constant 0 : index
    %c0_147 = arith.constant 0 : index
    %334 = vector.load %arg3[%c0_144, %c5_145, %c0_146, %c0_147] : memref<1x8x64x49xbf16, #tpu.memory_space<vmem>>, vector<1x1x64x49xbf16>
    %335 = vector.shape_cast %334 : vector<1x1x64x49xbf16> to vector<64x49xbf16>
    %c0_148 = arith.constant 0 : index
    %c6_149 = arith.constant 6 : index
    %c0_150 = arith.constant 0 : index
    %c0_151 = arith.constant 0 : index
    %336 = vector.load %arg3[%c0_148, %c6_149, %c0_150, %c0_151] : memref<1x8x64x49xbf16, #tpu.memory_space<vmem>>, vector<1x1x64x49xbf16>
    %337 = vector.shape_cast %336 : vector<1x1x64x49xbf16> to vector<64x49xbf16>
    %c0_152 = arith.constant 0 : index
    %c7 = arith.constant 7 : index
    %c0_153 = arith.constant 0 : index
    %c0_154 = arith.constant 0 : index
    %338 = vector.load %arg3[%c0_152, %c7, %c0_153, %c0_154] : memref<1x8x64x49xbf16, #tpu.memory_space<vmem>>, vector<1x1x64x49xbf16>
    %339 = vector.shape_cast %338 : vector<1x1x64x49xbf16> to vector<64x49xbf16>
    %cst_155 = arith.constant dense<0.000000e+00> : vector<64x64xf32>
    %340 = tpu.matmul %335, %28, %cst_155 {dimension_numbers = #tpu.dot_dimension_numbers<[1], [0], [0], [1], [0, 0, 1, 1], [], []>} : vector<64x49xbf16>, vector<49x64xbf16>, vector<64x64xf32> -> vector<64x64xf32>
    %cst_156 = arith.constant dense<0.000000e+00> : vector<64x64xf32>
    %341 = tpu.matmul %337, %30, %cst_156 {dimension_numbers = #tpu.dot_dimension_numbers<[1], [0], [0], [1], [0, 0, 1, 1], [], []>} : vector<64x49xbf16>, vector<49x64xbf16>, vector<64x64xf32> -> vector<64x64xf32>
    %342 = arith.addf %340, %341 : vector<64x64xf32>
    %cst_157 = arith.constant dense<0.000000e+00> : vector<64x64xf32>
    %343 = tpu.matmul %339, %32, %cst_157 {dimension_numbers = #tpu.dot_dimension_numbers<[1], [0], [0], [1], [0, 0, 1, 1], [], []>} : vector<64x49xbf16>, vector<49x64xbf16>, vector<64x64xf32> -> vector<64x64xf32>
    %344 = arith.addf %342, %343 : vector<64x64xf32>
    %345 = vector.broadcast %25 : vector<1x64xf32> to vector<64x64xf32>
    %346 = arith.addf %344, %345 : vector<64x64xf32>
    %cst_158 = arith.constant 0.000000e+00 : f32
    %347 = vector.broadcast %cst_158 : f32 to vector<64x64xf32>
    %348 = arith.cmpf oge, %346, %347 : vector<64x64xf32>
    %349 = vector.broadcast %26 : vector<1x64xf32> to vector<64x64xf32>
    %350 = arith.mulf %349, %346 : vector<64x64xf32>
    %351 = arith.select %348, %346, %350 : vector<64x64xi1>, vector<64x64xf32>
    %352 = vector.extract_strided_slice %351 {offsets = [0, 0], sizes = [16, 64], strides = [1, 1]} : vector<64x64xf32> to vector<16x64xf32>
    %353 = vector.extract_strided_slice %351 {offsets = [16, 0], sizes = [16, 64], strides = [1, 1]} : vector<64x64xf32> to vector<16x64xf32>
    %354 = vector.extract_strided_slice %351 {offsets = [32, 0], sizes = [16, 64], strides = [1, 1]} : vector<64x64xf32> to vector<16x64xf32>
    %355 = vector.extract_strided_slice %351 {offsets = [48, 0], sizes = [16, 64], strides = [1, 1]} : vector<64x64xf32> to vector<16x64xf32>
    %356 = arith.maximumf %352, %353 : vector<16x64xf32>
    %357 = arith.maximumf %354, %355 : vector<16x64xf32>
    %358 = arith.maximumf %356, %357 : vector<16x64xf32>
    %359 = arith.maximumf %353, %355 : vector<16x64xf32>
    %360 = vector.extract_strided_slice %359 {offsets = [0, 0], sizes = [15, 64], strides = [1, 1]} : vector<16x64xf32> to vector<15x64xf32>
    %361 = tpu.concatenate %22, %360 in 0 : vector<1x64xf32>, vector<15x64xf32> -> vector<16x64xf32>
    %cst_159 = arith.constant 0xFF800000 : f32
    %362 = vector.broadcast %cst_159 : f32 to vector<16x64xf32>
    %363 = arith.select %21, %362, %361 : vector<16x64xi1>, vector<16x64xf32>
    %364 = arith.maximumf %354, %355 : vector<16x64xf32>
    %365 = vector.extract_strided_slice %364 {offsets = [0, 0], sizes = [12, 64], strides = [1, 1]} : vector<16x64xf32> to vector<12x64xf32>
    %366 = tpu.concatenate %23, %365 in 0 : vector<4x64xf32>, vector<12x64xf32> -> vector<16x64xf32>
    %367 = vector.extract_strided_slice %355 {offsets = [0, 0], sizes = [15, 64], strides = [1, 1]} : vector<16x64xf32> to vector<15x64xf32>
    %368 = tpu.concatenate %22, %367 in 0 : vector<1x64xf32>, vector<15x64xf32> -> vector<16x64xf32>
    %cst_160 = arith.constant 0xFF800000 : f32
    %369 = vector.broadcast %cst_160 : f32 to vector<16x64xf32>
    %370 = arith.select %21, %369, %368 : vector<16x64xi1>, vector<16x64xf32>
    %371 = vector.extract_strided_slice %370 {offsets = [0, 0], sizes = [12, 64], strides = [1, 1]} : vector<16x64xf32> to vector<12x64xf32>
    %372 = tpu.concatenate %23, %371 in 0 : vector<4x64xf32>, vector<12x64xf32> -> vector<16x64xf32>
    %373 = arith.maximumf %358, %363 : vector<16x64xf32>
    %374 = arith.maximumf %366, %372 : vector<16x64xf32>
    %375 = arith.maximumf %373, %374 : vector<16x64xf32>
    %cst_161 = arith.constant dense<0.000000e+00> : vector<1x64xf32>
    %376 = tpu.matmul %24, %375, %cst_161 {dimension_numbers = #tpu.dot_dimension_numbers<[1], [0], [0], [1], [0, 0, 1, 1], [], []>} : vector<1x16xf32>, vector<16x64xf32>, vector<1x64xf32> -> vector<1x64xf32>
    %377 = tpu.concatenate %75, %118, %161, %204, %247, %290, %333, %376 in 0 : vector<1x64xf32>, vector<1x64xf32>, vector<1x64xf32>, vector<1x64xf32>, vector<1x64xf32>, vector<1x64xf32>, vector<1x64xf32>, vector<1x64xf32> -> vector<8x64xf32>
    %c0_162 = arith.constant 0 : index
    %c0_163 = arith.constant 0 : index
    %378 = vector.load %arg7[%c0_162, %c0_163] : memref<64x32xf32, #tpu.memory_space<vmem>>, vector<64x32xf32>
    %cst_164 = arith.constant dense<0.000000e+00> : vector<8x32xf32>
    %379 = tpu.matmul %377, %378, %cst_164 {dimension_numbers = #tpu.dot_dimension_numbers<[1], [0], [0], [1], [0, 0, 1, 1], [], []>} : vector<8x64xf32>, vector<64x32xf32>, vector<8x32xf32> -> vector<8x32xf32>
    %c0_165 = arith.constant 0 : index
    %c0_166 = arith.constant 0 : index
    %380 = vector.load %arg8[%c0_165, %c0_166] : memref<1x32xf32, #tpu.memory_space<vmem>>, vector<1x32xf32>
    %381 = vector.broadcast %380 : vector<1x32xf32> to vector<8x32xf32>
    %382 = arith.addf %379, %381 : vector<8x32xf32>
    %cst_167 = arith.constant 0.000000e+00 : f32
    %383 = vector.broadcast %cst_167 : f32 to vector<8x32xf32>
    %384 = arith.maximumf %382, %383 : vector<8x32xf32>
    %c0_168 = arith.constant 0 : index
    %c0_169 = arith.constant 0 : index
    %c0_170 = arith.constant 0 : index
    %385 = vector.load %arg9[%c0_168, %c0_169, %c0_170] : memref<1x8x32xf32, #tpu.memory_space<vmem>>, vector<1x8x32xf32>
    %386 = vector.shape_cast %385 : vector<1x8x32xf32> to vector<8x32xf32>
    %387 = vector.shape_cast %384 : vector<8x32xf32> to vector<1x8x32xf32>
    tpu.vector_store %arg9[%c0_168, %c0_169, %c0_170], %387 {strides = array<i32>} : memref<1x8x32xf32, #tpu.memory_space<vmem>>, vector<1x8x32xf32>,
    %c0_171 = arith.constant 0 : index
    %c6_172 = arith.constant 6 : index
    %c0_173 = arith.constant 0 : index
    %c0_174 = arith.constant 0 : index
    %388 = vector.load %arg3[%c0_171, %c6_172, %c0_173, %c0_174] : memref<1x8x64x49xbf16, #tpu.memory_space<vmem>>, vector<1x1x64x49xbf16>
    %389 = vector.shape_cast %388 : vector<1x1x64x49xbf16> to vector<64x49xbf16>
    %c0_175 = arith.constant 0 : index
    %c0_176 = arith.constant 0 : index
    %c0_177 = arith.constant 0 : index
    %390 = vector.load %arg10[%c0_175, %c0_176, %c0_177] : memref<2x64x49xbf16, #tpu.memory_space<vmem>>, vector<1x64x49xbf16>
    %391 = vector.shape_cast %390 : vector<1x64x49xbf16> to vector<64x49xbf16>
    %392 = vector.shape_cast %389 : vector<64x49xbf16> to vector<1x64x49xbf16>
    tpu.vector_store %arg10[%c0_175, %c0_176, %c0_177], %392 {strides = array<i32>} : memref<2x64x49xbf16, #tpu.memory_space<vmem>>, vector<1x64x49xbf16>,
    %c0_178 = arith.constant 0 : index
    %c7_179 = arith.constant 7 : index
    %c0_180 = arith.constant 0 : index
    %c0_181 = arith.constant 0 : index
    %393 = vector.load %arg3[%c0_178, %c7_179, %c0_180, %c0_181] : memref<1x8x64x49xbf16, #tpu.memory_space<vmem>>, vector<1x1x64x49xbf16>
    %394 = vector.shape_cast %393 : vector<1x1x64x49xbf16> to vector<64x49xbf16>
    %c1_182 = arith.constant 1 : index
    %c0_183 = arith.constant 0 : index
    %c0_184 = arith.constant 0 : index
    %395 = vector.load %arg10[%c1_182, %c0_183, %c0_184] : memref<2x64x49xbf16, #tpu.memory_space<vmem>>, vector<1x64x49xbf16>
    %396 = vector.shape_cast %395 : vector<1x64x49xbf16> to vector<64x49xbf16>
    %397 = vector.shape_cast %394 : vector<64x49xbf16> to vector<1x64x49xbf16>
    tpu.vector_store %arg10[%c1_182, %c0_183, %c0_184], %397 {strides = array<i32>} : memref<2x64x49xbf16, #tpu.memory_space<vmem>>, vector<1x64x49xbf16>,
    return
  }
  func.func @transform_0(%arg0: i32, %arg1: i32) -> (i32, i32, i32, i32) {
    %c0_i32 = arith.constant 0 : i32
    %c0_i32_0 = arith.constant 0 : i32
    %c0_i32_1 = arith.constant 0 : i32
    %c0_i32_2 = arith.constant 0 : i32
    return %arg0, %c0_i32, %c0_i32_0, %c0_i32_1 : i32, i32, i32, i32
  }
  func.func @transform_1(%arg0: i32, %arg1: i32) -> (i32, i32, i32, i32) {
    %c0_i32 = arith.constant 0 : i32
    %c0_i32_0 = arith.constant 0 : i32
    %c0_i32_1 = arith.constant 0 : i32
    return %arg0, %arg1, %c0_i32, %c0_i32_0 : i32, i32, i32, i32
  }
  func.func @transform_2(%arg0: i32, %arg1: i32) -> (i32, i32, i32) {
    %c0_i32 = arith.constant 0 : i32
    %c0_i32_0 = arith.constant 0 : i32
    %c0_i32_1 = arith.constant 0 : i32
    %c0_i32_2 = arith.constant 0 : i32
    return %c0_i32, %c0_i32_0, %c0_i32_1 : i32, i32, i32
  }
  func.func @transform_3(%arg0: i32, %arg1: i32) -> (i32, i32) {
    %c0_i32 = arith.constant 0 : i32
    %c0_i32_0 = arith.constant 0 : i32
    %c0_i32_1 = arith.constant 0 : i32
    return %c0_i32, %c0_i32_0 : i32, i32
  }
  func.func @transform_4(%arg0: i32, %arg1: i32) -> (i32, i32) {
    %c0_i32 = arith.constant 0 : i32
    %c0_i32_0 = arith.constant 0 : i32
    %c0_i32_1 = arith.constant 0 : i32
    return %c0_i32, %c0_i32_0 : i32, i32
  }
  func.func @transform_5(%arg0: i32, %arg1: i32) -> (i32, i32) {
    %c0_i32 = arith.constant 0 : i32
    %c0_i32_0 = arith.constant 0 : i32
    %c0_i32_1 = arith.constant 0 : i32
    return %c0_i32, %c0_i32_0 : i32, i32
  }
  func.func @transform_6(%arg0: i32, %arg1: i32) -> (i32, i32) {
    %c0_i32 = arith.constant 0 : i32
    %c0_i32_0 = arith.constant 0 : i32
    %c0_i32_1 = arith.constant 0 : i32
    return %c0_i32, %c0_i32_0 : i32, i32
  }
  func.func @transform_7(%arg0: i32, %arg1: i32) -> (i32, i32, i32) {
    %c0_i32 = arith.constant 0 : i32
    %c0_i32_0 = arith.constant 0 : i32
    return %arg0, %arg1, %c0_i32 : i32, i32, i32
  }
}

</mosaic_0001>

<bundles_post_ra>
// kernel: a_call__.3
= control target key start
LH: loop header
LB: loop body
LE: loop exit
PB: predicated region body
PF: predicated region fallthrough
CT: control target
= control target key end

     0   :  { %vm82_vm0 = vcmask 261120   ;;  %v38_v0 = vlaneseq  ;;  %vm24_vm1 = vcmask 1040384   ;;  %vm31_vm3 = vcmask 1046528   ;;  %s846_s1 = inlined_call_operand.vmem [shape: f32[3,32,32], index: 1, kind: input, shape index: {}]   ;;  %s847_s0 = inlined_call_operand.vmem [shape: f32[16,32], index: 0, kind: input, shape index: {}]   ;;  %s848_s3 = inlined_call_operand.vmem [shape: f32[32,512], index: 3, kind: input, shape index: {}]   ;;  %s849_s2 = inlined_call_operand.vmem [shape: f32[1,32], index: 2, kind: input, shape index: {}]   ;;  %s850_s4 = inlined_call_operand.vmem [shape: f32[1,512], index: 4, kind: input, shape index: {}]   ;;  %s851_s5 = inlined_call_operand.vmem [shape: f32[16,512], index: 5, kind: output, shape index: {}]  }
   0x1   :  { %v552_v1 = vld [vmem:[%s846_s1 + $0x20] sm:$0xff]  ;;  %v553_v2 = vld [vmem:[%s846_s1 + $0x28] sm:$0xff]  ;;  %v554_v3 = vld [vmem:[%s846_s1 + $0x30] sm:$0xff]  ;;  %v667_v53 = vmov 0.0  }
   0x2   :  { %v622_v4 = vpack.c.bf16 %v553_v2, %v552_v1  ;;  %v555_v5 = vld [vmem:[%s846_s1 + $0x38] sm:$0xff]  ;;  %v20_v6 = vld [vmem:[%s847_s0] sm:$0xff]  ;;  %v713_v7 = vshrl.u32 %v38_v0, 7  ;;  %v74_v11 = vld [vmem:[%s846_s1 + $0x8] sm:$0xff]  ;;  %450 = vmatprep.mubr.f32.mxu1 %v667_v53 }
   0x3   :  { %v626_v8 = vpack.c.bf16 %v555_v5, %v554_v3  ;;  %v25_v9 = vrot.slane %v20_v6, 7  ;;  %597 = vmatprep.mubr.msk.f32.mxu0 %vm82_vm0, %v20_v6  ;;  %v73_v10 = vld [vmem:[%s846_s1] sm:$0xff]  ;;  %v343_v13 = vld [vmem:[%s848_s3 + $0x8] sm:$0xff]  ;;  %v75_v19 = vld [vmem:[%s846_s1 + $0x10] sm:$0xff]  ;;  %v32_v30 = vrot.slane %v20_v6, 1 }
   0x4   :  { %623 = vmatprep.subr.bf16.mxu0 %v622_v4  ;;  %v45_v12 = vand.u32 7, %v713_v7  ;;  %v630_v14 = vpack.c.bf16 %v74_v11, %v73_v10  ;;  %v40_v15 = vadd.s32 8, %v713_v7  ;;  %v347_v16 = vld [vmem:[%s848_s3 + $0x28] sm:$0xff]  ;;  %v342_v17 = vld [vmem:[%s848_s3] sm:$0xff]  ;;  %v76_v20 = vld [vmem:[%s846_s1 + $0x18] sm:$0xff]  ;;  %v362_v6 = vsub.s32 0, %v713_v7 }
   0x5   :  { %625 = vmatpush3.bf16.msra.mxu0 %v622_v4  ;;  %v346_v18 = vld [vmem:[%s848_s3 + $0x20] sm:$0xff]  ;;  %v30_v21 = vsel %vm24_vm1, 0.0, %v25_v9  ;;  %v646_v23 = vpack.c.bf16 %v347_v16, %v343_v13  ;;  %v21_v25 = vld [vmem:[%s847_s0 + $0x8] sm:$0xff]  ;;  %v634_v27 = vpack.c.bf16 %v76_v20, %v75_v19  ;;  %v562_v36 = vld [vmem:[%s846_s1 + $0x50] sm:$0xff] }
   0x6   :  { %627 = vmatprep.subr.bf16.mxu0 %v626_v8  ;;  %vm743_vm2 = vcmp.eq.s32.totalorder %v45_v12, 0  ;;  %v648_v24 = vpack.c.bf16 %v346_v18, %v342_v17  ;;  %v26_v26 = vrot.slane %v21_v25, 7  ;;  %v52_v29 = vand.u32 7, %v40_v15  ;;  %v560_v32 = vld [vmem:[%s846_s1 + $0x40] sm:$0xff]  ;;  %v561_v33 = vld [vmem:[%s846_s1 + $0x48] sm:$0xff]  ;;  %v563_v37 = vld [vmem:[%s846_s1 + $0x58] sm:$0xff] }
   0x7   :  { %647 = vmatprep.subr.bf16.mxu1 %v646_v23  ;;  %v67_v28 = vsel %vm743_vm2, 0.0, %v30_v21  ;;  %v33_v31 = vrot.slane %v21_v25, 1  ;;  %v638_v35 = vpack.c.bf16 %v561_v33, %v560_v32  ;;  %vm69_vm5 = vcmp.eq.s32.totalorder %v45_v12, 7  ;;  %v351_v44 = vld [vmem:[%s848_s3 + $0x48] sm:$0xff]  ;;  %v350_v47 = vld [vmem:[%s848_s3 + $0x40] sm:$0xff]  ;;  %v345_v50 = vld [vmem:[%s848_s3 + $0x18] sm:$0xff] }
   0x8   :  { %649 = vmatpush1.bf16.msra.mxu1 %v648_v24  ;;  %v27_v34 = vsel %vm24_vm1, %v25_v9, %v26_v26  ;;  %vm66_vm4 = vcmp.eq.s32.totalorder %v52_v29, 0  ;;  %v642_v40 = vpack.c.bf16 %v563_v37, %v562_v36  ;;  %vm70_vm6 = vcmp.eq.s32.totalorder %v52_v29, 7  ;;  %v355_v45 = vld [vmem:[%s848_s3 + $0x68] sm:$0xff]  ;;  %v354_v48 = vld [vmem:[%s848_s3 + $0x60] sm:$0xff]  ;;  %v349_v51 = vld [vmem:[%s848_s3 + $0x38] sm:$0xff] }
   0x9   :  { %629 = vmatpush3.bf16.msra.mxu0 %v626_v8  ;;  %v34_v38 = vsel %vm31_vm3, %v32_v30, %v33_v31  ;;  %v68_v39 = vsel %vm66_vm4, 0.0, %v27_v34  ;;  %v37_v42 = vsel %vm31_vm3, %v33_v31, 0.0  ;;  %v650_v46 = vpack.c.bf16 %v355_v45, %v351_v44  ;;  %v566_v54 = vld [vmem:[%s849_s2] ss:$0 sm:$0xff]  ;;  %v344_v56 = vld [vmem:[%s848_s3 + $0x10] sm:$0xff]  ;;  %v353_v59 = vld [vmem:[%s848_s3 + $0x58] sm:$0xff] }
   0xa   :  { %631 = vmatprep.subr.bf16.mxu0 %v630_v14  ;;  %v71_v41 = vsel %vm69_vm5, 0.0, %v34_v38  ;;  %v72_v43 = vsel %vm70_vm6, 0.0, %v37_v42  ;;  %v652_v49 = vpack.c.bf16 %v354_v48, %v350_v47  ;;  %v654_v52 = vpack.c.bf16 %v349_v51, %v345_v50  ;;  %v348_v57 = vld [vmem:[%s848_s3 + $0x30] sm:$0xff]  ;;  %v357_v60 = vld [vmem:[%s848_s3 + $0x78] sm:$0xff]  ;;  %v358_v8 = vld [vmem:[%s850_s4] sm:$0xf] }
   0xb   :  { %651 = vmatprep.subr.bf16.mxu1 %v650_v46  ;;  %v656_v62 = vpack.c.bf16 %v348_v57, %v344_v56  ;;  %v658_v1 = vpack.c.bf16 %v357_v60, %v353_v59  ;;  %v352_v2 = vld [vmem:[%s848_s3 + $0x50] sm:$0xff]  ;;  %v366_v9 = vsub.s32 1, %v713_v7  ;;  %v363_v10 = vrot.slane %v358_v8, %v362_v6 }
   0xc   :  { %598 = vmatmul.mubr.msk.f32.vlgmr.msra.gmra.mrb[0].mxu0 %vm82_vm0, %v21_v25  ;;  %653 = vmatpush1.bf16.msra.mxu1 %v652_v49  ;;  %v356_v3 = vld [vmem:[%s848_s3 + $0x70] sm:$0xff]  ;;  %v370_v15 = vsub.s32 2, %v713_v7  ;;  %v374_v17 = vsub.s32 3, %v713_v7 }
   0xd   :  { %633 = vmatpush3.bf16.msra.mxu0 %v630_v14  ;;  %608 = vmatprep.mubr.msk.f32.mxu0 %vm82_vm0, %v67_v28  ;;  %v660_v4 = vpack.c.bf16 %v356_v3, %v352_v2  ;;  %v367_v11 = vrot.slane %v358_v8, %v366_v9 }
   0xe   :  { %635 = vmatprep.subr.bf16.mxu0 %v634_v27  ;;  %655 = vmatprep.subr.bf16.mxu1 %v654_v52  ;;  %v371_v21 = vrot.slane %v358_v8, %v370_v15  ;;  %v375_v23 = vrot.slane %v358_v8, %v374_v17 }
  0x11   :  { %637 = vmatpush3.bf16.msra.mxu0 %v634_v27 }
  0x12   :  { %639 = vmatprep.subr.bf16.mxu0 %v638_v35 }
  0x14   :  { %609 = vmatmul.mubr.msk.f32.vlgmr.msra.gmra.mrb[0].mxu0 %vm82_vm0, %v68_v39 }
  0x15   :  { %641 = vmatpush3.bf16.msra.mxu0 %v638_v35  ;;  %619 = vmatprep.mubr.msk.f32.mxu0 %vm82_vm0, %v71_v41 }
  0x16   :  { %643 = vmatprep.subr.bf16.mxu0 %v642_v40 }
  0x19   :  { %645 = vmatpush3.bf16.msra.mxu0 %v642_v40 }
  0x1c   :  { %620 = vmatmul.mubr.msk.f32.vlgmr.msra.gmra.mrb[0].mxu0 %vm82_vm0, %v72_v43 }
  0xef   :  { %v621_v55 = vpop.f32.mrb[0].mxu0 }
  0xf0   :  { %v320_v58 = vpop.f32.mrb[1].mxu0  ;;  %v339_v63 = vadd.f32 %v621_v55, %v566_v54 }
  0xf1   :  { %v338_v61 = vadd.f32 %v566_v54, %v320_v58 }
  0xf2   :  { %v341_v5 = vmax.f32 %v339_v63, 0.0 }
  0xf3   :  { %v340_v0 = vmax.f32 %v338_v61, 0.0 }
  0xf5   :  { %567 = vmatmul.mubr.msk.f32.vlgmr.msra.gmra.mrb[0].mxu1 %vm82_vm0, %v340_v0 }
  0xf6   :  { %657 = vmatpush1.bf16.msra.mxu1 %v656_v62  ;;  %456 = vmatprep.mubr.f32.mxu1 %v667_v53 }
  0xf7   :  { %659 = vmatprep.subr.bf16.mxu1 %v658_v1 }
  0xf9   :  { %568 = vmatmul.mubr.msk.f32.gmra.mrb[2].mxu1 %vm82_vm0, %v341_v5 }
  0xfa   :  { %661 = vmatpush1.bf16.msra.mxu1 %v660_v4  ;;  %527 = vmatprep.mubr.f32.mxu1 %v667_v53 }
  0xfd   :  { %569 = vmatmul.mubr.msk.f32.vlgmr.msra.gmra.mrb[4].mxu1 %vm82_vm0, %v340_v0 }
  0xfe   :  { %533 = vmatprep.mubr.f32.mxu1 %v667_v53 }
 0x101   :  { %570 = vmatmul.mubr.msk.f32.gmra.mrb[6].mxu1 %vm82_vm0, %v341_v5 }
 0x1c8   :  { %v452_v12 = vpop.f32.mrb[0].mxu1 }
 0x1c9   :  { %v453_v13 = vadd.f32 %v452_v12, %v363_v10  ;;  %v454_v14 = vpop.f32.mrb[1].mxu1 }
 0x1ca   :  { %v455_v16 = vadd.f32 %v454_v14, %v367_v11 }
 0x1cb   :  { %540 = vst [vmem:[%s851_s5] sm:$0xff] %v453_v13 }
 0x1cc   :  { %541 = vst [vmem:[%s851_s5 + $0x8] sm:$0xff] %v455_v16  ;;  %v458_v18 = vpop.f32.mrb[2].mxu1 }
 0x1cd   :  { %v459_v19 = vadd.f32 %v458_v18, %v363_v10  ;;  %v460_v20 = vpop.f32.mrb[3].mxu1 }
 0x1ce   :  { %v461_v22 = vadd.f32 %v460_v20, %v367_v11 }
 0x1cf   :  { %544 = vst [vmem:[%s851_s5 + $0x20] sm:$0xff] %v459_v19 }
 0x1d0   :  { %545 = vst [vmem:[%s851_s5 + $0x28] sm:$0xff] %v461_v22  ;;  %v529_v7 = vpop.f32.mrb[4].mxu1 }
 0x1d1   :  { %v530_v24 = vadd.f32 %v529_v7, %v371_v21  ;;  %v531_v25 = vpop.f32.mrb[5].mxu1 }
 0x1d2   :  { %v532_v26 = vadd.f32 %v531_v25, %v375_v23 }
 0x1d3   :  { %542 = vst [vmem:[%s851_s5 + $0x10] sm:$0xff] %v530_v24 }
 0x1d4   :  { %543 = vst [vmem:[%s851_s5 + $0x18] sm:$0xff] %v532_v26  ;;  %v535_v27 = vpop.f32.mrb[6].mxu1 }
 0x1d5   :  { %v536_v28 = vadd.f32 %v535_v27, %v371_v21  ;;  %v537_v29 = vpop.f32.mrb[7].mxu1 }
 0x1d6   :  { %v538_v30 = vadd.f32 %v537_v29, %v375_v23 }
 0x1d7   :  { %546 = vst [vmem:[%s851_s5 + $0x30] sm:$0xff] %v536_v28 }
 0x1d8   :  { %547 = vst [vmem:[%s851_s5 + $0x38] sm:$0xff] %v538_v30 }

// kernel: a_call__.2
= control target key start
LH: loop header
LB: loop body
LE: loop exit
PB: predicated region body
PF: predicated region fallthrough
CT: control target
= control target key end

     0   :  { %s5335_s24 = smov 0   ;;  %s5337_s25 = smov 0   ;;  %s6366_s0 = inlined_call_operand.vmem [shape: bf16[2,2,64,49], index: 0, kind: input, shape index: {}]   ;;  %s6367_s1 = inlined_call_operand.vmem [shape: bf16[2,8,64,49], index: 1, kind: input, shape index: {}]   ;;  %s6368_s2 = inlined_call_operand.vmem [shape: bf16[3,49,64], index: 2, kind: input, shape index: {}]   ;;  %s6369_s3 = inlined_call_operand.vmem [shape: f32[1,64], index: 3, kind: input, shape index: {}]   ;;  %s6370_s4 = inlined_call_operand.vmem [shape: f32[1,64], index: 4, kind: input, shape index: {}]   ;;  %s6371_s5 = inlined_call_operand.vmem [shape: f32[64,32], index: 5, kind: input, shape index: {}]   ;;  %s6372_s6 = inlined_call_operand.vmem [shape: f32[1,32], index: 6, kind: input, shape index: {}]   ;;  %s6373_s7 = inlined_call_operand.vmem [shape: f32[2,8,32], index: 7, kind: output, shape index: {}]  }
   0x1   :  { %s5339_s26 = smov 0  }
   0x2 LB: > { %s29_s27 = sadd.s32 1, %s5284_s25  ;;  %p4054_p0 = scmp.ge.s32.totalorder %s5288_s26, 1  ;;  %s5288_s26 = sphi %s5339_s26, %s17_s26   ;;  %s5284_s25 = sphi %s5337_s25, %s6379_s25   ;;  %s5280_s24 = sphi %s5335_s24, %s6378_s24  }
   0x3   : > { %p31_p1 = scmp.ge.s32.totalorder %s29_s27, 2  ;;  %p269_p2 = scmp.lt.s32.totalorder %s5288_s26, 3 }
   0x5   : > { %s6381_s27 = smov (%p31_p1, %s29_s27), 0  ;;  %p270_p3 = pnand %p4054_p0, %p269_p2 }
   0x6   : > { %v5356_v0 = vld [vmem:[%s6368_s2 + $0x1c] sm:$0xff] (!%p270_p3)   ;;  %v5361_v1 = vld [vmem:[%s6368_s2 + $0x24] sm:$0xff] (!%p270_p3)   ;;  %vm519_vm0 = vcmask (!%p270_p3), 1040384   ;;  %v5198_v2 = vld [vmem:[%s6368_s2 + $0x34] ss:$0 sps:$4 sm:$0x11] (!%p270_p3)   ;;  %v414_v47 = vlaneseq (!%p270_p3) }
   0x7   : > { %273 = sbr.rel (%p270_p3) target bundleno = 1950 (0x79e), region = 48  ;;  %4543 = vmatprep.subr.bf16.mxu0 (!%p270_p3), %v5356_v0  ;;  %p313_p4 = scmp.lt.s32.totalorder (!%p270_p3), %s5280_s24, 1  ;;  %v5372_v3 = vld [vmem:[%s6368_s2 + $0x2c] sm:$0xff] (!%p270_p3)   ;;  %v5290_v4 = vmov (!%p270_p3), 0   ;;  %vm405_vm1 = vcmask (!%p270_p3), 400384   ;;  %v5404_v9 = vld [vmem:[%s6368_s2] sm:$0xff] (!%p270_p3)  }
   0x8   : > { %4544 = vmatpush3.bf16.msra.mxu0 (!%p270_p3), %v5356_v0  ;;  %v5375_v5 = vsel (!%p270_p3), %vm519_vm0, 65535, %v5290_v4  ;;  %v5417_v14 = vld [vmem:[%s6368_s2 + $0x8] sm:$0xff] (!%p270_p3)   ;;  %v5438_v21 = vld [vmem:[%s6368_s2 + $0x10] sm:$0xff] (!%p270_p3)   ;;  %v5210_v22 = vld [vmem:[%s6368_s2 + $0x18] ss:$0 sps:$4 sm:$0x11] (!%p270_p3)  }
   0x9   : > { %4545 = vmatprep.subr.bf16.mxu0 (!%p270_p3), %v5361_v1  ;;  %v5384_v6 = vand.u32 (!%p270_p3), %v5198_v2, %v5375_v5  ;;  %v5462_v30 = vand.u32 (!%p270_p3), %v5210_v22, %v5375_v5  ;;  %v5476_v33 = vld [vmem:[%s6368_s2 + $0x38] sm:$0xff] (!%p270_p3)   ;;  %v5484_v36 = vld [vmem:[%s6368_s2 + $0x40] sm:$0xff] (!%p270_p3)   ;;  %v5492_v38 = vld [vmem:[%s6368_s2 + $0x48] sm:$0xff] (!%p270_p3)   ;;  %v5291_v45 = vmov (!%p270_p3), 0.0|0.0   ;;  %vm5292_vm2 = vmmov (!%p270_p3), 0  }
   0xa   : > { %v5222_v39 = vld [vmem:[%s6368_s2 + $0x50] ss:$0 sps:$4 sm:$0x11] (!%p270_p3)   ;;  %5002 = vmatprep.subr.bf16.mxu1 (!%p270_p3), %v5291_v45  ;;  %v5293_v46 = vmov (!%p270_p3), 0.0   ;;  %v5538_v48 = vld [vmem:[%s6369_s3] ss:$0 sm:$0xff] (!%p270_p3) }
   0xb   : > { %v5506_v41 = vand.u32 (!%p270_p3), %v5222_v39, %v5375_v5  ;;  %4595 = vmatprep.mubr.msk.f32.mxu1 (!%p270_p3), %vm5292_vm2, %v5293_v46  ;;  %v5543_v49 = vld [vmem:[%s6370_s4] ss:$0 sm:$0xff] (!%p270_p3)  ;;  %v415_v53 = vshrl.u32 (!%p270_p3), %v414_v47, 7  ;;  %vm884_vm13 = vcmask (!%p270_p3), 1043456   ;;  %vm915_vm14 = vcmask (!%p270_p3), 130048  }
   0xc   : > { %4546 = vmatpush3.bf16.msra.mxu0 (!%p270_p3), %v5361_v1 }
   0xd   : > { %4547 = vmatprep.subr.bf16.mxu0 (!%p270_p3), %v5372_v3  ;;  %v416_v63 = vadd.s32 (!%p270_p3), 8, %v415_v53 }
   0xe   : > { %s6383_s24 = smov (!%p313_p4, %s5280_s24), 1 }
   0xf   : > { %s4316_s13 = sshll.u32 %s6383_s24, 6  ;;  %s4317_s14 = sshll.u32 %s6383_s24, 8 }
  0x10   : > { %s5389_s17 = scalar_lea.vmem %s6366_s0, %s4316_s13  ;;  %s5394_s20 = scalar_lea.vmem %s6367_s1, %s4317_s14  ;;  %4548 = vmatpush3.bf16.msra.mxu0 %v5372_v3 }
  0x11   : > { %v5199_v7 = vld [vmem:[%s5389_s17 + $0x20] sm:$0xff]   ;;  %v5201_v8 = vld [vmem:[%s5389_s17 + $0x28] sm:$0xff]   ;;  %4549 = vmatprep.subr.bf16.mxu0 %v5384_v6  ;;  %v5205_v10 = vld [vmem:[%s5389_s17 + $0x30] sm:$0xff]   ;;  %s4059_s30 = sshll.u32 %s6383_s24, 3 }
  0x12   : > { %410 = vst.msk [vmem:[#allocation2 + $0x20] sm:$0xff] %vm405_vm1, %v5199_v7  ;;  %411 = vst.msk [vmem:[#allocation2 + $0x28] sm:$0xff] %vm405_vm1, %v5201_v8  ;;  %v5200_v11 = vld [vmem:[%s5394_s20 + $0xe0] sm:$0xff]   ;;  %v5207_v12 = vld [vmem:[%s5389_s17 + $0x38] sm:$0xff]   ;;  %s335_s10 = scalar_lea.vmem %s6373_s7, %s4059_s30 }
  0x13   : > { %412 = vst.msk [vmem:[#allocation2 + $0x30] sm:$0xff] %vm405_vm1, %v5205_v10  ;;  %v5202_v13 = vld [vmem:[%s5394_s20 + $0xe8] sm:$0xff]   ;;  %413 = vst.msk [vmem:[#allocation2 + $0x38] sm:$0xff] %vm405_vm1, %v5207_v12  ;;  %v5211_v15 = vld [vmem:[%s5389_s17] sm:$0xff]  }
  0x14   : > { %4550 = vmatpush3.bf16.msra.mxu0 %v5384_v6  ;;  %v5206_v17 = vld [vmem:[%s5394_s20 + $0xf0] sm:$0xff]   ;;  %406 = vst.msk [vmem:[#allocation2] sm:$0xff] %vm405_vm1, %v5211_v15  ;;  %v5213_v19 = vld [vmem:[%s5389_s17 + $0x8] sm:$0xff]   ;;  %v5208_v20 = vld [vmem:[%s5394_s20 + $0xf8] sm:$0xff]  }
  0x15   : > { %4559 = vmatprep.subr.bf16.mxu0 %v5404_v9  ;;  %v5212_v24 = vld [vmem:[%s5394_s20 + $0xc0] sm:$0xff]   ;;  %407 = vst.msk [vmem:[#allocation2 + $0x8] sm:$0xff] %vm405_vm1, %v5213_v19  ;;  %v5217_v25 = vld [vmem:[%s5389_s17 + $0x10] sm:$0xff]   ;;  %v5214_v27 = vld [vmem:[%s5394_s20 + $0xc8] sm:$0xff]  }
  0x16   : > { %408 = vst.msk [vmem:[#allocation2 + $0x10] sm:$0xff] %vm405_vm1, %v5217_v25  ;;  %v5219_v29 = vld [vmem:[%s5389_s17 + $0x18] sm:$0xff]   ;;  %v5218_v32 = vld [vmem:[%s5394_s20 + $0xd0] sm:$0xff]   ;;  %v5501_v40 = vld [vmem:[%s5394_s20] sm:$0xff]  }
  0x17   : > { %409 = vst.msk [vmem:[#allocation2 + $0x18] sm:$0xff] %vm405_vm1, %v5219_v29  ;;  %v5220_v35 = vld [vmem:[%s5394_s20 + $0xd8] sm:$0xff]   ;;  %v5514_v42 = vld [vmem:[%s5394_s20 + $0x8] sm:$0xff]   ;;  %v5517_v43 = vld [vmem:[%s5394_s20 + $0x10] sm:$0xff]  }
  0x18   : > { %v5525_v44 = vld [vmem:[%s5394_s20 + $0x18] sm:$0xff]  }
  0x19   : > { %v5421_v16 = vld [vmem:[#allocation2 + $0x20] sm:$0xff]  ;;  %v5428_v18 = vld [vmem:[#allocation2 + $0x28] sm:$0xff] }
  0x1a   : > { %4551 = vmatprep.mubr.msk.bf16.mxu0 %vm405_vm1, %v5421_v16  ;;  %3954 = vst.msk [vmem:[#allocation2 + $0x20] sm:$0xff] %vm405_vm1, %v5200_v11  ;;  %3955 = vst.msk [vmem:[#allocation2 + $0x28] sm:$0xff] %vm405_vm1, %v5202_v13  ;;  %v5444_v23 = vld [vmem:[#allocation2 + $0x30] sm:$0xff]  ;;  %v5453_v26 = vld [vmem:[#allocation2 + $0x38] sm:$0xff]  ;;  %v421_v11 = vand.u32 3, %v415_v53 }
  0x1b   : > { %4552 = vmatmul.mubr.msk.bf16.vlgmr.msra.gmra.mrb[0].mxu0 %vm405_vm1, %v5428_v18  ;;  %3956 = vst.msk [vmem:[#allocation2 + $0x30] sm:$0xff] %vm405_vm1, %v5206_v17  ;;  %3957 = vst.msk [vmem:[#allocation2 + $0x38] sm:$0xff] %vm405_vm1, %v5208_v20  ;;  %v468_v28 = vld [vmem:[#allocation2] sm:$0xff]  ;;  %v428_v17 = vand.u32 3, %v416_v63 }
  0x1c   : > { %4560 = vmatpush3.bf16.msra.mxu0 %v5404_v9  ;;  %4555 = vmatprep.mubr.msk.bf16.mxu0 %vm405_vm1, %v5444_v23  ;;  %3918 = vst.msk [vmem:[#allocation2] sm:$0xff] %vm405_vm1, %v5212_v24  ;;  %v469_v31 = vld [vmem:[#allocation2 + $0x8] sm:$0xff]  ;;  %vm5559_vm9 = vcmp.eq.s32.totalorder %v421_v11, 0 }
  0x1d   : > { %4561 = vmatprep.subr.bf16.mxu0 %v5417_v14  ;;  %3919 = vst.msk [vmem:[#allocation2 + $0x8] sm:$0xff] %vm405_vm1, %v5214_v27  ;;  %v470_v34 = vld [vmem:[#allocation2 + $0x10] sm:$0xff]  ;;  %vm5564_vm11 = vcmp.eq.s32.totalorder %v428_v17, 0 }
  0x1e   : > { %3920 = vst.msk [vmem:[#allocation2 + $0x10] sm:$0xff] %vm405_vm1, %v5218_v32  ;;  %v471_v37 = vld [vmem:[#allocation2 + $0x18] sm:$0xff] }
  0x1f   : > { %3921 = vst.msk [vmem:[#allocation2 + $0x18] sm:$0xff] %vm405_vm1, %v5220_v35 }
  0x20   : > { %4562 = vmatpush3.bf16.msra.mxu0 %v5417_v14 }
  0x21   : > { %4563 = vmatprep.subr.bf16.mxu0 %v5438_v21 }
  0x23   : > { %4556 = vmatmul.mubr.msk.bf16.gmra.mrb[4].mxu0 %vm405_vm1, %v5453_v26 }
  0x24   : > { %4564 = vmatpush3.bf16.msra.mxu0 %v5438_v21  ;;  %4567 = vmatprep.mubr.msk.bf16.mxu0 %vm405_vm1, %v468_v28 }
  0x25   : > { %4565 = vmatprep.subr.bf16.mxu0 %v5462_v30 }
  0x28   : > { %4566 = vmatpush3.bf16.msra.mxu0 %v5462_v30 }
  0x29   : > { %4575 = vmatprep.subr.bf16.mxu0 %v5476_v33 }
  0x2b   : > { %4568 = vmatmul.mubr.msk.bf16.vlgmr.msra.gmra.mrb[0].mxu0 %vm405_vm1, %v469_v31 }
  0x2c   : > { %4576 = vmatpush3.bf16.msra.mxu0 %v5476_v33  ;;  %4571 = vmatprep.mubr.msk.bf16.mxu0 %vm405_vm1, %v470_v34  ;;  %v3800_v34 = vld [vmem:[%s6371_s5 + $0x30] sm:$0xff] }
  0x2d   : > { %4577 = vmatprep.subr.bf16.mxu0 %v5484_v36 }
  0x30   : > { %4578 = vmatpush3.bf16.msra.mxu0 %v5484_v36 }
  0x31   : > { %4579 = vmatprep.subr.bf16.mxu0 %v5492_v38 }
  0x33   : > { %4572 = vmatmul.mubr.msk.bf16.gmra.mrb[4].mxu0 %vm405_vm1, %v471_v37 }
  0x34   : > { %4580 = vmatpush3.bf16.msra.mxu0 %v5492_v38  ;;  %4583 = vmatprep.mubr.msk.bf16.mxu0 %vm405_vm1, %v5501_v40 }
  0x35   : > { %4581 = vmatprep.subr.bf16.mxu0 %v5506_v41 }
  0x38   : > { %4582 = vmatpush3.bf16.msra.mxu0 %v5506_v41 }
  0x39   : > { %5005 = vmatprep.subr.bf16.mxu0 %v5291_v45 }
  0x3b   : > { %4584 = vmatmul.mubr.msk.bf16.vlgmr.msra.gmra.mrb[0].mxu0 %vm405_vm1, %v5514_v42 }
  0x3c   : > { %4587 = vmatprep.mubr.msk.bf16.mxu0 %vm405_vm1, %v5517_v43 }
  0x43   : > { %4588 = vmatmul.mubr.msk.bf16.gmra.mrb[4].mxu0 %vm405_vm1, %v5525_v44 }
  0x44   : > { %4650 = vmatprep.mubr.msk.f32.mxu0 %vm5292_vm2, %v5293_v46 }
 0x10e   : > { %v4585_v50 = vpop.f32.mrb[0].mxu0 }
 0x10f   : > { %v828_v51 = vadd.f32 %v4585_v50, %v5538_v48  ;;  %v781_v52 = vpop.f32.mrb[1].mxu0 }
 0x110   : > { %v826_v54 = vadd.f32 %v5538_v48, %v781_v52  ;;  %v4586_v55 = vpop.f32.mrb[2].mxu0 }
 0x111   : > { %vm836_vm3 = vcmp.ge.f32.partialorder %v828_v51, 0.0  ;;  %v850_v56 = vmul.f32 %v5543_v49, %v828_v51  ;;  %v829_v57 = vadd.f32 %v4586_v55, %v5538_v48  ;;  %v784_v58 = vpop.f32.mrb[3].mxu0 }
 0x112   : > { %vm834_vm4 = vcmp.ge.f32.partialorder %v826_v54, 0.0  ;;  %v848_v59 = vmul.f32 %v5543_v49, %v826_v54  ;;  %v827_v60 = vadd.f32 %v5538_v48, %v784_v58 }
 0x113   : > { %v858_v61 = vsel %vm836_vm3, %v828_v51, %v850_v56  ;;  %vm837_vm5 = vcmp.ge.f32.partialorder %v829_v57, 0.0  ;;  %v851_v62 = vmul.f32 %v5543_v49, %v829_v57 }
 0x114   : > { %v856_v2 = vsel %vm834_vm4, %v826_v54, %v848_v59  ;;  %vm835_vm6 = vcmp.ge.f32.partialorder %v827_v60, 0.0  ;;  %v849_v4 = vmul.f32 %v5543_v49, %v827_v60 }
 0x115   : > { %v864_v5 = vmax.f32 %v856_v2, %v858_v61  ;;  %v859_v7 = vsel %vm837_vm5, %v829_v57, %v851_v62 }
 0x116   : > { %v857_v8 = vsel %vm835_vm6, %v827_v60, %v849_v4  ;;  %v4589_v10 = vpop.f32.mrb[4].mxu0 }
 0x117   : > { %v865_v12 = vmax.f32 %v857_v8, %v859_v7  ;;  %v832_v13 = vadd.f32 %v4589_v10, %v5538_v48  ;;  %v797_v15 = vpop.f32.mrb[5].mxu0 }
 0x118   : > { %v830_v19 = vadd.f32 %v5538_v48, %v797_v15  ;;  %v4590_v20 = vpop.f32.mrb[6].mxu0 }
 0x119   : > { %vm840_vm7 = vcmp.ge.f32.partialorder %v832_v13, 0.0  ;;  %v854_v22 = vmul.f32 %v5543_v49, %v832_v13  ;;  %v833_v24 = vadd.f32 %v4590_v20, %v5538_v48  ;;  %v800_v25 = vpop.f32.mrb[7].mxu0 }
 0x11a   : > { %vm838_vm8 = vcmp.ge.f32.partialorder %v830_v19, 0.0  ;;  %v852_v27 = vmul.f32 %v5543_v49, %v830_v19  ;;  %v831_v28 = vadd.f32 %v5538_v48, %v800_v25 }
 0x11b   : > { %v862_v31 = vsel %vm840_vm7, %v832_v13, %v854_v22  ;;  %vm841_vm10 = vcmp.ge.f32.partialorder %v833_v24, 0.0  ;;  %v855_v32 = vmul.f32 %v5543_v49, %v833_v24 }
 0x11c   : > { %v870_v35 = vmax.f32 %v858_v61, %v862_v31  ;;  %v893_v37 = vrot.slane %v862_v31, 7  ;;  %v860_v39 = vsel %vm838_vm8, %v830_v19, %v852_v27  ;;  %vm839_vm12 = vcmp.ge.f32.partialorder %v831_v28, 0.0 }
 0x11d   : > { %v866_v47 = vmax.f32 %v860_v39, %v862_v31  ;;  %v863_v50 = vsel %vm841_vm10, %v833_v24, %v855_v32  ;;  %v853_v51 = vmul.f32 %v5543_v49, %v831_v28 }
 0x11e   : > { %v874_v52 = vrot.slane %v870_v35, 7  ;;  %v898_v53 = vsel %vm519_vm0, -inf, %v893_v37  ;;  %v871_v54 = vmax.f32 %v859_v7, %v863_v50  ;;  %v894_v55 = vrot.slane %v863_v50, 7 }
 0x11f   : > { %v885_v56 = vrot.slane %v866_v47, 4  ;;  %v861_v57 = vsel %vm839_vm12, %v831_v28, %v853_v51  ;;  %v868_v58 = vmax.f32 %v864_v5, %v866_v47  ;;  %v899_v59 = vsel %vm5559_vm9, -inf, %v898_v53 }
 0x120   : > { %v875_v60 = vrot.slane %v871_v54, 7  ;;  %v895_v61 = vsel %vm519_vm0, %v893_v37, %v894_v55  ;;  %v867_v62 = vmax.f32 %v861_v57, %v863_v50  ;;  %v879_v63 = vsel %vm519_vm0, -inf, %v874_v52 }
 0x121   : > { %v880_v2 = vsel %vm5559_vm9, -inf, %v879_v63  ;;  %v890_v4 = vsel %vm884_vm13, -inf, %v885_v56  ;;  %v900_v7 = vsel %vm5564_vm11, -inf, %v895_v61  ;;  %v903_v8 = vrot.slane %v899_v59, 4 }
 0x122   : > { %v886_v10 = vrot.slane %v867_v62, 4  ;;  %v869_v5 = vmax.f32 %v865_v12, %v867_v62  ;;  %v876_v11 = vsel %vm519_vm0, %v874_v52, %v875_v60  ;;  %v904_v13 = vrot.slane %v900_v7, 4 }
 0x123   : > { %v881_v15 = vsel %vm5564_vm11, -inf, %v876_v11  ;;  %v908_v17 = vsel %vm884_vm13, -inf, %v903_v8  ;;  %v909_v19 = vmax.f32 %v868_v58, %v880_v2  ;;  %v5294_v12 = vmov 0.0625  }
 0x124   : > { %v887_v20 = vsel %vm884_vm13, %v885_v56, %v886_v10  ;;  %v905_v22 = vsel %vm884_vm13, %v903_v8, %v904_v13  ;;  %v910_v24 = vmax.f32 %v869_v5, %v881_v15  ;;  %v911_v25 = vmax.f32 %v890_v4, %v908_v17 }
 0x125   : > { %v912_v27 = vmax.f32 %v887_v20, %v905_v22 }
 0x126   : > { %v913_v28 = vmax.f32 %v909_v19, %v911_v25 }
 0x127   : > { %v914_v31 = vmax.f32 %v910_v24, %v912_v27 }
 0x129   : > { %v5003_v32 = vpack.c.bf16 %v914_v31, %v913_v28 }
 0x12b   : > { %5004 = vmatpush3.bf16.msra.mxu1 %v5003_v32 }
 0x12c   : > { %4598 = vmatprep.subr.bf16.mxu1 %v5356_v0 }
 0x12e   : > { %4596 = vmatmul.mubr.msk.f32.vlgmr.msra.gmra.mrb[0].mxu1 %vm915_vm14, %v5294_v12 }
 0x12f   : > { %4599 = vmatpush3.bf16.msra.mxu1 %v5356_v0  ;;  %4606 = vmatprep.mubr.msk.bf16.mxu1 %vm405_vm1, %v5501_v40 }
 0x130   : > { %4600 = vmatprep.subr.bf16.mxu1 %v5361_v1 }
 0x133   : > { %4601 = vmatpush3.bf16.msra.mxu1 %v5361_v1 }
 0x134   : > { %4602 = vmatprep.subr.bf16.mxu1 %v5372_v3 }
 0x137   : > { %4603 = vmatpush3.bf16.msra.mxu1 %v5372_v3 }
 0x138   : > { %4604 = vmatprep.subr.bf16.mxu1 %v5384_v6 }
 0x13b   : > { %4605 = vmatpush3.bf16.msra.mxu1 %v5384_v6 }
 0x13c   : > { %4614 = vmatprep.subr.bf16.mxu1 %v5404_v9 }
 0x13e   : > { %4607 = vmatmul.mubr.msk.bf16.vlgmr.msra.gmra.mrb[4].mxu1 %vm405_vm1, %v5514_v42 }
 0x13f   : > { %4615 = vmatpush3.bf16.msra.mxu1 %v5404_v9  ;;  %4610 = vmatprep.mubr.msk.bf16.mxu1 %vm405_vm1, %v5517_v43 }
 0x140   : > { %4616 = vmatprep.subr.bf16.mxu1 %v5417_v14 }
 0x143   : > { %4617 = vmatpush3.bf16.msra.mxu1 %v5417_v14 }
 0x144   : > { %4618 = vmatprep.subr.bf16.mxu1 %v5438_v21 }
 0x146   : > { %4611 = vmatmul.mubr.msk.bf16.gmra.mrb[8].mxu1 %vm405_vm1, %v5525_v44 }
 0x147   : > { %4619 = vmatpush3.bf16.msra.mxu1 %v5438_v21  ;;  %4622 = vmatprep.mubr.msk.bf16.mxu1 %vm405_vm1, %v5421_v16  ;;  %v5622_v16 = vld [vmem:[%s5394_s20 + $0x20] sm:$0xff]  }
 0x148   : > { %4620 = vmatprep.subr.bf16.mxu1 %v5462_v30 }
 0x14b   : > { %4621 = vmatpush3.bf16.msra.mxu1 %v5462_v30 }
 0x14c   : > { %4630 = vmatprep.subr.bf16.mxu1 %v5476_v33 }
 0x14e   : > { %4623 = vmatmul.mubr.msk.bf16.vlgmr.msra.gmra.mrb[4].mxu1 %vm405_vm1, %v5428_v18  ;;  %v5632_v18 = vld [vmem:[%s5394_s20 + $0x28] sm:$0xff]  }
 0x14f   : > { %4631 = vmatpush3.bf16.msra.mxu1 %v5476_v33  ;;  %4626 = vmatprep.mubr.msk.bf16.mxu1 %vm405_vm1, %v5444_v23  ;;  %v5636_v23 = vld [vmem:[%s5394_s20 + $0x30] sm:$0xff]  }
 0x150   : > { %4632 = vmatprep.subr.bf16.mxu1 %v5484_v36 }
 0x153   : > { %4633 = vmatpush3.bf16.msra.mxu1 %v5484_v36 }
 0x154   : > { %4634 = vmatprep.subr.bf16.mxu1 %v5492_v38 }
 0x156   : > { %4627 = vmatmul.mubr.msk.bf16.gmra.mrb[8].mxu1 %vm405_vm1, %v5453_v26  ;;  %v5646_v26 = vld [vmem:[%s5394_s20 + $0x38] sm:$0xff]  }
 0x157   : > { %4635 = vmatpush3.bf16.msra.mxu1 %v5492_v38  ;;  %4638 = vmatprep.mubr.msk.bf16.mxu1 %vm405_vm1, %v5622_v16 }
 0x158   : > { %4636 = vmatprep.subr.bf16.mxu1 %v5506_v41 }
 0x15b   : > { %4637 = vmatpush3.bf16.msra.mxu1 %v5506_v41 }
 0x15c   : > { %4653 = vmatprep.subr.bf16.mxu1 %v5356_v0 }
 0x15e   : > { %4639 = vmatmul.mubr.msk.bf16.vlgmr.msra.gmra.mrb[4].mxu1 %vm405_vm1, %v5632_v18 }
 0x15f   : > { %4654 = vmatpush3.bf16.msra.mxu1 %v5356_v0  ;;  %4642 = vmatprep.mubr.msk.bf16.mxu1 %vm405_vm1, %v5636_v23 }
 0x160   : > { %4655 = vmatprep.subr.bf16.mxu1 %v5361_v1 }
 0x163   : > { %4656 = vmatpush3.bf16.msra.mxu1 %v5361_v1 }
 0x164   : > { %4657 = vmatprep.subr.bf16.mxu1 %v5372_v3 }
 0x166   : > { %4643 = vmatmul.mubr.msk.bf16.gmra.mrb[8].mxu1 %vm405_vm1, %v5646_v26 }
 0x167   : > { %4658 = vmatpush3.bf16.msra.mxu1 %v5372_v3  ;;  %4661 = vmatprep.mubr.msk.bf16.mxu1 %vm405_vm1, %v5622_v16 }
 0x168   : > { %4659 = vmatprep.subr.bf16.mxu1 %v5384_v6 }
 0x16b   : > { %4660 = vmatpush3.bf16.msra.mxu1 %v5384_v6 }
 0x16c   : > { %4669 = vmatprep.subr.bf16.mxu1 %v5404_v9 }
 0x16e   : > { %4662 = vmatmul.mubr.msk.bf16.vlgmr.msra.gmra.mrb[12].mxu1 %vm405_vm1, %v5632_v18 }
 0x16f   : > { %4670 = vmatpush3.bf16.msra.mxu1 %v5404_v9  ;;  %4665 = vmatprep.mubr.msk.bf16.mxu1 %vm405_vm1, %v5636_v23 }
 0x170   : > { %4671 = vmatprep.subr.bf16.mxu1 %v5417_v14 }
 0x173   : > { %4672 = vmatpush3.bf16.msra.mxu1 %v5417_v14 }
 0x174   : > { %4673 = vmatprep.subr.bf16.mxu1 %v5438_v21 }
 0x176   : > { %4666 = vmatmul.mubr.msk.bf16.gmra.mrb[16].mxu1 %vm405_vm1, %v5646_v26 }
 0x177   : > { %4674 = vmatpush3.bf16.msra.mxu1 %v5438_v21  ;;  %4677 = vmatprep.mubr.msk.bf16.mxu1 %vm405_vm1, %v5501_v40  ;;  %v5682_v40 = vld [vmem:[%s5394_s20 + $0x40] sm:$0xff]  }
 0x178   : > { %4675 = vmatprep.subr.bf16.mxu1 %v5462_v30 }
 0x17b   : > { %4676 = vmatpush3.bf16.msra.mxu1 %v5462_v30 }
 0x17c   : > { %4685 = vmatprep.subr.bf16.mxu1 %v5476_v33 }
 0x17e   : > { %4678 = vmatmul.mubr.msk.bf16.vlgmr.msra.gmra.mrb[12].mxu1 %vm405_vm1, %v5514_v42  ;;  %v5692_v42 = vld [vmem:[%s5394_s20 + $0x48] sm:$0xff]  }
 0x17f   : > { %4686 = vmatpush3.bf16.msra.mxu1 %v5476_v33  ;;  %4681 = vmatprep.mubr.msk.bf16.mxu1 %vm405_vm1, %v5517_v43  ;;  %v5696_v43 = vld [vmem:[%s5394_s20 + $0x50] sm:$0xff]  }
 0x180   : > { %4687 = vmatprep.subr.bf16.mxu1 %v5484_v36 }
 0x183   : > { %4688 = vmatpush3.bf16.msra.mxu1 %v5484_v36 }
 0x184   : > { %4689 = vmatprep.subr.bf16.mxu1 %v5492_v38 }
 0x186   : > { %4682 = vmatmul.mubr.msk.bf16.gmra.mrb[16].mxu1 %vm405_vm1, %v5525_v44  ;;  %v5704_v44 = vld [vmem:[%s5394_s20 + $0x58] sm:$0xff]  }
 0x187   : > { %4690 = vmatpush3.bf16.msra.mxu1 %v5492_v38  ;;  %4693 = vmatprep.mubr.msk.bf16.mxu1 %vm405_vm1, %v5682_v40 }
 0x188   : > { %4691 = vmatprep.subr.bf16.mxu1 %v5506_v41 }
 0x18b   : > { %4692 = vmatpush3.bf16.msra.mxu1 %v5506_v41 }
 0x18c   : > { %5008 = vmatprep.subr.bf16.mxu1 %v5291_v45 }
 0x18e   : > { %4694 = vmatmul.mubr.msk.bf16.vlgmr.msra.gmra.mrb[12].mxu1 %vm405_vm1, %v5692_v42 }
 0x18f   : > { %4697 = vmatprep.mubr.msk.bf16.mxu1 %vm405_vm1, %v5696_v43 }
 0x196   : > { %4698 = vmatmul.mubr.msk.bf16.gmra.mrb[16].mxu1 %vm405_vm1, %v5704_v44 }
 0x197   : > { %4705 = vmatprep.mubr.msk.f32.mxu1 %vm5292_vm2, %v5293_v46 }
 0x201   : > { %v5710_v35 = vpop.f32.mrb[0].mxu1 }
 0x202   : > { %v4597_v37 = vpop.f32.mrb[1].mxu1 }
 0x231   : > { %v4640_v39 = vpop.f32.mrb[4].mxu1 }
 0x232   : > { %v1235_v47 = vadd.f32 %v4640_v39, %v5538_v48  ;;  %v1194_v50 = vpop.f32.mrb[5].mxu1 }
 0x233   : > { %v1233_v51 = vadd.f32 %v5538_v48, %v1194_v50  ;;  %v4641_v52 = vpop.f32.mrb[6].mxu1 }
 0x234   : > { %vm1243_vm15 = vcmp.ge.f32.partialorder %v1235_v47, 0.0  ;;  %v1251_v53 = vmul.f32 %v5543_v49, %v1235_v47  ;;  %v1236_v54 = vadd.f32 %v4641_v52, %v5538_v48  ;;  %v1197_v55 = vpop.f32.mrb[7].mxu1 }
 0x235   : > { %vm1241_vm3 = vcmp.ge.f32.partialorder %v1233_v51, 0.0  ;;  %v1249_v56 = vmul.f32 %v5543_v49, %v1233_v51  ;;  %v1234_v57 = vadd.f32 %v5538_v48, %v1197_v55 }
 0x236   : > { %v1259_v58 = vsel %vm1243_vm15, %v1235_v47, %v1251_v53  ;;  %vm1244_vm4 = vcmp.ge.f32.partialorder %v1236_v54, 0.0  ;;  %v1252_v59 = vmul.f32 %v5543_v49, %v1236_v54 }
 0x237   : > { %v1257_v60 = vsel %vm1241_vm3, %v1233_v51, %v1249_v56  ;;  %vm1242_vm5 = vcmp.ge.f32.partialorder %v1234_v57, 0.0  ;;  %v1250_v61 = vmul.f32 %v5543_v49, %v1234_v57 }
 0x238   : > { %v1265_v62 = vmax.f32 %v1257_v60, %v1259_v58  ;;  %v1260_v63 = vsel %vm1244_vm4, %v1236_v54, %v1252_v59 }
 0x239   : > { %v1258_v2 = vsel %vm1242_vm5, %v1234_v57, %v1250_v61  ;;  %v4644_v4 = vpop.f32.mrb[8].mxu1 }
 0x23a   : > { %v1266_v7 = vmax.f32 %v1258_v2, %v1260_v63  ;;  %v1239_v8 = vadd.f32 %v4644_v4, %v5538_v48  ;;  %v1210_v10 = vpop.f32.mrb[9].mxu1 }
 0x23b   : > { %v1237_v5 = vadd.f32 %v5538_v48, %v1210_v10  ;;  %v4645_v11 = vpop.f32.mrb[10].mxu1 }
 0x23c   : > { %vm1247_vm6 = vcmp.ge.f32.partialorder %v1239_v8, 0.0  ;;  %v1255_v13 = vmul.f32 %v5543_v49, %v1239_v8  ;;  %v1240_v15 = vadd.f32 %v4645_v11, %v5538_v48  ;;  %v1213_v17 = vpop.f32.mrb[11].mxu1 }
 0x23d   : > { %vm1245_vm7 = vcmp.ge.f32.partialorder %v1237_v5, 0.0  ;;  %v1253_v19 = vmul.f32 %v5543_v49, %v1237_v5  ;;  %v1238_v20 = vadd.f32 %v5538_v48, %v1213_v17 }
 0x23e   : > { %v1263_v22 = vsel %vm1247_vm6, %v1239_v8, %v1255_v13  ;;  %vm1248_vm8 = vcmp.ge.f32.partialorder %v1240_v15, 0.0  ;;  %v1256_v24 = vmul.f32 %v5543_v49, %v1240_v15 }
 0x23f   : > { %v1271_v25 = vmax.f32 %v1259_v58, %v1263_v22  ;;  %v1293_v27 = vrot.slane %v1263_v22, 7  ;;  %v1261_v28 = vsel %vm1245_vm7, %v1237_v5, %v1253_v19  ;;  %vm1246_vm10 = vcmp.ge.f32.partialorder %v1238_v20, 0.0 }
 0x240   : > { %v1267_v31 = vmax.f32 %v1261_v28, %v1263_v22  ;;  %v1264_v32 = vsel %vm1248_vm8, %v1240_v15, %v1256_v24  ;;  %v1254_v37 = vmul.f32 %v5543_v49, %v1238_v20 }
 0x241   : > { %v1275_v39 = vrot.slane %v1271_v25, 7  ;;  %v1298_v47 = vsel %vm519_vm0, -inf, %v1293_v27  ;;  %v1272_v50 = vmax.f32 %v1260_v63, %v1264_v32  ;;  %v1294_v51 = vrot.slane %v1264_v32, 7 }
 0x242   : > { %v1299_v52 = vsel %vm5559_vm9, -inf, %v1298_v47  ;;  %v1269_v53 = vmax.f32 %v1265_v62, %v1267_v31  ;;  %v1285_v54 = vrot.slane %v1267_v31, 4  ;;  %v1262_v55 = vsel %vm1246_vm10, %v1238_v20, %v1254_v37 }
 0x243   : > { %v1280_v56 = vsel %vm519_vm0, -inf, %v1275_v39  ;;  %v1303_v57 = vrot.slane %v1299_v52, 4  ;;  %v1276_v58 = vrot.slane %v1272_v50, 7  ;;  %v1295_v59 = vsel %vm519_vm0, %v1293_v27, %v1294_v51 }
 0x244   : > { %v1281_v60 = vsel %vm5559_vm9, -inf, %v1280_v56  ;;  %v1290_v61 = vsel %vm884_vm13, -inf, %v1285_v54  ;;  %v1300_v63 = vsel %vm5564_vm11, -inf, %v1295_v59  ;;  %v1268_v2 = vmax.f32 %v1262_v55, %v1264_v32 }
 0x245   : > { %v1308_v4 = vsel %vm884_vm13, -inf, %v1303_v57  ;;  %v1309_v62 = vmax.f32 %v1269_v53, %v1281_v60  ;;  %v1304_v8 = vrot.slane %v1300_v63, 4  ;;  %v1277_v10 = vsel %vm519_vm0, %v1275_v39, %v1276_v58 }
 0x246   : > { %v1311_v5 = vmax.f32 %v1290_v61, %v1308_v4  ;;  %v1270_v11 = vmax.f32 %v1266_v7, %v1268_v2  ;;  %v1282_v13 = vsel %vm5564_vm11, -inf, %v1277_v10  ;;  %v1286_v15 = vrot.slane %v1268_v2, 4 }
 0x247   : > { %v1305_v17 = vsel %vm884_vm13, %v1303_v57, %v1304_v8  ;;  %vm3783_vm10 = vcmask 1041408  }
 0x248   : > { %v1310_v19 = vmax.f32 %v1270_v11, %v1282_v13  ;;  %v1287_v20 = vsel %vm884_vm13, %v1285_v54, %v1286_v15  ;;  %v1313_v22 = vmax.f32 %v1309_v62, %v1311_v5 }
 0x249   : > { %v1312_v24 = vmax.f32 %v1287_v20, %v1305_v17 }
 0x24b   : > { %v1314_v25 = vmax.f32 %v1310_v19, %v1312_v24 }
 0x24d   : > { %v5006_v27 = vpack.c.bf16 %v1314_v25, %v1313_v22 }
 0x24f   : > { %5007 = vmatpush3.bf16.msra.mxu0 %v5006_v27 }
 0x250   : > { %4708 = vmatprep.subr.bf16.mxu0 %v5356_v0 }
 0x252   : > { %4651 = vmatmul.mubr.msk.f32.vlgmr.msra.gmra.mrb[8].mxu0 %vm915_vm14, %v5294_v12 }
 0x253   : > { %4709 = vmatpush3.bf16.msra.mxu0 %v5356_v0  ;;  %4716 = vmatprep.mubr.msk.bf16.mxu0 %vm405_vm1, %v5682_v40 }
 0x254   : > { %4710 = vmatprep.subr.bf16.mxu0 %v5361_v1 }
 0x257   : > { %4711 = vmatpush3.bf16.msra.mxu0 %v5361_v1 }
 0x258   : > { %4712 = vmatprep.subr.bf16.mxu0 %v5372_v3 }
 0x25b   : > { %4713 = vmatpush3.bf16.msra.mxu0 %v5372_v3 }
 0x25c   : > { %4714 = vmatprep.subr.bf16.mxu0 %v5384_v6 }
 0x25f   : > { %4715 = vmatpush3.bf16.msra.mxu0 %v5384_v6 }
 0x260   : > { %4724 = vmatprep.subr.bf16.mxu0 %v5404_v9 }
 0x261   : > { %v4695_v7 = vpop.f32.mrb[12].mxu1 }
 0x262   : > { %4717 = vmatmul.mubr.msk.bf16.vlgmr.msra.gmra.mrb[12].mxu0 %vm405_vm1, %v5692_v42  ;;  %v1631_v0 = vadd.f32 %v4695_v7, %v5538_v48  ;;  %v1590_v28 = vpop.f32.mrb[13].mxu1 }
 0x263   : > { %4725 = vmatpush3.bf16.msra.mxu0 %v5404_v9  ;;  %v1629_v1 = vadd.f32 %v5538_v48, %v1590_v28  ;;  %v4696_v31 = vpop.f32.mrb[14].mxu1  ;;  %4720 = vmatprep.mubr.msk.bf16.mxu0 %vm405_vm1, %v5696_v43 }
 0x264   : > { %vm1639_vm12 = vcmp.ge.f32.partialorder %v1631_v0, 0.0  ;;  %v1647_v3 = vmul.f32 %v5543_v49, %v1631_v0  ;;  %4726 = vmatprep.subr.bf16.mxu0 %v5417_v14  ;;  %v1632_v32 = vadd.f32 %v4696_v31, %v5538_v48  ;;  %v1593_v37 = vpop.f32.mrb[15].mxu1 }
 0x265   : > { %vm1637_vm15 = vcmp.ge.f32.partialorder %v1629_v1, 0.0  ;;  %v1645_v39 = vmul.f32 %v5543_v49, %v1629_v1  ;;  %v1630_v47 = vadd.f32 %v5538_v48, %v1593_v37 }
 0x266   : > { %vm1640_vm3 = vcmp.ge.f32.partialorder %v1632_v32, 0.0  ;;  %v1648_v9 = vmul.f32 %v5543_v49, %v1632_v32  ;;  %v1655_v50 = vsel %vm1639_vm12, %v1631_v0, %v1647_v3 }
 0x267   : > { %v1653_v51 = vsel %vm1637_vm15, %v1629_v1, %v1645_v39  ;;  %4727 = vmatpush3.bf16.msra.mxu0 %v5417_v14  ;;  %vm1638_vm4 = vcmp.ge.f32.partialorder %v1630_v47, 0.0  ;;  %v1646_v52 = vmul.f32 %v5543_v49, %v1630_v47 }
 0x268   : > { %v1661_v53 = vmax.f32 %v1653_v51, %v1655_v50  ;;  %4728 = vmatprep.subr.bf16.mxu0 %v5438_v21  ;;  %v1656_v54 = vsel %vm1640_vm3, %v1632_v32, %v1648_v9 }
 0x269   : > { %v1654_v55 = vsel %vm1638_vm4, %v1630_v47, %v1646_v52  ;;  %v4699_v56 = vpop.f32.mrb[16].mxu1 }
 0x26a   : > { %v1662_v57 = vmax.f32 %v1654_v55, %v1656_v54  ;;  %v1635_v58 = vadd.f32 %v4699_v56, %v5538_v48  ;;  %4721 = vmatmul.mubr.msk.bf16.gmra.mrb[16].mxu0 %vm405_vm1, %v5704_v44  ;;  %v1606_v59 = vpop.f32.mrb[17].mxu1  ;;  %v5812_v55 = vld [vmem:[%s5394_s20 + $0x60] sm:$0xff]  }
 0x26b   : > { %v1633_v60 = vadd.f32 %v5538_v48, %v1606_v59  ;;  %4729 = vmatpush3.bf16.msra.mxu0 %v5438_v21  ;;  %v4700_v14 = vpop.f32.mrb[18].mxu1  ;;  %4732 = vmatprep.mubr.msk.bf16.mxu0 %vm405_vm1, %v5622_v16 }
 0x26c   : > { %vm1643_vm5 = vcmp.ge.f32.partialorder %v1635_v58, 0.0  ;;  %v1651_v61 = vmul.f32 %v5543_v49, %v1635_v58  ;;  %v1636_v63 = vadd.f32 %v4700_v14, %v5538_v48  ;;  %v1609_v2 = vpop.f32.mrb[19].mxu1  ;;  %4730 = vmatprep.subr.bf16.mxu0 %v5462_v30 }
 0x26d   : > { %vm1641_vm6 = vcmp.ge.f32.partialorder %v1633_v60, 0.0  ;;  %v1649_v4 = vmul.f32 %v5543_v49, %v1633_v60  ;;  %v1634_v62 = vadd.f32 %v5538_v48, %v1609_v2  ;;  %v5846_v2 = vld [vmem:[%s6368_s2 + $0x24] sm:$0xff]  }
 0x26e   : > { %v1659_v8 = vsel %vm1643_vm5, %v1635_v58, %v1651_v61  ;;  %vm1644_vm7 = vcmp.ge.f32.partialorder %v1636_v63, 0.0  ;;  %v1652_v21 = vmul.f32 %v5543_v49, %v1636_v63  ;;  %v5823_v61 = vld [vmem:[%s5394_s20 + $0x68] sm:$0xff]  }
 0x26f   : > { %v1667_v10 = vmax.f32 %v1655_v50, %v1659_v8  ;;  %v1689_v5 = vrot.slane %v1659_v8, 7  ;;  %v1657_v16 = vsel %vm1641_vm6, %v1633_v60, %v1649_v4  ;;  %vm1642_vm8 = vcmp.ge.f32.partialorder %v1634_v62, 0.0  ;;  %4731 = vmatpush3.bf16.msra.mxu0 %v5462_v30  ;;  %v5852_v4 = vld [vmem:[%s5394_s20 + $0x78] sm:$0xff]  }
 0x270   : > { %v1663_v11 = vmax.f32 %v1657_v16, %v1659_v8  ;;  %v1660_v13 = vsel %vm1644_vm7, %v1636_v63, %v1652_v21  ;;  %v1650_v15 = vmul.f32 %v5543_v49, %v1634_v62  ;;  %4740 = vmatprep.subr.bf16.mxu0 %v5476_v33  ;;  %v5827_v63 = vld [vmem:[%s5394_s20 + $0x70] sm:$0xff]   ;;  %v5871_v8 = vld [vmem:[%s6368_s2] sm:$0xff]   ;;  %v5882_v21 = vld [vmem:[%s6368_s2 + $0x8] sm:$0xff]  }
 0x271   : > { %v1671_v17 = vrot.slane %v1667_v10, 7  ;;  %v1694_v19 = vsel %vm519_vm0, -inf, %v1689_v5  ;;  %v1668_v20 = vmax.f32 %v1656_v54, %v1660_v13  ;;  %v1690_v22 = vrot.slane %v1660_v13, 7  ;;  %v5889_v10 = vld [vmem:[%s6368_s2 + $0x10] sm:$0xff]  }
 0x272   : > { %v1695_v24 = vsel %vm5559_vm9, -inf, %v1694_v19  ;;  %v1665_v25 = vmax.f32 %v1661_v53, %v1663_v11  ;;  %v1681_v27 = vrot.slane %v1663_v11, 4  ;;  %v1658_v7 = vsel %vm1642_vm8, %v1634_v62, %v1650_v15  ;;  %4733 = vmatmul.mubr.msk.bf16.vlgmr.msra.gmra.mrb[12].mxu0 %vm405_vm1, %v5632_v18  ;;  %v5858_v62 = vld [vmem:[%s6368_s2 + $0x2c] sm:$0xff]  }
 0x273   : > { %v1676_v0 = vsel %vm519_vm0, -inf, %v1671_v17  ;;  %v1699_v28 = vrot.slane %v1695_v24, 4  ;;  %v1672_v1 = vrot.slane %v1668_v20, 7  ;;  %v1691_v31 = vsel %vm519_vm0, %v1689_v5, %v1690_v22  ;;  %4741 = vmatpush3.bf16.msra.mxu0 %v5476_v33  ;;  %4736 = vmatprep.mubr.msk.bf16.mxu0 %vm405_vm1, %v5636_v23 }
 0x274   : > { %v1677_v3 = vsel %vm5559_vm9, -inf, %v1676_v0  ;;  %v1686_v32 = vsel %vm884_vm13, -inf, %v1681_v27  ;;  %v1696_v18 = vsel %vm5564_vm11, -inf, %v1691_v31  ;;  %v1664_v37 = vmax.f32 %v1658_v7, %v1660_v13  ;;  %4742 = vmatprep.subr.bf16.mxu0 %v5484_v36 }
 0x275   : > { %v1704_v39 = vsel %vm884_vm13, -inf, %v1699_v28  ;;  %v1705_v47 = vmax.f32 %v1665_v25, %v1677_v3  ;;  %v1700_v9 = vrot.slane %v1696_v18, 4  ;;  %v1673_v50 = vsel %vm519_vm0, %v1671_v17, %v1672_v1 }
 0x276   : > { %v1707_v51 = vmax.f32 %v1686_v32, %v1704_v39  ;;  %v1666_v23 = vmax.f32 %v1662_v57, %v1664_v37  ;;  %v1678_v52 = vsel %vm5564_vm11, -inf, %v1673_v50  ;;  %v1682_v53 = vrot.slane %v1664_v37, 4 }
 0x277   : > { %4743 = vmatpush3.bf16.msra.mxu0 %v5484_v36  ;;  %v1701_v54 = vsel %vm884_vm13, %v1699_v28, %v1700_v9 }
 0x278   : > { %v1706_v56 = vmax.f32 %v1666_v23, %v1678_v52  ;;  %4744 = vmatprep.subr.bf16.mxu0 %v5492_v38  ;;  %v1683_v58 = vsel %vm884_vm13, %v1681_v27, %v1682_v53  ;;  %v1709_v59 = vmax.f32 %v1705_v47, %v1707_v51 }
 0x279   : > { %v1708_v60 = vmax.f32 %v1683_v58, %v1701_v54 }
 0x27a   : > { %4737 = vmatmul.mubr.msk.bf16.gmra.mrb[16].mxu0 %vm405_vm1, %v5646_v26  ;;  %v5832_v26 = vld [vmem:[%s6368_s2 + $0x1c] sm:$0xff]  }
 0x27b   : > { %4745 = vmatpush3.bf16.msra.mxu0 %v5492_v38  ;;  %v1710_v57 = vmax.f32 %v1706_v56, %v1708_v60  ;;  %4748 = vmatprep.mubr.msk.bf16.mxu0 %vm405_vm1, %v5812_v55 }
 0x27c   : > { %4746 = vmatprep.subr.bf16.mxu0 %v5506_v41 }
 0x27d   : > { %v5009_v14 = vpack.c.bf16 %v1710_v57, %v1709_v59 }
 0x27f   : > { %5010 = vmatpush3.bf16.msra.mxu1 %v5009_v14  ;;  %4747 = vmatpush3.bf16.msra.mxu0 %v5506_v41 }
 0x280   : > { %4763 = vmatprep.subr.bf16.mxu0 %v5832_v26  ;;  %5011 = vmatprep.subr.bf16.mxu1 %v5291_v45 }
 0x282   : > { %4706 = vmatmul.mubr.msk.f32.vlgmr.msra.gmra.mrb[2].mxu1 %vm915_vm14, %v5294_v12  ;;  %4749 = vmatmul.mubr.msk.bf16.vlgmr.msra.gmra.mrb[12].mxu0 %vm405_vm1, %v5823_v61 }
 0x283   : > { %4764 = vmatpush3.bf16.msra.mxu0 %v5832_v26  ;;  %4752 = vmatprep.mubr.msk.bf16.mxu0 %vm405_vm1, %v5827_v63 }
 0x284   : > { %4765 = vmatprep.subr.bf16.mxu0 %v5846_v2  ;;  %4760 = vmatprep.mubr.msk.f32.mxu1 %vm5292_vm2, %v5293_v46 }
 0x287   : > { %4766 = vmatpush3.bf16.msra.mxu0 %v5846_v2 }
 0x288   : > { %4767 = vmatprep.subr.bf16.mxu0 %v5858_v62 }
 0x28a   : > { %4753 = vmatmul.mubr.msk.bf16.gmra.mrb[16].mxu0 %vm405_vm1, %v5852_v4 }
 0x28b   : > { %4768 = vmatpush3.bf16.msra.mxu0 %v5858_v62  ;;  %4771 = vmatprep.mubr.msk.bf16.mxu0 %vm405_vm1, %v5812_v55 }
 0x28c   : > { %4769 = vmatprep.subr.bf16.mxu0 %v5384_v6 }
 0x28f   : > { %4770 = vmatpush3.bf16.msra.mxu0 %v5384_v6 }
 0x290   : > { %4779 = vmatprep.subr.bf16.mxu0 %v5871_v8 }
 0x292   : > { %4772 = vmatmul.mubr.msk.bf16.vlgmr.msra.gmra.mrb[20].mxu0 %vm405_vm1, %v5823_v61 }
 0x293   : > { %4780 = vmatpush3.bf16.msra.mxu0 %v5871_v8  ;;  %4775 = vmatprep.mubr.msk.bf16.mxu0 %vm405_vm1, %v5827_v63 }
 0x294   : > { %4781 = vmatprep.subr.bf16.mxu0 %v5882_v21 }
 0x297   : > { %4782 = vmatpush3.bf16.msra.mxu0 %v5882_v21 }
 0x298   : > { %4783 = vmatprep.subr.bf16.mxu0 %v5889_v10 }
 0x29a   : > { %4776 = vmatmul.mubr.msk.bf16.gmra.mrb[24].mxu0 %vm405_vm1, %v5852_v4 }
 0x29b   : > { %4784 = vmatpush3.bf16.msra.mxu0 %v5889_v10  ;;  %4787 = vmatprep.mubr.msk.bf16.mxu0 %vm405_vm1, %v5682_v40  ;;  %v5908_v40 = vld [vmem:[%s5394_s20 + $0x80] sm:$0xff]  }
 0x29c   : > { %4785 = vmatprep.subr.bf16.mxu0 %v5462_v30 }
 0x29f   : > { %4786 = vmatpush3.bf16.msra.mxu0 %v5462_v30 }
 0x2a0   : > { %4795 = vmatprep.subr.bf16.mxu0 %v5476_v33 }
 0x2a2   : > { %4788 = vmatmul.mubr.msk.bf16.vlgmr.msra.gmra.mrb[20].mxu0 %vm405_vm1, %v5692_v42  ;;  %v5922_v42 = vld [vmem:[%s5394_s20 + $0x90] sm:$0xff]  }
 0x2a3   : > { %4796 = vmatpush3.bf16.msra.mxu0 %v5476_v33  ;;  %4791 = vmatprep.mubr.msk.bf16.mxu0 %vm405_vm1, %v5696_v43  ;;  %v5918_v33 = vld [vmem:[%s5394_s20 + $0x88] sm:$0xff]  }
 0x2a4   : > { %4797 = vmatprep.subr.bf16.mxu0 %v5484_v36 }
 0x2a7   : > { %4798 = vmatpush3.bf16.msra.mxu0 %v5484_v36  ;;  %v5930_v36 = vld [vmem:[%s5394_s20 + $0x98] sm:$0xff]  }
 0x2a8   : > { %4799 = vmatprep.subr.bf16.mxu0 %v5492_v38 }
 0x2aa   : > { %4792 = vmatmul.mubr.msk.bf16.gmra.mrb[24].mxu0 %vm405_vm1, %v5704_v44 }
 0x2ab   : > { %4800 = vmatpush3.bf16.msra.mxu0 %v5492_v38  ;;  %4803 = vmatprep.mubr.msk.bf16.mxu0 %vm405_vm1, %v5908_v40 }
 0x2ac   : > { %4801 = vmatprep.subr.bf16.mxu0 %v5506_v41 }
 0x2af   : > { %4802 = vmatpush3.bf16.msra.mxu0 %v5506_v41 }
 0x2b0   : > { %5017 = vmatprep.subr.bf16.mxu0 %v5291_v45 }
 0x2b2   : > { %4804 = vmatmul.mubr.msk.bf16.vlgmr.msra.gmra.mrb[20].mxu0 %vm405_vm1, %v5918_v33 }
 0x2b3   : > { %4807 = vmatprep.mubr.msk.bf16.mxu0 %vm405_vm1, %v5922_v42 }
 0x2ba   : > { %4808 = vmatmul.mubr.msk.bf16.gmra.mrb[24].mxu0 %vm405_vm1, %v5930_v36 }
 0x2bb   : > { %4870 = vmatprep.mubr.msk.f32.mxu0 %vm5292_vm2, %v5293_v46 }
 0x325   : > { %v1381_v38 = vpop.f32.mrb[8].mxu0 }
 0x326   : > { %v3762_v43 = vrot.slane %v1381_v38, 7  ;;  %v4652_v44 = vpop.f32.mrb[9].mxu0 }
 0x328   : > { %v3782_v5 = vsel %vm519_vm0, %v5710_v35, %v3762_v43 }
 0x355   : > { %v1777_v16 = vpop.f32.mrb[2].mxu1  ;;  %v4750_v11 = vpop.f32.mrb[12].mxu0 }
 0x356   : > { %v3765_v13 = vrot.slane %v1777_v16, 6  ;;  %v2027_v15 = vadd.f32 %v4750_v11, %v5538_v48  ;;  %v1986_v17 = vpop.f32.mrb[13].mxu0  ;;  %v4707_v19 = vpop.f32.mrb[3].mxu1 }
 0x357   : > { %v2025_v20 = vadd.f32 %v5538_v48, %v1986_v17  ;;  %v4751_v22 = vpop.f32.mrb[14].mxu0 }
 0x358   : > { %v5940_v24 = vsel %vm3783_vm10, %v3782_v5, %v3765_v13  ;;  %vm2035_vm12 = vcmp.ge.f32.partialorder %v2027_v15, 0.0  ;;  %v2043_v25 = vmul.f32 %v5543_v49, %v2027_v15  ;;  %v2028_v27 = vadd.f32 %v4751_v22, %v5538_v48  ;;  %v1989_v7 = vpop.f32.mrb[15].mxu0 }
 0x359   : > { %vm2033_vm15 = vcmp.ge.f32.partialorder %v2025_v20, 0.0  ;;  %v2041_v35 = vmul.f32 %v5543_v49, %v2025_v20  ;;  %v2026_v0 = vadd.f32 %v5538_v48, %v1989_v7 }
 0x35a   : > { %v2051_v28 = vsel %vm2035_vm12, %v2027_v15, %v2043_v25  ;;  %vm2036_vm3 = vcmp.ge.f32.partialorder %v2028_v27, 0.0  ;;  %v2044_v1 = vmul.f32 %v5543_v49, %v2028_v27 }
 0x35b   : > { %v2049_v31 = vsel %vm2033_vm15, %v2025_v20, %v2041_v35  ;;  %vm2034_vm4 = vcmp.ge.f32.partialorder %v2026_v0, 0.0  ;;  %v2042_v3 = vmul.f32 %v5543_v49, %v2026_v0 }
 0x35c   : > { %v2057_v32 = vmax.f32 %v2049_v31, %v2051_v28  ;;  %v2052_v18 = vsel %vm2036_vm3, %v2028_v27, %v2044_v1 }
 0x35d   : > { %v2050_v37 = vsel %vm2034_vm4, %v2026_v0, %v2042_v3  ;;  %v4754_v39 = vpop.f32.mrb[16].mxu0 }
 0x35e   : > { %v2058_v47 = vmax.f32 %v2050_v37, %v2052_v18  ;;  %v2031_v9 = vadd.f32 %v4754_v39, %v5538_v48  ;;  %v2002_v50 = vpop.f32.mrb[17].mxu0 }
 0x35f   : > { %v2029_v51 = vadd.f32 %v5538_v48, %v2002_v50  ;;  %v4755_v23 = vpop.f32.mrb[18].mxu0 }
 0x360   : > { %vm2039_vm5 = vcmp.ge.f32.partialorder %v2031_v9, 0.0  ;;  %v2047_v52 = vmul.f32 %v5543_v49, %v2031_v9  ;;  %v2032_v53 = vadd.f32 %v4755_v23, %v5538_v48  ;;  %v2005_v54 = vpop.f32.mrb[19].mxu0 }
 0x361   : > { %vm2037_vm6 = vcmp.ge.f32.partialorder %v2029_v51, 0.0  ;;  %v2045_v56 = vmul.f32 %v5543_v49, %v2029_v51  ;;  %v2030_v58 = vadd.f32 %v5538_v48, %v2005_v54 }
 0x362   : > { %v2055_v59 = vsel %vm2039_vm5, %v2031_v9, %v2047_v52  ;;  %vm2040_vm7 = vcmp.ge.f32.partialorder %v2032_v53, 0.0  ;;  %v2048_v60 = vmul.f32 %v5543_v49, %v2032_v53 }
 0x363   : > { %v2063_v57 = vmax.f32 %v2051_v28, %v2055_v59  ;;  %v2085_v14 = vrot.slane %v2055_v59, 7  ;;  %v2053_v38 = vsel %vm2037_vm6, %v2029_v51, %v2045_v56  ;;  %vm2038_vm8 = vcmp.ge.f32.partialorder %v2030_v58, 0.0 }
 0x364   : > { %v2059_v43 = vmax.f32 %v2053_v38, %v2055_v59  ;;  %v2056_v44 = vsel %vm2040_vm7, %v2032_v53, %v2048_v60  ;;  %v2046_v5 = vmul.f32 %v5543_v49, %v2030_v58 }
 0x365   : > { %v2067_v16 = vrot.slane %v2063_v57, 7  ;;  %v2090_v11 = vsel %vm519_vm0, -inf, %v2085_v14  ;;  %v2064_v13 = vmax.f32 %v2052_v18, %v2056_v44  ;;  %v2086_v15 = vrot.slane %v2056_v44, 7 }
 0x366   : > { %v2091_v17 = vsel %vm5559_vm9, -inf, %v2090_v11  ;;  %v2061_v19 = vmax.f32 %v2057_v32, %v2059_v43  ;;  %v2077_v20 = vrot.slane %v2059_v43, 4  ;;  %v2054_v22 = vsel %vm2038_vm8, %v2030_v58, %v2046_v5 }
 0x367   : > { %v2072_v25 = vsel %vm519_vm0, -inf, %v2067_v16  ;;  %v2095_v27 = vrot.slane %v2091_v17, 4  ;;  %v2068_v7 = vrot.slane %v2064_v13, 7  ;;  %v2087_v35 = vsel %vm519_vm0, %v2085_v14, %v2086_v15 }
 0x368   : > { %v2073_v0 = vsel %vm5559_vm9, -inf, %v2072_v25  ;;  %v2082_v28 = vsel %vm884_vm13, -inf, %v2077_v20  ;;  %v2092_v1 = vsel %vm5564_vm11, -inf, %v2087_v35  ;;  %v2060_v31 = vmax.f32 %v2054_v22, %v2056_v44 }
 0x369   : > { %v2100_v3 = vsel %vm884_vm13, -inf, %v2095_v27  ;;  %v2101_v32 = vmax.f32 %v2061_v19, %v2073_v0  ;;  %v2096_v18 = vrot.slane %v2092_v1, 4  ;;  %v2069_v37 = vsel %vm519_vm0, %v2067_v16, %v2068_v7  ;;  %v5987_v19 = vld [vmem:[%s6370_s4] ss:$0 sm:$0xff] }
 0x36a   : > { %v2103_v39 = vmax.f32 %v2082_v28, %v2100_v3  ;;  %v2062_v9 = vmax.f32 %v2058_v47, %v2060_v31  ;;  %v2074_v50 = vsel %vm5564_vm11, -inf, %v2069_v37  ;;  %v2078_v51 = vrot.slane %v2060_v31, 4 }
 0x36b   : > { %v2097_v23 = vsel %vm884_vm13, %v2095_v27, %v2096_v18  ;;  %vm3785_vm8 = vcmask 1042432  }
 0x36c   : > { %v2102_v52 = vmax.f32 %v2062_v9, %v2074_v50  ;;  %v2079_v53 = vsel %vm884_vm13, %v2077_v20, %v2078_v51  ;;  %v2105_v54 = vmax.f32 %v2101_v32, %v2103_v39 }
 0x36d   : > { %v2104_v56 = vmax.f32 %v2079_v53, %v2097_v23 }
 0x36f   : > { %v2106_v58 = vmax.f32 %v2102_v52, %v2104_v56 }
 0x371   : > { %v5012_v59 = vpack.c.bf16 %v2106_v58, %v2105_v54 }
 0x373   : > { %5013 = vmatpush3.bf16.msra.mxu1 %v5012_v59 }
 0x374   : > { %5014 = vmatprep.subr.bf16.mxu1 %v5291_v45 }
 0x376   : > { %4761 = vmatmul.mubr.msk.f32.vlgmr.msra.gmra.mrb[20].mxu1 %vm915_vm14, %v5294_v12 }
 0x377   : > { %4815 = vmatprep.mubr.msk.f32.mxu1 %vm5292_vm2, %v5293_v46 }
 0x385   : > { %v4805_v47 = vpop.f32.mrb[20].mxu0 }
 0x386   : > { %v2423_v60 = vadd.f32 %v4805_v47, %v5538_v48  ;;  %v2382_v57 = vpop.f32.mrb[21].mxu0 }
 0x387   : > { %v2421_v14 = vadd.f32 %v5538_v48, %v2382_v57  ;;  %v4806_v38 = vpop.f32.mrb[22].mxu0 }
 0x388   : > { %vm2431_vm10 = vcmp.ge.f32.partialorder %v2423_v60, 0.0  ;;  %v2439_v43 = vmul.f32 %v5543_v49, %v2423_v60  ;;  %v2424_v44 = vadd.f32 %v4806_v38, %v5538_v48  ;;  %v2385_v5 = vpop.f32.mrb[23].mxu0 }
 0x389   : > { %vm2429_vm12 = vcmp.ge.f32.partialorder %v2421_v14, 0.0  ;;  %v2437_v16 = vmul.f32 %v5543_v49, %v2421_v14  ;;  %v2422_v11 = vadd.f32 %v5538_v48, %v2385_v5  ;;  %v5993_v48 = vld [vmem:[%s6369_s3] ss:$0 sm:$0xff] }
 0x38a   : > { %v2447_v13 = vsel %vm2431_vm10, %v2423_v60, %v2439_v43  ;;  %vm2432_vm15 = vcmp.ge.f32.partialorder %v2424_v44, 0.0  ;;  %v2440_v15 = vmul.f32 %v5543_v49, %v2424_v44 }
 0x38b   : > { %v2445_v17 = vsel %vm2429_vm12, %v2421_v14, %v2437_v16  ;;  %vm2430_vm3 = vcmp.ge.f32.partialorder %v2422_v11, 0.0  ;;  %v2438_v20 = vmul.f32 %v5987_v19, %v2422_v11 }
 0x38c   : > { %v2453_v22 = vmax.f32 %v2445_v17, %v2447_v13  ;;  %v2448_v25 = vsel %vm2432_vm15, %v2424_v44, %v2440_v15 }
 0x38d   : > { %v2446_v27 = vsel %vm2430_vm3, %v2422_v11, %v2438_v20  ;;  %v4809_v7 = vpop.f32.mrb[24].mxu0 }
 0x38e   : > { %v2454_v35 = vmax.f32 %v2446_v27, %v2448_v25  ;;  %v2427_v49 = vadd.f32 %v5993_v48, %v4809_v7  ;;  %v2398_v0 = vpop.f32.mrb[25].mxu0 }
 0x38f   : > { %v2425_v28 = vadd.f32 %v5993_v48, %v2398_v0  ;;  %v4810_v1 = vpop.f32.mrb[26].mxu0 }
 0x390   : > { %vm2435_vm4 = vcmp.ge.f32.partialorder %v2427_v49, 0.0  ;;  %v2443_v31 = vmul.f32 %v5987_v19, %v2427_v49  ;;  %v2428_v3 = vadd.f32 %v5993_v48, %v4810_v1  ;;  %v2401_v32 = vpop.f32.mrb[27].mxu0 }
 0x391   : > { %vm2433_vm5 = vcmp.ge.f32.partialorder %v2425_v28, 0.0  ;;  %v2441_v18 = vmul.f32 %v5987_v19, %v2425_v28  ;;  %v2426_v37 = vadd.f32 %v5993_v48, %v2401_v32 }
 0x392   : > { %v2451_v39 = vsel %vm2435_vm4, %v2427_v49, %v2443_v31  ;;  %vm2436_vm6 = vcmp.ge.f32.partialorder %v2428_v3, 0.0  ;;  %v2444_v9 = vmul.f32 %v5987_v19, %v2428_v3 }
 0x393   : > { %v2459_v50 = vmax.f32 %v2447_v13, %v2451_v39  ;;  %v2481_v51 = vrot.slane %v2451_v39, 7  ;;  %v2449_v23 = vsel %vm2433_vm5, %v2425_v28, %v2441_v18  ;;  %vm2434_vm7 = vcmp.ge.f32.partialorder %v2426_v37, 0.0 }
 0x394   : > { %v2455_v52 = vmax.f32 %v2449_v23, %v2451_v39  ;;  %v2452_v53 = vsel %vm2436_vm6, %v2428_v3, %v2444_v9  ;;  %v2442_v54 = vmul.f32 %v5987_v19, %v2426_v37  ;;  %v6066_v9 = vld [vmem:[%s5394_s20 + $0xa0] sm:$0xff]  }
 0x395   : > { %v2463_v56 = vrot.slane %v2459_v50, 7  ;;  %v2486_v58 = vsel %vm519_vm0, -inf, %v2481_v51  ;;  %v2460_v59 = vmax.f32 %v2448_v25, %v2452_v53  ;;  %v2482_v47 = vrot.slane %v2452_v53, 7  ;;  %v6085_v50 = vld [vmem:[%s5394_s20 + $0xb0] sm:$0xff]  }
 0x396   : > { %v2487_v60 = vsel %vm5559_vm9, -inf, %v2486_v58  ;;  %v2457_v57 = vmax.f32 %v2453_v22, %v2455_v52  ;;  %v2473_v14 = vrot.slane %v2455_v52, 4  ;;  %v2450_v38 = vsel %vm2434_vm7, %v2426_v37, %v2442_v54 }
 0x397   : > { %v2468_v43 = vsel %vm519_vm0, -inf, %v2463_v56  ;;  %v2491_v44 = vrot.slane %v2487_v60, 4  ;;  %v2464_v5 = vrot.slane %v2460_v59, 7  ;;  %v2483_v16 = vsel %vm519_vm0, %v2481_v51, %v2482_v47 }
 0x398   : > { %v2469_v11 = vsel %vm5559_vm9, -inf, %v2468_v43  ;;  %v2478_v13 = vsel %vm884_vm13, -inf, %v2473_v14  ;;  %v2488_v15 = vsel %vm5564_vm11, -inf, %v2483_v16  ;;  %v2456_v17 = vmax.f32 %v2450_v38, %v2452_v53 }
 0x399   : > { %v2496_v20 = vsel %vm884_vm13, -inf, %v2491_v44  ;;  %v2497_v22 = vmax.f32 %v2457_v57, %v2469_v11  ;;  %v2492_v25 = vrot.slane %v2488_v15, 4  ;;  %v2465_v27 = vsel %vm519_vm0, %v2463_v56, %v2464_v5 }
 0x39a   : > { %v2499_v7 = vmax.f32 %v2478_v13, %v2496_v20  ;;  %v2458_v49 = vmax.f32 %v2454_v35, %v2456_v17  ;;  %v2470_v0 = vsel %vm5564_vm11, -inf, %v2465_v27  ;;  %v2474_v28 = vrot.slane %v2456_v17, 4  ;;  %v6050_v35 = vld [vmem:[%s6368_s2 + $0x38] sm:$0xff]  }
 0x39b   : > { %v2493_v1 = vsel %vm884_vm13, %v2491_v44, %v2492_v25 }
 0x39c   : > { %v2498_v31 = vmax.f32 %v2458_v49, %v2470_v0  ;;  %v2475_v3 = vsel %vm884_vm13, %v2473_v14, %v2474_v28  ;;  %v2501_v32 = vmax.f32 %v2497_v22, %v2499_v7 }
 0x39d   : > { %v2500_v18 = vmax.f32 %v2475_v3, %v2493_v1 }
 0x39f   : > { %v2502_v37 = vmax.f32 %v2498_v31, %v2500_v18 }
 0x3a1   : > { %v5015_v39 = vpack.c.bf16 %v2502_v37, %v2501_v32 }
 0x3a3   : > { %5016 = vmatpush3.bf16.msra.mxu1 %v5015_v39 }
 0x3a4   : > { %4818 = vmatprep.subr.bf16.mxu1 %v5832_v26 }
 0x3a6   : > { %4816 = vmatmul.mubr.msk.f32.vlgmr.msra.gmra.mrb[22].mxu1 %vm915_vm14, %v5294_v12 }
 0x3a7   : > { %4819 = vmatpush3.bf16.msra.mxu1 %v5832_v26  ;;  %4826 = vmatprep.mubr.msk.bf16.mxu1 %vm405_vm1, %v5908_v40 }
 0x3a8   : > { %4820 = vmatprep.subr.bf16.mxu1 %v5846_v2 }
 0x3ab   : > { %4821 = vmatpush3.bf16.msra.mxu1 %v5846_v2 }
 0x3ac   : > { %4822 = vmatprep.subr.bf16.mxu1 %v5858_v62 }
 0x3af   : > { %4823 = vmatpush3.bf16.msra.mxu1 %v5858_v62 }
 0x3b0   : > { %4824 = vmatprep.subr.bf16.mxu1 %v5384_v6 }
 0x3b3   : > { %4825 = vmatpush3.bf16.msra.mxu1 %v5384_v6 }
 0x3b4   : > { %4834 = vmatprep.subr.bf16.mxu1 %v5871_v8 }
 0x3b6   : > { %4827 = vmatmul.mubr.msk.bf16.vlgmr.msra.gmra.mrb[24].mxu1 %vm405_vm1, %v5918_v33 }
 0x3b7   : > { %4835 = vmatpush3.bf16.msra.mxu1 %v5871_v8  ;;  %4830 = vmatprep.mubr.msk.bf16.mxu1 %vm405_vm1, %v5922_v42 }
 0x3b8   : > { %4836 = vmatprep.subr.bf16.mxu1 %v5882_v21 }
 0x3bb   : > { %4837 = vmatpush3.bf16.msra.mxu1 %v5882_v21 }
 0x3bc   : > { %4838 = vmatprep.subr.bf16.mxu1 %v5889_v10 }
 0x3be   : > { %4831 = vmatmul.mubr.msk.bf16.gmra.mrb[28].mxu1 %vm405_vm1, %v5930_v36 }
 0x3bf   : > { %4839 = vmatpush3.bf16.msra.mxu1 %v5889_v10  ;;  %4842 = vmatprep.mubr.msk.bf16.mxu1 %vm405_vm1, %v5812_v55  ;;  %v6061_v55 = vld [vmem:[%s6368_s2 + $0x40] sm:$0xff]  }
 0x3c0   : > { %4840 = vmatprep.subr.bf16.mxu1 %v5462_v30 }
 0x3c3   : > { %4841 = vmatpush3.bf16.msra.mxu1 %v5462_v30 }
 0x3c4   : > { %4850 = vmatprep.subr.bf16.mxu1 %v6050_v35 }
 0x3c6   : > { %4843 = vmatmul.mubr.msk.bf16.vlgmr.msra.gmra.mrb[24].mxu1 %vm405_vm1, %v5823_v61  ;;  %v6071_v61 = vld [vmem:[%s6368_s2 + $0x48] sm:$0xff]  }
 0x3c7   : > { %4851 = vmatpush3.bf16.msra.mxu1 %v6050_v35  ;;  %4846 = vmatprep.mubr.msk.bf16.mxu1 %vm405_vm1, %v5827_v63  ;;  %v6081_v63 = vld [vmem:[%s5394_s20 + $0xa8] sm:$0xff]  }
 0x3c8   : > { %4852 = vmatprep.subr.bf16.mxu1 %v6061_v55 }
 0x3cb   : > { %4853 = vmatpush3.bf16.msra.mxu1 %v6061_v55 }
 0x3cc   : > { %4854 = vmatprep.subr.bf16.mxu1 %v6071_v61 }
 0x3ce   : > { %4847 = vmatmul.mubr.msk.bf16.gmra.mrb[28].mxu1 %vm405_vm1, %v5852_v4  ;;  %v6095_v4 = vld [vmem:[%s5394_s20 + $0xb8] sm:$0xff]  }
 0x3cf   : > { %4855 = vmatpush3.bf16.msra.mxu1 %v6071_v61  ;;  %4858 = vmatprep.mubr.msk.bf16.mxu1 %vm405_vm1, %v6066_v9 }
 0x3d0   : > { %4856 = vmatprep.subr.bf16.mxu1 %v5506_v41 }
 0x3d3   : > { %4857 = vmatpush3.bf16.msra.mxu1 %v5506_v41 }
 0x3d4   : > { %4873 = vmatprep.subr.bf16.mxu1 %v5832_v26 }
 0x3d6   : > { %4859 = vmatmul.mubr.msk.bf16.vlgmr.msra.gmra.mrb[24].mxu1 %vm405_vm1, %v6081_v63 }
 0x3d7   : > { %4874 = vmatpush3.bf16.msra.mxu1 %v5832_v26  ;;  %4862 = vmatprep.mubr.msk.bf16.mxu1 %vm405_vm1, %v6085_v50 }
 0x3d8   : > { %4875 = vmatprep.subr.bf16.mxu1 %v5846_v2 }
 0x3db   : > { %4876 = vmatpush3.bf16.msra.mxu1 %v5846_v2 }
 0x3dc   : > { %4877 = vmatprep.subr.bf16.mxu1 %v5858_v62 }
 0x3de   : > { %4863 = vmatmul.mubr.msk.bf16.gmra.mrb[28].mxu1 %vm405_vm1, %v6095_v4 }
 0x3df   : > { %4878 = vmatpush3.bf16.msra.mxu1 %v5858_v62  ;;  %4881 = vmatprep.mubr.msk.bf16.mxu1 %vm405_vm1, %v6066_v9 }
 0x3e0   : > { %4879 = vmatprep.subr.bf16.mxu1 %v5384_v6 }
 0x3e3   : > { %4880 = vmatpush3.bf16.msra.mxu1 %v5384_v6 }
 0x3e4   : > { %4889 = vmatprep.subr.bf16.mxu1 %v5871_v8 }
 0x3e6   : > { %4882 = vmatmul.mubr.msk.bf16.vlgmr.msra.gmra.mrb[32].mxu1 %vm405_vm1, %v6081_v63 }
 0x3e7   : > { %4890 = vmatpush3.bf16.msra.mxu1 %v5871_v8  ;;  %4885 = vmatprep.mubr.msk.bf16.mxu1 %vm405_vm1, %v6085_v50 }
 0x3e8   : > { %4891 = vmatprep.subr.bf16.mxu1 %v5882_v21 }
 0x3eb   : > { %4892 = vmatpush3.bf16.msra.mxu1 %v5882_v21 }
 0x3ec   : > { %4893 = vmatprep.subr.bf16.mxu1 %v5889_v10 }
 0x3ee   : > { %4886 = vmatmul.mubr.msk.bf16.gmra.mrb[36].mxu1 %vm405_vm1, %v6095_v4 }
 0x3ef   : > { %4894 = vmatpush3.bf16.msra.mxu1 %v5889_v10  ;;  %4897 = vmatprep.mubr.msk.bf16.mxu1 %vm405_vm1, %v5908_v40  ;;  %v6131_v40 = vld [vmem:[%s5394_s20 + $0xc0] sm:$0xff]  }
 0x3f0   : > { %4895 = vmatprep.subr.bf16.mxu1 %v5462_v30 }
 0x3f3   : > { %4896 = vmatpush3.bf16.msra.mxu1 %v5462_v30 }
 0x3f4   : > { %4905 = vmatprep.subr.bf16.mxu1 %v6050_v35 }
 0x3f6   : > { %4898 = vmatmul.mubr.msk.bf16.vlgmr.msra.gmra.mrb[32].mxu1 %vm405_vm1, %v5918_v33  ;;  %v6141_v33 = vld [vmem:[%s5394_s20 + $0xc8] sm:$0xff]  }
 0x3f7   : > { %4906 = vmatpush3.bf16.msra.mxu1 %v6050_v35  ;;  %4901 = vmatprep.mubr.msk.bf16.mxu1 %vm405_vm1, %v5922_v42  ;;  %v6145_v42 = vld [vmem:[%s5394_s20 + $0xd0] sm:$0xff]  }
 0x3f8   : > { %4907 = vmatprep.subr.bf16.mxu1 %v6061_v55 }
 0x3fb   : > { %4908 = vmatpush3.bf16.msra.mxu1 %v6061_v55 }
 0x3fc   : > { %4909 = vmatprep.subr.bf16.mxu1 %v6071_v61 }
 0x3fe   : > { %4902 = vmatmul.mubr.msk.bf16.gmra.mrb[36].mxu1 %vm405_vm1, %v5930_v36  ;;  %v6153_v36 = vld [vmem:[%s5394_s20 + $0xd8] sm:$0xff]  }
 0x3ff   : > { %4910 = vmatpush3.bf16.msra.mxu1 %v6071_v61  ;;  %4913 = vmatprep.mubr.msk.bf16.mxu1 %vm405_vm1, %v6131_v40 }
 0x400   : > { %4911 = vmatprep.subr.bf16.mxu1 %v5506_v41 }
 0x403   : > { %4912 = vmatpush3.bf16.msra.mxu1 %v5506_v41 }
 0x404   : > { %5020 = vmatprep.subr.bf16.mxu1 %v5291_v45 }
 0x406   : > { %4914 = vmatmul.mubr.msk.bf16.vlgmr.msra.gmra.mrb[32].mxu1 %vm405_vm1, %v6141_v33 }
 0x407   : > { %4917 = vmatprep.mubr.msk.bf16.mxu1 %vm405_vm1, %v6145_v42 }
 0x40e   : > { %4918 = vmatmul.mubr.msk.bf16.gmra.mrb[36].mxu1 %vm405_vm1, %v6153_v36 }
 0x40f   : > { %4925 = vmatprep.mubr.msk.f32.mxu1 %vm5292_vm2, %v5293_v46 }
 0x449   : > { %v2173_v51 = vpop.f32.mrb[20].mxu1 }
 0x44a   : > { %v3768_v23 = vrot.slane %v2173_v51, 5  ;;  %v4762_v52 = vpop.f32.mrb[21].mxu1 }
 0x44c   : > { %v3786_v53 = vsel %vm3785_vm8, %v5940_v24, %v3768_v23 }
 0x479   : > { %v2569_v54 = vpop.f32.mrb[22].mxu1 }
 0x47a   : > { %v3771_v56 = vrot.slane %v2569_v54, 4  ;;  %v4817_v58 = vpop.f32.mrb[23].mxu1 }
 0x47c   : > { %v6161_v59 = vsel %vm884_vm13, %v3786_v53, %v3771_v56 }
 0x4a9   : > { %v4860_v47 = vpop.f32.mrb[24].mxu1 }
 0x4aa   : > { %v2819_v60 = vadd.f32 %v5993_v48, %v4860_v47  ;;  %v2778_v57 = vpop.f32.mrb[25].mxu1 }
 0x4ab   : > { %v2817_v14 = vadd.f32 %v5993_v48, %v2778_v57  ;;  %v4861_v38 = vpop.f32.mrb[26].mxu1 }
 0x4ac   : > { %vm2827_vm10 = vcmp.ge.f32.partialorder %v2819_v60, 0.0  ;;  %v2835_v43 = vmul.f32 %v5987_v19, %v2819_v60  ;;  %v2820_v44 = vadd.f32 %v5993_v48, %v4861_v38  ;;  %v2781_v5 = vpop.f32.mrb[27].mxu1 }
 0x4ad   : > { %vm2825_vm12 = vcmp.ge.f32.partialorder %v2817_v14, 0.0  ;;  %v2833_v24 = vmul.f32 %v5987_v19, %v2817_v14  ;;  %v2818_v16 = vadd.f32 %v5993_v48, %v2781_v5 }
 0x4ae   : > { %v2843_v11 = vsel %vm2827_vm10, %v2819_v60, %v2835_v43  ;;  %vm2828_vm15 = vcmp.ge.f32.partialorder %v2820_v44, 0.0  ;;  %v2836_v13 = vmul.f32 %v5987_v19, %v2820_v44 }
 0x4af   : > { %v2841_v15 = vsel %vm2825_vm12, %v2817_v14, %v2833_v24  ;;  %vm2826_vm3 = vcmp.ge.f32.partialorder %v2818_v16, 0.0  ;;  %v2834_v17 = vmul.f32 %v5987_v19, %v2818_v16 }
 0x4b0   : > { %v2849_v20 = vmax.f32 %v2841_v15, %v2843_v11  ;;  %v2844_v22 = vsel %vm2828_vm15, %v2820_v44, %v2836_v13 }
 0x4b1   : > { %v2842_v25 = vsel %vm2826_vm3, %v2818_v16, %v2834_v17  ;;  %v4864_v27 = vpop.f32.mrb[28].mxu1 }
 0x4b2   : > { %v2850_v7 = vmax.f32 %v2842_v25, %v2844_v22  ;;  %v2823_v49 = vadd.f32 %v5993_v48, %v4864_v27  ;;  %v2794_v0 = vpop.f32.mrb[29].mxu1 }
 0x4b3   : > { %v2821_v28 = vadd.f32 %v5993_v48, %v2794_v0  ;;  %v4865_v1 = vpop.f32.mrb[30].mxu1 }
 0x4b4   : > { %vm2831_vm4 = vcmp.ge.f32.partialorder %v2823_v49, 0.0  ;;  %v2839_v31 = vmul.f32 %v5987_v19, %v2823_v49  ;;  %v2824_v3 = vadd.f32 %v5993_v48, %v4865_v1  ;;  %v2797_v32 = vpop.f32.mrb[31].mxu1 }
 0x4b5   : > { %vm2829_vm5 = vcmp.ge.f32.partialorder %v2821_v28, 0.0  ;;  %v2837_v18 = vmul.f32 %v5987_v19, %v2821_v28  ;;  %v2822_v37 = vadd.f32 %v5993_v48, %v2797_v32 }
 0x4b6   : > { %v2847_v39 = vsel %vm2831_vm4, %v2823_v49, %v2839_v31  ;;  %vm2832_vm6 = vcmp.ge.f32.partialorder %v2824_v3, 0.0  ;;  %v2840_v51 = vmul.f32 %v5987_v19, %v2824_v3 }
 0x4b7   : > { %v2855_v23 = vmax.f32 %v2843_v11, %v2847_v39  ;;  %v2877_v52 = vrot.slane %v2847_v39, 7  ;;  %v2845_v53 = vsel %vm2829_vm5, %v2821_v28, %v2837_v18  ;;  %vm2830_vm7 = vcmp.ge.f32.partialorder %v2822_v37, 0.0 }
 0x4b8   : > { %v2851_v54 = vmax.f32 %v2845_v53, %v2847_v39  ;;  %v2848_v56 = vsel %vm2832_vm6, %v2824_v3, %v2840_v51  ;;  %v2838_v58 = vmul.f32 %v5987_v19, %v2822_v37 }
 0x4b9   : > { %v2859_v47 = vrot.slane %v2855_v23, 7  ;;  %v2882_v60 = vsel %vm519_vm0, -inf, %v2877_v52  ;;  %v2856_v57 = vmax.f32 %v2844_v22, %v2848_v56  ;;  %v2878_v14 = vrot.slane %v2848_v56, 7 }
 0x4ba   : > { %v2883_v38 = vsel %vm5559_vm9, -inf, %v2882_v60  ;;  %v2853_v43 = vmax.f32 %v2849_v20, %v2851_v54  ;;  %v2869_v44 = vrot.slane %v2851_v54, 4  ;;  %v2846_v5 = vsel %vm2830_vm7, %v2822_v37, %v2838_v58 }
 0x4bb   : > { %v2864_v24 = vsel %vm519_vm0, -inf, %v2859_v47  ;;  %v2887_v16 = vrot.slane %v2883_v38, 4  ;;  %v2860_v11 = vrot.slane %v2856_v57, 7  ;;  %v2879_v13 = vsel %vm519_vm0, %v2877_v52, %v2878_v14 }
 0x4bc   : > { %v2865_v15 = vsel %vm5559_vm9, -inf, %v2864_v24  ;;  %v2874_v17 = vsel %vm884_vm13, -inf, %v2869_v44  ;;  %v2884_v22 = vsel %vm5564_vm11, -inf, %v2879_v13  ;;  %v2852_v25 = vmax.f32 %v2846_v5, %v2848_v56 }
 0x4bd   : > { %v2892_v27 = vsel %vm884_vm13, -inf, %v2887_v16  ;;  %v2893_v20 = vmax.f32 %v2853_v43, %v2865_v15  ;;  %v2888_v49 = vrot.slane %v2884_v22, 4  ;;  %v2861_v0 = vsel %vm519_vm0, %v2859_v47, %v2860_v11 }
 0x4be   : > { %v2895_v28 = vmax.f32 %v2874_v17, %v2892_v27  ;;  %v2854_v1 = vmax.f32 %v2850_v7, %v2852_v25  ;;  %v2866_v31 = vsel %vm5564_vm11, -inf, %v2861_v0  ;;  %v2870_v3 = vrot.slane %v2852_v25, 4 }
 0x4bf   : > { %v2889_v32 = vsel %vm884_vm13, %v2887_v16, %v2888_v49 }
 0x4c0   : > { %v2894_v18 = vmax.f32 %v2854_v1, %v2866_v31  ;;  %v2871_v37 = vsel %vm884_vm13, %v2869_v44, %v2870_v3  ;;  %v2897_v39 = vmax.f32 %v2893_v20, %v2895_v28 }
 0x4c1   : > { %v2896_v51 = vmax.f32 %v2871_v37, %v2889_v32 }
 0x4c3   : > { %v2898_v23 = vmax.f32 %v2894_v18, %v2896_v51 }
 0x4c5   : > { %v5018_v52 = vpack.c.bf16 %v2898_v23, %v2897_v39 }
 0x4c7   : > { %5019 = vmatpush3.bf16.msra.mxu0 %v5018_v52 }
 0x4c8   : > { %4928 = vmatprep.subr.bf16.mxu0 %v5832_v26 }
 0x4ca   : > { %4871 = vmatmul.mubr.msk.f32.vlgmr.msra.gmra.mrb[10].mxu0 %vm915_vm14, %v5294_v12 }
 0x4cb   : > { %4929 = vmatpush3.bf16.msra.mxu0 %v5832_v26  ;;  %4936 = vmatprep.mubr.msk.bf16.mxu0 %vm405_vm1, %v6131_v40 }
 0x4cc   : > { %4930 = vmatprep.subr.bf16.mxu0 %v5846_v2 }
 0x4cf   : > { %4931 = vmatpush3.bf16.msra.mxu0 %v5846_v2 }
 0x4d0   : > { %4932 = vmatprep.subr.bf16.mxu0 %v5858_v62 }
 0x4d3   : > { %4933 = vmatpush3.bf16.msra.mxu0 %v5858_v62 }
 0x4d4   : > { %4934 = vmatprep.subr.bf16.mxu0 %v5384_v6 }
 0x4d7   : > { %4935 = vmatpush3.bf16.msra.mxu0 %v5384_v6 }
 0x4d8   : > { %4944 = vmatprep.subr.bf16.mxu0 %v5871_v8 }
 0x4d9   : > { %v4915_v7 = vpop.f32.mrb[32].mxu1 }
 0x4da   : > { %4937 = vmatmul.mubr.msk.bf16.vlgmr.msra.gmra.mrb[28].mxu0 %vm405_vm1, %v6141_v33  ;;  %v3215_v26 = vadd.f32 %v5993_v48, %v4915_v7  ;;  %v3174_v40 = vpop.f32.mrb[33].mxu1 }
 0x4db   : > { %4945 = vmatpush3.bf16.msra.mxu0 %v5871_v8  ;;  %v3213_v2 = vadd.f32 %v5993_v48, %v3174_v40  ;;  %v4916_v53 = vpop.f32.mrb[34].mxu1  ;;  %4940 = vmatprep.mubr.msk.bf16.mxu0 %vm405_vm1, %v6145_v42 }
 0x4dc   : > { %vm3223_vm8 = vcmp.ge.f32.partialorder %v3215_v26, 0.0  ;;  %v3231_v6 = vmul.f32 %v5987_v19, %v3215_v26  ;;  %4946 = vmatprep.subr.bf16.mxu0 %v5882_v21  ;;  %v3216_v62 = vadd.f32 %v5993_v48, %v4916_v53  ;;  %v3177_v54 = vpop.f32.mrb[35].mxu1 }
 0x4dd   : > { %vm3221_vm10 = vcmp.ge.f32.partialorder %v3213_v2, 0.0  ;;  %v3229_v33 = vmul.f32 %v5987_v19, %v3213_v2  ;;  %v3214_v56 = vadd.f32 %v5993_v48, %v3177_v54 }
 0x4de   : > { %vm3224_vm12 = vcmp.ge.f32.partialorder %v3216_v62, 0.0  ;;  %v3232_v8 = vmul.f32 %v5987_v19, %v3216_v62  ;;  %v3239_v58 = vsel %vm3223_vm8, %v3215_v26, %v3231_v6 }
 0x4df   : > { %v3237_v47 = vsel %vm3221_vm10, %v3213_v2, %v3229_v33  ;;  %4947 = vmatpush3.bf16.msra.mxu0 %v5882_v21  ;;  %vm3222_vm15 = vcmp.ge.f32.partialorder %v3214_v56, 0.0  ;;  %v3230_v42 = vmul.f32 %v5987_v19, %v3214_v56 }
 0x4e0   : > { %v3245_v60 = vmax.f32 %v3237_v47, %v3239_v58  ;;  %4948 = vmatprep.subr.bf16.mxu0 %v5889_v10  ;;  %v3240_v57 = vsel %vm3224_vm12, %v3216_v62, %v3232_v8 }
 0x4e1   : > { %v3238_v14 = vsel %vm3222_vm15, %v3214_v56, %v3230_v42  ;;  %v4919_v38 = vpop.f32.mrb[36].mxu1  ;;  %v5251_v56 = vld [vmem:[%s5394_s20 + $0xe0] sm:$0xff]  }
 0x4e2   : > { %v3246_v43 = vmax.f32 %v3238_v14, %v3240_v57  ;;  %v3219_v44 = vadd.f32 %v5993_v48, %v4919_v38  ;;  %4941 = vmatmul.mubr.msk.bf16.gmra.mrb[32].mxu0 %vm405_vm1, %v6153_v36  ;;  %v3190_v5 = vpop.f32.mrb[37].mxu1  ;;  %v5253_v14 = vld [vmem:[%s5394_s20 + $0xf0] sm:$0xff]  }
 0x4e3   : > { %v3217_v24 = vadd.f32 %v5993_v48, %v3190_v5  ;;  %4949 = vmatpush3.bf16.msra.mxu0 %v5889_v10  ;;  %v4920_v21 = vpop.f32.mrb[38].mxu1  ;;  %4952 = vmatprep.mubr.msk.bf16.mxu0 %vm405_vm1, %v6066_v9  ;;  %v3796_v38 = vld [vmem:[%s6371_s5 + $0x10] sm:$0xff] }
 0x4e4   : > { %vm3227_vm3 = vcmp.ge.f32.partialorder %v3219_v44, 0.0  ;;  %v3235_v16 = vmul.f32 %v5987_v19, %v3219_v44  ;;  %v3220_v11 = vadd.f32 %v5993_v48, %v4920_v21  ;;  %v3193_v13 = vpop.f32.mrb[39].mxu1  ;;  %4950 = vmatprep.subr.bf16.mxu0 %v5462_v30 }
 0x4e5   : > { %vm3225_vm4 = vcmp.ge.f32.partialorder %v3217_v24, 0.0  ;;  %v3233_v36 = vmul.f32 %v5987_v19, %v3217_v24  ;;  %v3218_v15 = vadd.f32 %v5993_v48, %v3193_v13 }
 0x4e6   : > { %v3243_v17 = vsel %vm3227_vm3, %v3219_v44, %v3235_v16  ;;  %vm3228_vm5 = vcmp.ge.f32.partialorder %v3220_v11, 0.0  ;;  %v3236_v10 = vmul.f32 %v5987_v19, %v3220_v11  ;;  %v3797_v44 = vld [vmem:[%s6371_s5 + $0x18] sm:$0xff] }
 0x4e7   : > { %v3251_v22 = vmax.f32 %v3239_v58, %v3243_v17  ;;  %v3273_v25 = vrot.slane %v3243_v17, 7  ;;  %v3241_v9 = vsel %vm3225_vm4, %v3217_v24, %v3233_v36  ;;  %vm3226_vm6 = vcmp.ge.f32.partialorder %v3218_v15, 0.0  ;;  %4951 = vmatpush3.bf16.msra.mxu0 %v5462_v30  ;;  %v3799_v24 = vld [vmem:[%s6371_s5 + $0x28] sm:$0xff] }
 0x4e8   : > { %v3247_v27 = vmax.f32 %v3241_v9, %v3243_v17  ;;  %v3244_v20 = vsel %vm3228_vm5, %v3220_v11, %v3236_v10  ;;  %v3234_v49 = vmul.f32 %v5987_v19, %v3218_v15  ;;  %4960 = vmatprep.subr.bf16.mxu0 %v6050_v35  ;;  %v5030_v5 = vpack.c.bf16 %v3797_v44, %v3796_v38 }
 0x4e9   : > { %v3255_v0 = vrot.slane %v3251_v22, 7  ;;  %v3278_v28 = vsel %vm519_vm0, -inf, %v3273_v25  ;;  %v3252_v1 = vmax.f32 %v3240_v57, %v3244_v20  ;;  %v3274_v31 = vrot.slane %v3244_v20, 7  ;;  %v5252_v57 = vld [vmem:[%s5394_s20 + $0xe8] sm:$0xff]  }
 0x4ea   : > { %v3279_v3 = vsel %vm5559_vm9, -inf, %v3278_v28  ;;  %v3249_v32 = vmax.f32 %v3245_v60, %v3247_v27  ;;  %v3265_v18 = vrot.slane %v3247_v27, 4  ;;  %v3242_v37 = vsel %vm3226_vm6, %v3218_v15, %v3234_v49  ;;  %4953 = vmatmul.mubr.msk.bf16.vlgmr.msra.gmra.mrb[28].mxu0 %vm405_vm1, %v6081_v63 }
 0x4eb   : > { %v3260_v30 = vsel %vm519_vm0, -inf, %v3255_v0  ;;  %v3283_v39 = vrot.slane %v3279_v3, 4  ;;  %v3256_v51 = vrot.slane %v3252_v1, 7  ;;  %v3275_v23 = vsel %vm519_vm0, %v3273_v25, %v3274_v31  ;;  %4961 = vmatpush3.bf16.msra.mxu0 %v6050_v35  ;;  %4956 = vmatprep.mubr.msk.bf16.mxu0 %vm405_vm1, %v6085_v50 }
 0x4ec   : > { %v3261_v52 = vsel %vm5559_vm9, -inf, %v3260_v30  ;;  %v3270_v7 = vsel %vm884_vm13, -inf, %v3265_v18  ;;  %v3280_v63 = vsel %vm5564_vm11, -inf, %v3275_v23  ;;  %v3248_v26 = vmax.f32 %v3242_v37, %v3244_v20  ;;  %4962 = vmatprep.subr.bf16.mxu0 %v6061_v55 }
 0x4ed   : > { %v3288_v40 = vsel %vm884_vm13, -inf, %v3283_v39  ;;  %v3289_v2 = vmax.f32 %v3249_v32, %v3261_v52  ;;  %v3284_v53 = vrot.slane %v3280_v63, 4  ;;  %v3257_v35 = vsel %vm519_vm0, %v3255_v0, %v3256_v51 }
 0x4ee   : > { %v3291_v6 = vmax.f32 %v3270_v7, %v3288_v40  ;;  %v3250_v50 = vmax.f32 %v3246_v43, %v3248_v26  ;;  %v3262_v62 = vsel %vm5564_vm11, -inf, %v3257_v35  ;;  %v3266_v54 = vrot.slane %v3248_v26, 4 }
 0x4ef   : > { %4963 = vmatpush3.bf16.msra.mxu0 %v6061_v55  ;;  %v3285_v33 = vsel %vm884_vm13, %v3283_v39, %v3284_v53 }
 0x4f0   : > { %v3290_v8 = vmax.f32 %v3250_v50, %v3262_v62  ;;  %4964 = vmatprep.subr.bf16.mxu0 %v6071_v61  ;;  %v3267_v58 = vsel %vm884_vm13, %v3265_v18, %v3266_v54  ;;  %v3293_v47 = vmax.f32 %v3289_v2, %v3291_v6 }
 0x4f1   : > { %v3292_v42 = vmax.f32 %v3267_v58, %v3285_v33 }
 0x4f2   : > { %4957 = vmatmul.mubr.msk.bf16.gmra.mrb[32].mxu0 %vm405_vm1, %v6095_v4  ;;  %v3795_v4 = vld [vmem:[%s6371_s5 + $0x8] sm:$0xff] }
 0x4f3   : > { %4965 = vmatpush3.bf16.msra.mxu0 %v6071_v61  ;;  %v3294_v60 = vmax.f32 %v3290_v8, %v3292_v42  ;;  %4968 = vmatprep.mubr.msk.bf16.mxu0 %vm405_vm1, %v5251_v56  ;;  %v5254_v61 = vld [vmem:[%s5394_s20 + $0xf8] sm:$0xff]  }
 0x4f4   : > { %4966 = vmatprep.subr.bf16.mxu0 %v5506_v41 }
 0x4f5   : > { %v5021_v55 = vpack.c.bf16 %v3294_v60, %v3293_v47 }
 0x4f7   : > { %5022 = vmatpush3.bf16.msra.mxu1 %v5021_v55  ;;  %4967 = vmatpush3.bf16.msra.mxu0 %v5506_v41  ;;  %v3794_v41 = vld [vmem:[%s6371_s5] sm:$0xff] }
 0x4f8   : > { %5023 = vmatprep.subr.bf16.mxu1 %v5291_v45  ;;  %5026 = vmatprep.subr.bf16.mxu0 %v5291_v45  ;;  %v5027_v43 = vpack.c.bf16 %v3795_v4, %v3794_v41 }
 0x4fa   : > { %4926 = vmatmul.mubr.msk.f32.vlgmr.msra.gmra.mrb[40].mxu1 %vm915_vm14, %v5294_v12  ;;  %4969 = vmatmul.mubr.msk.bf16.vlgmr.msra.gmra.mrb[28].mxu0 %vm405_vm1, %v5252_v57 }
 0x4fb   : > { %4972 = vmatprep.mubr.msk.bf16.mxu0 %vm405_vm1, %v5253_v14  ;;  %4980 = vmatprep.mubr.msk.f32.mxu1 %vm5292_vm2, %v5293_v46 }
 0x4fc   : > { %5028 = vmatpush3.bf16.msra.mxu0 %v5027_v43 }
 0x4fd   : > { %5029 = vmatprep.subr.bf16.mxu0 %v5291_v45 }
 0x500   : > { %5031 = vmatpush3.bf16.msra.mxu0 %v5030_v5 }
 0x501   : > { %5032 = vmatprep.subr.bf16.mxu0 %v5291_v45 }
 0x502   : > { %4973 = vmatmul.mubr.msk.bf16.gmra.mrb[32].mxu0 %vm405_vm1, %v5254_v61  ;;  %vm3788_vm1 = vcmask 1044480  }
 0x503   : > { %4999 = vmatprep.mubr.msk.f32.mxu0 %vm5292_vm2, %v5293_v46  ;;  %v3798_v46 = vld [vmem:[%s6371_s5 + $0x20] sm:$0xff]  ;;  %vm3790_vm2 = vcmask 1045504  }
 0x504   : > { %v5033_v21 = vpack.c.bf16 %v3799_v24, %v3798_v46 }
 0x506   : > { %5034 = vmatpush3.bf16.msra.mxu0 %v5033_v21 }
 0x507   : > { %5035 = vmatprep.subr.bf16.mxu0 %v5291_v45 }
 0x59d   : > { %v2965_v16 = vpop.f32.mrb[10].mxu0 }
 0x59e   : > { %v3774_v11 = vrot.slane %v2965_v16, 3  ;;  %v4872_v13 = vpop.f32.mrb[11].mxu0 }
 0x5a0   : > { %v3789_v36 = vsel %vm3788_vm1, %v6161_v59, %v3774_v11 }
 0x5cd   : > { %v3361_v15 = vpop.f32.mrb[40].mxu1  ;;  %v4970_v17 = vpop.f32.mrb[28].mxu0 }
 0x5ce   : > { %v3777_v10 = vrot.slane %v3361_v15, 2  ;;  %v3611_v22 = vadd.f32 %v5993_v48, %v4970_v17  ;;  %v3570_v25 = vpop.f32.mrb[29].mxu0  ;;  %v4927_v9 = vpop.f32.mrb[41].mxu1 }
 0x5cf   : > { %v3609_v27 = vadd.f32 %v5993_v48, %v3570_v25  ;;  %v4971_v20 = vpop.f32.mrb[30].mxu0 }
 0x5d0   : > { %v6309_v49 = vsel %vm3790_vm2, %v3789_v36, %v3777_v10  ;;  %vm3619_vm7 = vcmp.ge.f32.partialorder %v3611_v22, 0.0  ;;  %v3627_v45 = vmul.f32 %v5987_v19, %v3611_v22  ;;  %v3612_v0 = vadd.f32 %v5993_v48, %v4971_v20  ;;  %v3573_v28 = vpop.f32.mrb[31].mxu0 }
 0x5d1   : > { %vm3617_vm8 = vcmp.ge.f32.partialorder %v3609_v27, 0.0  ;;  %v3625_v59 = vmul.f32 %v5987_v19, %v3609_v27  ;;  %v3610_v1 = vadd.f32 %v5993_v48, %v3573_v28 }
 0x5d2   : > { %v3635_v31 = vsel %vm3619_vm7, %v3611_v22, %v3627_v45  ;;  %vm3620_vm10 = vcmp.ge.f32.partialorder %v3612_v0, 0.0  ;;  %v3628_v3 = vmul.f32 %v5987_v19, %v3612_v0 }
 0x5d3   : > { %v3633_v32 = vsel %vm3617_vm8, %v3609_v27, %v3625_v59  ;;  %vm3618_vm12 = vcmp.ge.f32.partialorder %v3610_v1, 0.0  ;;  %v3626_v18 = vmul.f32 %v5987_v19, %v3610_v1 }
 0x5d4   : > { %v3641_v37 = vmax.f32 %v3633_v32, %v3635_v31  ;;  %v3636_v30 = vsel %vm3620_vm10, %v3612_v0, %v3628_v3  ;;  %v3801_v0 = vld [vmem:[%s6371_s5 + $0x38] sm:$0xff] }
 0x5d5   : > { %v3634_v39 = vsel %vm3618_vm12, %v3610_v1, %v3626_v18  ;;  %v4974_v51 = vpop.f32.mrb[32].mxu0  ;;  %v5036_v28 = vpack.c.bf16 %v3801_v0, %v3800_v34 }
 0x5d6   : > { %v3642_v23 = vmax.f32 %v3634_v39, %v3636_v30  ;;  %v3615_v52 = vadd.f32 %v5993_v48, %v4974_v51  ;;  %v3586_v7 = vpop.f32.mrb[33].mxu0 }
 0x5d7   : > { %v3613_v63 = vadd.f32 %v5993_v48, %v3586_v7  ;;  %v4975_v26 = vpop.f32.mrb[34].mxu0  ;;  %5037 = vmatpush3.bf16.msra.mxu0 %v5036_v28 }
 0x5d8   : > { %vm3623_vm15 = vcmp.ge.f32.partialorder %v3615_v52, 0.0  ;;  %v3631_v40 = vmul.f32 %v5987_v19, %v3615_v52  ;;  %v3616_v2 = vadd.f32 %v5993_v48, %v4975_v26  ;;  %v3589_v53 = vpop.f32.mrb[35].mxu0 }
 0x5d9   : > { %vm3621_vm3 = vcmp.ge.f32.partialorder %v3613_v63, 0.0  ;;  %v3629_v35 = vmul.f32 %v5987_v19, %v3613_v63  ;;  %v3614_v6 = vadd.f32 %v5993_v48, %v3589_v53 }
 0x5da   : > { %v3639_v50 = vsel %vm3623_vm15, %v3615_v52, %v3631_v40  ;;  %vm3624_vm4 = vcmp.ge.f32.partialorder %v3616_v2, 0.0  ;;  %v3632_v62 = vmul.f32 %v5987_v19, %v3616_v2 }
 0x5db   : > { %v3647_v54 = vmax.f32 %v3635_v31, %v3639_v50  ;;  %v3669_v33 = vrot.slane %v3639_v50, 7  ;;  %v3637_v56 = vsel %vm3621_vm3, %v3613_v63, %v3629_v35  ;;  %vm3622_vm5 = vcmp.ge.f32.partialorder %v3614_v6, 0.0 }
 0x5dc   : > { %v3643_v8 = vmax.f32 %v3637_v56, %v3639_v50  ;;  %v3640_v58 = vsel %vm3624_vm4, %v3616_v2, %v3632_v62  ;;  %v3630_v47 = vmul.f32 %v5987_v19, %v3614_v6 }
 0x5dd   : > { %v3651_v42 = vrot.slane %v3647_v54, 7  ;;  %v3674_v60 = vsel %vm519_vm0, -inf, %v3669_v33  ;;  %v3648_v55 = vmax.f32 %v3636_v30, %v3640_v58  ;;  %v3670_v57 = vrot.slane %v3640_v58, 7 }
 0x5de   : > { %v3675_v48 = vsel %vm5559_vm9, -inf, %v3674_v60  ;;  %v3645_v14 = vmax.f32 %v3641_v37, %v3643_v8  ;;  %v3661_v61 = vrot.slane %v3643_v8, 4  ;;  %v3638_v41 = vsel %vm3622_vm5, %v3614_v6, %v3630_v47 }
 0x5df   : > { %v3656_v4 = vsel %vm519_vm0, -inf, %v3651_v42  ;;  %v3679_v38 = vrot.slane %v3675_v48, 4  ;;  %v3652_v43 = vrot.slane %v3648_v55, 7  ;;  %v3671_v44 = vsel %vm519_vm0, %v3669_v33, %v3670_v57 }
 0x5e0   : > { %v3657_v19 = vsel %vm5559_vm9, -inf, %v3656_v4  ;;  %v3666_v5 = vsel %vm884_vm13, -inf, %v3661_v61  ;;  %v3676_v46 = vsel %vm5564_vm11, -inf, %v3671_v44  ;;  %v3644_v24 = vmax.f32 %v3638_v41, %v3640_v58 }
 0x5e1   : > { %v3684_v21 = vsel %vm884_vm13, -inf, %v3679_v38  ;;  %v3685_v16 = vmax.f32 %v3645_v14, %v3657_v19  ;;  %v3680_v11 = vrot.slane %v3676_v46, 4  ;;  %v3653_v13 = vsel %vm519_vm0, %v3651_v42, %v3652_v43 }
 0x5e2   : > { %v3687_v36 = vmax.f32 %v3666_v5, %v3684_v21  ;;  %v3646_v15 = vmax.f32 %v3642_v23, %v3644_v24  ;;  %v3658_v17 = vsel %vm5564_vm11, -inf, %v3653_v13  ;;  %v3662_v10 = vrot.slane %v3644_v24, 4 }
 0x5e3   : > { %v3681_v29 = vsel %vm884_vm13, %v3679_v38, %v3680_v11  ;;  %vm3792_vm0 = vcmask 1046528   ;;  %vm3809_vm9 = vcmask 523264   ;;  %vm3884_vm11 = vcmask 261120  }
 0x5e4   : > { %v3686_v22 = vmax.f32 %v3646_v15, %v3658_v17  ;;  %v3663_v25 = vsel %vm884_vm13, %v3661_v61, %v3662_v10  ;;  %v3689_v9 = vmax.f32 %v3685_v16, %v3687_v36 }
 0x5e5   : > { %v3688_v27 = vmax.f32 %v3663_v25, %v3681_v29 }
 0x5e7   : > { %v3690_v20 = vmax.f32 %v3686_v22, %v3688_v27 }
 0x5e9   : > { %v5024_v45 = vpack.c.bf16 %v3690_v20, %v3689_v9 }
 0x5eb   : > { %5025 = vmatpush3.bf16.msra.mxu1 %v5024_v45 }
 0x5ee   : > { %4981 = vmatmul.mubr.msk.f32.vlgmr.msra.gmra.mrb[42].mxu1 %vm915_vm14, %v5294_v12  ;;  %v4288_v12 = vld [vmem:[%s6372_s6] ss:$0 sm:$0xff] }
 0x6c1   : > { %v3757_v59 = vpop.f32.mrb[42].mxu1 }
 0x6c2   : > { %v3780_v1 = vrot.slane %v3757_v59, 1  ;;  %v4982_v31 = vpop.f32.mrb[43].mxu1 }
 0x6c4   : > { %v3793_v3 = vsel %vm3792_vm0, %v6309_v49, %v3780_v1 }
 0x6c5   : > { %5000 = vmatmul.mubr.msk.f32.vlgmr.msra.gmra.mrb[36].mxu0 %vm3809_vm9, %v3793_v3 }
 0x798   : > { %v3879_v32 = vpop.f32.mrb[36].mxu0 }
 0x799   : > { %v3880_v18 = vadd.f32 %v4288_v12, %v3879_v32  ;;  %v5001_v37 = vpop.f32.mrb[37].mxu0 }
 0x79b   : > { %v3883_v30 = vmax.f32 %v3880_v18, 0.0 }
 0x79d   : > { %3885 = vst.msk [vmem:[%s335_s10] sm:$0xff] %vm3884_vm11, %v3883_v30 }
 0x79e PF: > { %s17_s26 = sadd.s32 1, %s5288_s26   ;;  %s6378_s24 = smov %s5284_s25 }
 0x79f   : > { %p14_p5 = scmp.ge.s32.totalorder %s17_s26, 4   ;;  %s6379_s25 = smov %s6381_s27 }
 0x7a1   :  { %16 = sbr.rel (!%p14_p5) target bundleno = 2 (0x2), region = 95 }

</bundles_post_ra>
